<compile_context>
chip_gen: v7x
topology: tpu7x:2x2x1
jax: 0.10.0
libtpu: 0.0.40
codegen_flags: <defaults>
</compile_context>

<pallas_src>
import jax
import jax.numpy as jnp
from jax import lax
from jax.experimental import pallas as pl
from jax.experimental.pallas import tpu as pltpu


# ------------------------------ fused model kernel -----------------------------
def _fused_kernel(xaug_ref,        # (T*B, 2D)  row-block s = [x[s] | x[T-1-s]]
                  w1_ih_ref,       # (2D, 8H)   block-structured, fused gate cols
                  w1_hh_ref,       # (2H, 8H)   block-diag(fwd, bwd), fused gate cols
                  b1_ref,          # (1, 8H)
                  w2f_ih_f_ref,    # (H, 4H)    layer-2 fwd, rows for h1f, cols [i,f,o,g]
                  w2f_ih_b_ref,    # (H, 4H)    layer-2 fwd, rows for h1b
                  w2f_hh_ref,      # (H, 4H)
                  b2f_ref,         # (1, 4H)
                  w2b_ih_f_ref,    # (H, 4H)    layer-2 bwd (one step only)
                  w2b_ih_b_ref,    # (H, 4H)
                  b2b_ref,         # (1, 4H)
                  wh_f_ref,        # (H, 134)   heads, rows for h2f
                  wh_b_ref,        # (H, 134)   heads, rows for h2b
                  bh_ref,          # (1, 134)
                  out_ref,         # (B, 134)
                  x1pre_ref,       # (T*B, 8H)  scratch: fused layer-1 pre-activations
                  x2pre_ref):      # (T*B, 4H)  scratch: layer-2 fwd pre-activations
    B = out_ref.shape[0]
    TB = xaug_ref.shape[0]
    T = TB // B
    H = w2f_hh_ref.shape[0]

    # ---- hoisted loop-invariant weight loads ----
    w1_hh = w1_hh_ref[...]          # stationary RHS of the fused layer-1 recurrence
    w2f_ih_f = w2f_ih_f_ref[...]
    w2f_ih_b = w2f_ih_b_ref[...]
    w2f_hh = w2f_hh_ref[...]

    # Fused bidirectional cell, gate cols [i_f,i_b,f_f,f_b,o_f,o_b | g_f,g_b].
    def cell_bd(pre, h, c):
        gates = pre + jnp.dot(h, w1_hh, preferred_element_type=jnp.float32)
        sg = jax.nn.sigmoid(gates[:, :6 * H])
        g = jnp.tanh(gates[:, 6 * H:])
        i = sg[:, :2 * H]
        f = sg[:, 2 * H:4 * H]
        o = sg[:, 4 * H:]
        c_new = f * c + i * g
        h_new = o * jnp.tanh(c_new)
        return h_new, c_new

    def cell_bd_first(pre):          # zero state: no recurrent matmul, f*c == 0
        sg = jax.nn.sigmoid(pre[:, :6 * H])
        g = jnp.tanh(pre[:, 6 * H:])
        i = sg[:, :2 * H]
        o = sg[:, 4 * H:]
        c_new = i * g
        h_new = o * jnp.tanh(c_new)
        return h_new, c_new

    # Single-direction cell, gate cols [i, f, o, g].
    def cell(pre, h, c, w_hh):
        gates = pre + jnp.dot(h, w_hh, preferred_element_type=jnp.float32)
        sg = jax.nn.sigmoid(gates[:, :3 * H])
        g = jnp.tanh(gates[:, 3 * H:])
        i = sg[:, :H]
        f = sg[:, H:2 * H]
        o = sg[:, 2 * H:]
        c_new = f * c + i * g
        h_new = o * jnp.tanh(c_new)
        return h_new, c_new

    def cell_first(pre):
        sg = jax.nn.sigmoid(pre[:, :3 * H])
        g = jnp.tanh(pre[:, 3 * H:])
        i = sg[:, :H]
        o = sg[:, 2 * H:]
        c_new = i * g
        h_new = o * jnp.tanh(c_new)
        return h_new, c_new

    # ---- layer-1 input projection: ONE matmul for all steps & both dirs ----
    x1pre_ref[...] = (jnp.dot(xaug_ref[...], w1_ih_ref[...],
                              preferred_element_type=jnp.float32) + b1_ref[...])

    # ---- layer-2 fwd pre-activations: init with bias, accumulated below ----
    x2pre_ref[...] = jnp.broadcast_to(b2f_ref[...], (TB, 4 * H))

    # ---- layer 1: both directions in one fused recurrence ----
    # Step 0: fwd chain at time 0, bwd chain at time T-1, both from zero state.
    h_cat, c_cat = cell_bd_first(x1pre_ref[pl.ds(0, B), :])
    hf = h_cat[:, :H]                 # h1f[0]
    hb = h_cat[:, H:]                 # h1b[T-1]
    x2pre_ref[pl.ds(0, B), :] += jnp.dot(hf, w2f_ih_f,
                                         preferred_element_type=jnp.float32)
    x2pre_ref[pl.ds((T - 1) * B, B), :] += jnp.dot(hb, w2f_ih_b,
                                                   preferred_element_type=jnp.float32)
    # h1b[T-1] contribution to the single layer-2 backward step at t = T-1.
    pre2b_acc = jnp.dot(hb, w2b_ih_b_ref[...], preferred_element_type=jnp.float32)

    for s in range(1, T):
        h_cat, c_cat = cell_bd(x1pre_ref[pl.ds(s * B, B), :], h_cat, c_cat)
        hf = h_cat[:, :H]             # h1f[s]
        hb = h_cat[:, H:]             # h1b[T-1-s]
        # Layer-2 input projection hidden under the latency-bound recurrence.
        x2pre_ref[pl.ds(s * B, B), :] += jnp.dot(
            hf, w2f_ih_f, preferred_element_type=jnp.float32)
        x2pre_ref[pl.ds((T - 1 - s) * B, B), :] += jnp.dot(
            hb, w2f_ih_b, preferred_element_type=jnp.float32)

    # ---- layer-2 backward at output time T-1 == ONE step from zero state ----
    pre2b = (pre2b_acc
             + jnp.dot(h_cat[:, :H], w2b_ih_f_ref[...],       # h1f[T-1]
                       preferred_element_type=jnp.float32)
             + b2b_ref[...])
    h2b, _ = cell_first(pre2b)

    # ---- layer-2 forward recurrence (pre-activations already complete) ----
    h2f, c2f = cell_first(x2pre_ref[pl.ds(0, B), :])
    for t in range(1, T):
        h2f, c2f = cell(x2pre_ref[pl.ds(t * B, B), :], h2f, c2f, w2f_hh)

    # ---- heads: z = [h2f|h2b] @ W + b, cols [t(2), d(2), pi(128), v(2)] ----
    z = (jnp.dot(h2f, wh_f_ref[...], preferred_element_type=jnp.float32)
         + jnp.dot(h2b, wh_b_ref[...], preferred_element_type=jnp.float32)
         + bh_ref[...])                                        # (B, 134)

    lane = lax.broadcasted_iota(jnp.int32, z.shape, 1)
    is_exp = (lane == 1) | (lane == 3) | (lane == 133)         # "scale" columns -> exp
    is_pi = (lane >= 4) & (lane < 132)                         # softmax block

    zp = jnp.where(is_pi, z, -1e30)
    m = jnp.max(zp, axis=1, keepdims=True)
    e = jnp.exp(zp - m)                                        # 0 outside pi block
    p = e / jnp.sum(e, axis=1, keepdims=True)
    pi_out = jnp.log(p + 1e-10)                                # log(softmax + 1e-10)

    out_ref[...] = jnp.where(is_pi, pi_out, jnp.where(is_exp, jnp.exp(z), z))


# -------------------------------- model wrapper --------------------------------
def note_event_predictor(x, kp):
    """x: (B, T, input_dim), batch_first like the PyTorch module."""
    x_tm = jnp.transpose(x, (1, 0, 2)).astype(jnp.float32)     # (T, B, D)
    T, B, D = x_tm.shape
    H = kp["w2f_hh"].shape[0]

    # One-time per-forward layout plumbing: row-block s = [x[s] | x[T-1-s]].
    x_aug = jnp.concatenate([x_tm, jnp.flip(x_tm, axis=0)], axis=-1)
    x_aug = x_aug.reshape(T * B, 2 * D)

    args = (x_aug, kp["w1_ih"], kp["w1_hh"], kp["b1"],
            kp["w2f_ih_f"], kp["w2f_ih_b"], kp["w2f_hh"], kp["b2f"],
            kp["w2b_ih_f"], kp["w2b_ih_b"], kp["b2b"],
            kp["wh_f"], kp["wh_b"], kp["bh"])

    flops = (2 * T * B * (2 * D) * (8 * H)        # layer-1 input projection
             + 2 * T * B * (2 * H) * (8 * H)      # layer-1 fused recurrence
             + 2 * 2 * T * B * H * (4 * H)        # layer-2 input projection
             + 2 * T * B * H * (4 * H)            # layer-2 forward recurrence
             + 2 * 2 * B * H * (4 * H)            # layer-2 backward single step
             + 2 * 2 * B * H * 134)               # heads
    transcendentals = T * B * 16 * H + B * (8 * H + 2 * 134)
    bytes_accessed = sum(int(a.size) * a.dtype.itemsize for a in args) + B * 134 * 4

    return pl.pallas_call(
        _fused_kernel,
        out_shape=jax.ShapeDtypeStruct((B, 134), jnp.float32),
        in_specs=[pl.BlockSpec(memory_space=pltpu.MemorySpace.VMEM)] * len(args),
        out_specs=pl.BlockSpec(memory_space=pltpu.MemorySpace.VMEM),
        scratch_shapes=[
            pltpu.VMEM((T * B, 8 * H), jnp.float32),   # fused layer-1 pre-activations
            pltpu.VMEM((T * B, 4 * H), jnp.float32),   # layer-2 forward pre-activations
        ],
        cost_estimate=pl.CostEstimate(flops=int(flops),
                                      transcendentals=int(transcendentals),
                                      bytes_accessed=int(bytes_accessed)),
    )(*args)


# ------------------------- parameters (raw + kernel prep) ----------------------
def init_params(key, input_dim=4, hidden_size=32, num_layers=2):
    """Raw PyTorch-layout params: w_ih (4H, D_in), w_hh (4H, H), gates [i,f,g,o]."""
    H = hidden_size
    scale = 0.1
    lstm_params = []
    for layer in range(num_layers):
        d_in = input_dim if layer == 0 else 2 * H
        lp = {}
        for tag in ("f", "b"):
            key, k1, k2, k3, k4 = jax.random.split(key, 5)
            lp[f"w_ih_{tag}"] = scale * jax.random.normal(k1, (4 * H, d_in), jnp.float32)
            lp[f"w_hh_{tag}"] = scale * jax.random.normal(k2, (4 * H, H), jnp.float32)
            lp[f"b_ih_{tag}"] = scale * jax.random.normal(k3, (4 * H,), jnp.float32)
            lp[f"b_hh_{tag}"] = scale * jax.random.normal(k4, (4 * H,), jnp.float32)
        lstm_params.append(lp)

    # Heads fused into one (2H, 134) weight, column order [t(2), d(2), pi(128), v(2)].
    key, k1, k2, k3, k4, k5, k6, k7, k8 = jax.random.split(key, 9)
    w1 = scale * jax.random.normal(k1, (2 * H, 2), jnp.float32)
    b1 = scale * jax.random.normal(k2, (2,), jnp.float32)
    w2 = scale * jax.random.normal(k3, (2 * H, 2), jnp.float32)
    b2 = scale * jax.random.normal(k4, (2,), jnp.float32)
    w3 = scale * jax.random.normal(k5, (2 * H, 2), jnp.float32)
    b3 = scale * jax.random.normal(k6, (2,), jnp.float32)
    w4 = scale * jax.random.normal(k7, (2 * H, 128), jnp.float32)
    b4 = scale * jax.random.normal(k8, (128,), jnp.float32)
    w_heads = jnp.concatenate([w1, w2, w4, w3], axis=1)             # (2H, 134)
    b_heads = jnp.concatenate([b1, b2, b4, b3]).reshape(1, 134)     # (1, 134)
    return {"lstm": lstm_params, "w_heads": w_heads, "b_heads": b_heads}


def _gate_cols(w, H):
    """Split (R, 4H) columns into PyTorch gate blocks (i, f, g, o)."""
    return w[:, 0:H], w[:, H:2 * H], w[:, 2 * H:3 * H], w[:, 3 * H:4 * H]


def prepare_params(raw, hidden_size):
    """One-time prep: transposes, fused gate layouts, block-diag fusion, bias folds."""
    H = hidden_size
    assert len(raw["lstm"]) == 2, "fused kernel is specialized to num_layers=2"
    l1, l2 = raw["lstm"]

    # ---- layer 1: fused bidirectional layout [i_f,i_b,f_f,f_b,o_f,o_b,g_f,g_b] ----
    wfi, wff, wfg, wfo = _gate_cols(l1["w_ih_f"].T, H)      # (D, H) each
    wbi, wbf, wbg, wbo = _gate_cols(l1["w_ih_b"].T, H)
    D = wfi.shape[0]
    zD = jnp.zeros((D, H), jnp.float32)
    w1_ih = jnp.concatenate([
        jnp.concatenate([wfi, zD, wff, zD, wfo, zD, wfg, zD], axis=1),   # rows for x[s]
        jnp.concatenate([zD, wbi, zD, wbf, zD, wbo, zD, wbg], axis=1),   # rows for x[T-1-s]
    ], axis=0)                                                            # (2D, 8H)

    hfi, hff, hfg, hfo = _gate_cols(l1["w_hh_f"].T, H)      # (H, H) each
    hbi, hbf, hbg, hbo = _gate_cols(l1["w_hh_b"].T, H)
    zH = jnp.zeros((H, H), jnp.float32)
    w1_hh = jnp.concatenate([
        jnp.concatenate([hfi, zH, hff, zH, hfo, zH, hfg, zH], axis=1),   # rows for h_f
        jnp.concatenate([zH, hbi, zH, hbf, zH, hbo, zH, hbg], axis=1),   # rows for h_b
    ], axis=0)                                                            # (2H, 8H)

    bfv = (l1["b_ih_f"] + l1["b_hh_f"]).reshape(1, 4 * H)
    bbv = (l1["b_ih_b"] + l1["b_hh_b"]).reshape(1, 4 * H)
    bfi, bff, bfg, bfo = _gate_cols(bfv, H)
    bbi, bbf, bbg, bbo = _gate_cols(bbv, H)
    b1 = jnp.concatenate([bfi, bbi, bff, bbf, bfo, bbo, bfg, bbg], axis=1)  # (1, 8H)

    # ---- layer 2: single-direction layout [i, f, o, g] ----
    def prep_dir(w_ih, w_hh, b_ih, b_hh):
        def reorder(w):
            i, f, g, o = _gate_cols(w, H)
            return jnp.concatenate([i, f, o, g], axis=1)
        return (reorder(w_ih.T), reorder(w_hh.T),
                reorder((b_ih + b_hh).reshape(1, 4 * H)))

    w2f_ih, w2f_hh, b2f = prep_dir(l2["w_ih_f"], l2["w_hh_f"],
                                   l2["b_ih_f"], l2["b_hh_f"])
    w2b_ih, _, b2b = prep_dir(l2["w_ih_b"], l2["w_hh_b"],
                              l2["b_ih_b"], l2["b_hh_b"])   # w2b_hh unused (1 step only)

    kp = {
        "w1_ih": w1_ih, "w1_hh": w1_hh, "b1": b1,
        "w2f_ih_f": w2f_ih[:H], "w2f_ih_b": w2f_ih[H:], "w2f_hh": w2f_hh, "b2f": b2f,
        "w2b_ih_f": w2b_ih[:H], "w2b_ih_b": w2b_ih[H:], "b2b": b2b,
        "wh_f": raw["w_heads"][:H], "wh_b": raw["w_heads"][H:], "bh": raw["b_heads"],
    }
    return jax.tree_util.tree_map(lambda a: jnp.asarray(a, jnp.float32), kp)


# ------------------------------ pure-JAX reference -----------------------------
def _ref_lstm_layer(x_tm, w_ih, w_hh, b_ih, b_hh):
    T, B, _ = x_tm.shape
    H = w_hh.shape[1]
    b = b_ih + b_hh

    def step(carry, x_t):
        h, c = carry
        gates = x_t @ w_ih.T + h @ w_hh.T + b
        i = jax.nn.sigmoid(gates[:, 0 * H:1 * H])
        f = jax.nn.sigmoid(gates[:, 1 * H:2 * H])
        g = jnp.tanh(gates[:, 2 * H:3 * H])
        o = jax.nn.sigmoid(gates[:, 3 * H:4 * H])
        c = f * c + i * g
        h = o * jnp.tanh(c)
        return (h, c), h

    init = (jnp.zeros((B, H), jnp.float32), jnp.zeros((B, H), jnp.float32))
    _, hs = lax.scan(step, init, x_tm)
    return hs


def _ref_forward(x, params):
    h = jnp.transpose(x, (1, 0, 2)).astype(jnp.float32)
    for lp in params["lstm"]:
        fwd = _ref_lstm_layer(h, lp["w_ih_f"], lp["w_hh_f"], lp["b_ih_f"], lp["b_hh_f"])
        bwd = jnp.flip(_ref_lstm_layer(jnp.flip(h, 0), lp["w_ih_b"], lp["w_hh_b"],
                                       lp["b_ih_b"], lp["b_hh_b"]), 0)
        h = jnp.concatenate([fwd, bwd], axis=-1)
    last = h[-1]
    z = last @ params["w_heads"] + params["b_heads"]
    t = jnp.concatenate([z[:, 0:1], jnp.exp(z[:, 1:2])], axis=1)
    d = jnp.concatenate([z[:, 2:3], jnp.exp(z[:, 3:4])], axis=1)
    pi = jax.nn.softmax(z[:, 4:132], axis=1)
    log_pi = jnp.log(pi + 1e-10)
    v = jnp.concatenate([z[:, 132:133], jnp.exp(z[:, 133:134])], axis=1)
    return jnp.concatenate([t, d, log_pi, v], axis=1)


# ------------------------------------ main -------------------------------------
if __name__ == "__main__":
    B, T, INPUT_DIM, HIDDEN = 2, 8, 4, 32

    key = jax.random.PRNGKey(0)
    key, kx = jax.random.split(key)
    x = jax.random.normal(kx, (B, T, INPUT_DIM), jnp.float32)

    raw_params = init_params(key, input_dim=INPUT_DIM, hidden_size=HIDDEN, num_layers=2)
    kernel_params = prepare_params(raw_params, HIDDEN)      # one-time weight prep

    fwd = jax.jit(note_event_predictor)
    out = jax.block_until_ready(fwd(x, kernel_params))
    assert out.shape == (B, 2 + 2 + 128 + 2), out.shape

    ref = jax.block_until_ready(_ref_forward(x, raw_params))
    assert jnp.allclose(out, ref, rtol=2e-3, atol=2e-3), float(jnp.max(jnp.abs(out - ref)))

    print("KERNEL_OK")
</pallas_src>

<mosaic_0001>
module attributes {stable_mosaic.version = 11 : i64} {
  func.func @_fused_kernel(%arg0: memref<16x8xf32, #tpu.memory_space<vmem>>, %arg1: memref<8x256xf32, #tpu.memory_space<vmem>>, %arg2: memref<64x256xf32, #tpu.memory_space<vmem>>, %arg3: memref<1x256xf32, #tpu.memory_space<vmem>>, %arg4: memref<32x128xf32, #tpu.memory_space<vmem>>, %arg5: memref<32x128xf32, #tpu.memory_space<vmem>>, %arg6: memref<32x128xf32, #tpu.memory_space<vmem>>, %arg7: memref<1x128xf32, #tpu.memory_space<vmem>>, %arg8: memref<32x128xf32, #tpu.memory_space<vmem>>, %arg9: memref<32x128xf32, #tpu.memory_space<vmem>>, %arg10: memref<1x128xf32, #tpu.memory_space<vmem>>, %arg11: memref<32x134xf32, #tpu.memory_space<vmem>>, %arg12: memref<32x134xf32, #tpu.memory_space<vmem>>, %arg13: memref<1x134xf32, #tpu.memory_space<vmem>>, %arg14: memref<2x134xf32, #tpu.memory_space<vmem>>, %arg15: memref<16x256xf32, #tpu.memory_space<vmem>>, %arg16: memref<16x128xf32, #tpu.memory_space<vmem>>) attributes {dimension_semantics = [], scalar_prefetch = 0 : i64, scratch_operands = 2 : i64, tpu.core_type = #tpu.core_type<tc>} {
    %c0 = arith.constant 0 : index
    %c0_0 = arith.constant 0 : index
    %0 = vector.load %arg2[%c0, %c0_0] : memref<64x256xf32, #tpu.memory_space<vmem>>, vector<64x256xf32>
    %c0_1 = arith.constant 0 : index
    %c0_2 = arith.constant 0 : index
    %1 = vector.load %arg4[%c0_1, %c0_2] : memref<32x128xf32, #tpu.memory_space<vmem>>, vector<32x128xf32>
    %c0_3 = arith.constant 0 : index
    %c0_4 = arith.constant 0 : index
    %2 = vector.load %arg5[%c0_3, %c0_4] : memref<32x128xf32, #tpu.memory_space<vmem>>, vector<32x128xf32>
    %c0_5 = arith.constant 0 : index
    %c0_6 = arith.constant 0 : index
    %3 = vector.load %arg6[%c0_5, %c0_6] : memref<32x128xf32, #tpu.memory_space<vmem>>, vector<32x128xf32>
    %c0_7 = arith.constant 0 : index
    %c0_8 = arith.constant 0 : index
    %4 = vector.load %arg0[%c0_7, %c0_8] : memref<16x8xf32, #tpu.memory_space<vmem>>, vector<16x8xf32>
    %c0_9 = arith.constant 0 : index
    %c0_10 = arith.constant 0 : index
    %5 = vector.load %arg1[%c0_9, %c0_10] : memref<8x256xf32, #tpu.memory_space<vmem>>, vector<8x256xf32>
    %cst = arith.constant dense<0.000000e+00> : vector<16x256xf32>
    %6 = tpu.matmul %4, %5, %cst {dimension_numbers = #tpu.dot_dimension_numbers<[1], [0], [0], [1], [0, 0, 1, 1], [], []>} : vector<16x8xf32>, vector<8x256xf32>, vector<16x256xf32> -> vector<16x256xf32>
    %c0_11 = arith.constant 0 : index
    %c0_12 = arith.constant 0 : index
    %7 = vector.load %arg3[%c0_11, %c0_12] : memref<1x256xf32, #tpu.memory_space<vmem>>, vector<1x256xf32>
    %8 = vector.broadcast %7 : vector<1x256xf32> to vector<16x256xf32>
    %9 = arith.addf %6, %8 : vector<16x256xf32>
    %c0_13 = arith.constant 0 : index
    %c0_14 = arith.constant 0 : index
    %10 = vector.load %arg15[%c0_13, %c0_14] : memref<16x256xf32, #tpu.memory_space<vmem>>, vector<16x256xf32>
    tpu.vector_store %arg15[%c0_13, %c0_14], %9 {strides = array<i32>} : memref<16x256xf32, #tpu.memory_space<vmem>>, vector<16x256xf32>,
    %c0_15 = arith.constant 0 : index
    %c0_16 = arith.constant 0 : index
    %11 = vector.load %arg7[%c0_15, %c0_16] : memref<1x128xf32, #tpu.memory_space<vmem>>, vector<1x128xf32>
    %12 = vector.shape_cast %11 : vector<1x128xf32> to vector<1x128xf32>
    %13 = vector.broadcast %12 : vector<1x128xf32> to vector<16x128xf32>
    %c0_17 = arith.constant 0 : index
    %c0_18 = arith.constant 0 : index
    %14 = vector.load %arg16[%c0_17, %c0_18] : memref<16x128xf32, #tpu.memory_space<vmem>>, vector<16x128xf32>
    tpu.vector_store %arg16[%c0_17, %c0_18], %13 {strides = array<i32>} : memref<16x128xf32, #tpu.memory_space<vmem>>, vector<16x128xf32>,
    %c0_19 = arith.constant 0 : index
    %c0_20 = arith.constant 0 : index
    %15 = vector.load %arg15[%c0_19, %c0_20] : memref<16x256xf32, #tpu.memory_space<vmem>>, vector<2x256xf32>
    %16 = vector.extract_strided_slice %15 {offsets = [0, 0], sizes = [2, 192], strides = [1, 1]} : vector<2x256xf32> to vector<2x192xf32>
    %17 = arith.negf %16 : vector<2x192xf32>
    %18 = math.exp %17 : vector<2x192xf32>
    %cst_21 = arith.constant 1.000000e+00 : f32
    %19 = vector.broadcast %cst_21 : f32 to vector<2x192xf32>
    %20 = arith.addf %19, %18 : vector<2x192xf32>
    %21 = arith.divf %19, %20 : vector<2x192xf32>
    %22 = vector.extract_strided_slice %15 {offsets = [0, 192], sizes = [2, 64], strides = [1, 1]} : vector<2x256xf32> to vector<2x64xf32>
    %23 = math.tanh %22 : vector<2x64xf32>
    %24 = vector.extract_strided_slice %21 {offsets = [0, 0], sizes = [2, 64], strides = [1, 1]} : vector<2x192xf32> to vector<2x64xf32>
    %25 = vector.extract_strided_slice %21 {offsets = [0, 128], sizes = [2, 64], strides = [1, 1]} : vector<2x192xf32> to vector<2x64xf32>
    %26 = arith.mulf %24, %23 : vector<2x64xf32>
    %27 = math.tanh %26 : vector<2x64xf32>
    %28 = arith.mulf %25, %27 : vector<2x64xf32>
    %29 = vector.extract_strided_slice %28 {offsets = [0, 0], sizes = [2, 32], strides = [1, 1]} : vector<2x64xf32> to vector<2x32xf32>
    %30 = vector.extract_strided_slice %28 {offsets = [0, 32], sizes = [2, 32], strides = [1, 1]} : vector<2x64xf32> to vector<2x32xf32>
    %c0_22 = arith.constant 0 : index
    %c0_23 = arith.constant 0 : index
    %31 = vector.load %arg16[%c0_22, %c0_23] : memref<16x128xf32, #tpu.memory_space<vmem>>, vector<2x128xf32>
    %cst_24 = arith.constant dense<0.000000e+00> : vector<2x128xf32>
    %32 = tpu.matmul %29, %1, %cst_24 {dimension_numbers = #tpu.dot_dimension_numbers<[1], [0], [0], [1], [0, 0, 1, 1], [], []>} : vector<2x32xf32>, vector<32x128xf32>, vector<2x128xf32> -> vector<2x128xf32>
    %33 = arith.addf %31, %32 : vector<2x128xf32>
    %c0_25 = arith.constant 0 : index
    %c0_26 = arith.constant 0 : index
    %34 = vector.load %arg16[%c0_25, %c0_26] : memref<16x128xf32, #tpu.memory_space<vmem>>, vector<2x128xf32>
    tpu.vector_store %arg16[%c0_25, %c0_26], %33 {strides = array<i32>} : memref<16x128xf32, #tpu.memory_space<vmem>>, vector<2x128xf32>,
    %c14 = arith.constant 14 : index
    %c0_27 = arith.constant 0 : index
    %35 = vector.load %arg16[%c14, %c0_27] : memref<16x128xf32, #tpu.memory_space<vmem>>, vector<2x128xf32>
    %cst_28 = arith.constant dense<0.000000e+00> : vector<2x128xf32>
    %36 = tpu.matmul %30, %2, %cst_28 {dimension_numbers = #tpu.dot_dimension_numbers<[1], [0], [0], [1], [0, 0, 1, 1], [], []>} : vector<2x32xf32>, vector<32x128xf32>, vector<2x128xf32> -> vector<2x128xf32>
    %37 = arith.addf %35, %36 : vector<2x128xf32>
    %c14_29 = arith.constant 14 : index
    %c0_30 = arith.constant 0 : index
    %38 = vector.load %arg16[%c14_29, %c0_30] : memref<16x128xf32, #tpu.memory_space<vmem>>, vector<2x128xf32>
    tpu.vector_store %arg16[%c14_29, %c0_30], %37 {strides = array<i32>} : memref<16x128xf32, #tpu.memory_space<vmem>>, vector<2x128xf32>,
    %c0_31 = arith.constant 0 : index
    %c0_32 = arith.constant 0 : index
    %39 = vector.load %arg9[%c0_31, %c0_32] : memref<32x128xf32, #tpu.memory_space<vmem>>, vector<32x128xf32>
    %cst_33 = arith.constant dense<0.000000e+00> : vector<2x128xf32>
    %40 = tpu.matmul %30, %39, %cst_33 {dimension_numbers = #tpu.dot_dimension_numbers<[1], [0], [0], [1], [0, 0, 1, 1], [], []>} : vector<2x32xf32>, vector<32x128xf32>, vector<2x128xf32> -> vector<2x128xf32>
    %c2 = arith.constant 2 : index
    %c0_34 = arith.constant 0 : index
    %41 = vector.load %arg15[%c2, %c0_34] : memref<16x256xf32, #tpu.memory_space<vmem>>, vector<2x256xf32>
    %cst_35 = arith.constant dense<0.000000e+00> : vector<2x256xf32>
    %42 = tpu.matmul %28, %0, %cst_35 {dimension_numbers = #tpu.dot_dimension_numbers<[1], [0], [0], [1], [0, 0, 1, 1], [], []>} : vector<2x64xf32>, vector<64x256xf32>, vector<2x256xf32> -> vector<2x256xf32>
    %43 = arith.addf %41, %42 : vector<2x256xf32>
    %44 = vector.extract_strided_slice %43 {offsets = [0, 0], sizes = [2, 192], strides = [1, 1]} : vector<2x256xf32> to vector<2x192xf32>
    %45 = arith.negf %44 : vector<2x192xf32>
    %46 = math.exp %45 : vector<2x192xf32>
    %cst_36 = arith.constant 1.000000e+00 : f32
    %47 = vector.broadcast %cst_36 : f32 to vector<2x192xf32>
    %48 = arith.addf %47, %46 : vector<2x192xf32>
    %49 = arith.divf %47, %48 : vector<2x192xf32>
    %50 = vector.extract_strided_slice %43 {offsets = [0, 192], sizes = [2, 64], strides = [1, 1]} : vector<2x256xf32> to vector<2x64xf32>
    %51 = math.tanh %50 : vector<2x64xf32>
    %52 = vector.extract_strided_slice %49 {offsets = [0, 0], sizes = [2, 64], strides = [1, 1]} : vector<2x192xf32> to vector<2x64xf32>
    %53 = vector.extract_strided_slice %49 {offsets = [0, 64], sizes = [2, 64], strides = [1, 1]} : vector<2x192xf32> to vector<2x64xf32>
    %54 = vector.extract_strided_slice %49 {offsets = [0, 128], sizes = [2, 64], strides = [1, 1]} : vector<2x192xf32> to vector<2x64xf32>
    %55 = arith.mulf %53, %26 : vector<2x64xf32>
    %56 = arith.mulf %52, %51 : vector<2x64xf32>
    %57 = arith.addf %55, %56 : vector<2x64xf32>
    %58 = math.tanh %57 : vector<2x64xf32>
    %59 = arith.mulf %54, %58 : vector<2x64xf32>
    %60 = vector.extract_strided_slice %59 {offsets = [0, 0], sizes = [2, 32], strides = [1, 1]} : vector<2x64xf32> to vector<2x32xf32>
    %61 = vector.extract_strided_slice %59 {offsets = [0, 32], sizes = [2, 32], strides = [1, 1]} : vector<2x64xf32> to vector<2x32xf32>
    %c2_37 = arith.constant 2 : index
    %c0_38 = arith.constant 0 : index
    %62 = vector.load %arg16[%c2_37, %c0_38] : memref<16x128xf32, #tpu.memory_space<vmem>>, vector<2x128xf32>
    %cst_39 = arith.constant dense<0.000000e+00> : vector<2x128xf32>
    %63 = tpu.matmul %60, %1, %cst_39 {dimension_numbers = #tpu.dot_dimension_numbers<[1], [0], [0], [1], [0, 0, 1, 1], [], []>} : vector<2x32xf32>, vector<32x128xf32>, vector<2x128xf32> -> vector<2x128xf32>
    %64 = arith.addf %62, %63 : vector<2x128xf32>
    %c2_40 = arith.constant 2 : index
    %c0_41 = arith.constant 0 : index
    %65 = vector.load %arg16[%c2_40, %c0_41] : memref<16x128xf32, #tpu.memory_space<vmem>>, vector<2x128xf32>
    tpu.vector_store %arg16[%c2_40, %c0_41], %64 {strides = array<i32>} : memref<16x128xf32, #tpu.memory_space<vmem>>, vector<2x128xf32>,
    %c12 = arith.constant 12 : index
    %c0_42 = arith.constant 0 : index
    %66 = vector.load %arg16[%c12, %c0_42] : memref<16x128xf32, #tpu.memory_space<vmem>>, vector<2x128xf32>
    %cst_43 = arith.constant dense<0.000000e+00> : vector<2x128xf32>
    %67 = tpu.matmul %61, %2, %cst_43 {dimension_numbers = #tpu.dot_dimension_numbers<[1], [0], [0], [1], [0, 0, 1, 1], [], []>} : vector<2x32xf32>, vector<32x128xf32>, vector<2x128xf32> -> vector<2x128xf32>
    %68 = arith.addf %66, %67 : vector<2x128xf32>
    %c12_44 = arith.constant 12 : index
    %c0_45 = arith.constant 0 : index
    %69 = vector.load %arg16[%c12_44, %c0_45] : memref<16x128xf32, #tpu.memory_space<vmem>>, vector<2x128xf32>
    tpu.vector_store %arg16[%c12_44, %c0_45], %68 {strides = array<i32>} : memref<16x128xf32, #tpu.memory_space<vmem>>, vector<2x128xf32>,
    %c4 = arith.constant 4 : index
    %c0_46 = arith.constant 0 : index
    %70 = vector.load %arg15[%c4, %c0_46] : memref<16x256xf32, #tpu.memory_space<vmem>>, vector<2x256xf32>
    %cst_47 = arith.constant dense<0.000000e+00> : vector<2x256xf32>
    %71 = tpu.matmul %59, %0, %cst_47 {dimension_numbers = #tpu.dot_dimension_numbers<[1], [0], [0], [1], [0, 0, 1, 1], [], []>} : vector<2x64xf32>, vector<64x256xf32>, vector<2x256xf32> -> vector<2x256xf32>
    %72 = arith.addf %70, %71 : vector<2x256xf32>
    %73 = vector.extract_strided_slice %72 {offsets = [0, 0], sizes = [2, 192], strides = [1, 1]} : vector<2x256xf32> to vector<2x192xf32>
    %74 = arith.negf %73 : vector<2x192xf32>
    %75 = math.exp %74 : vector<2x192xf32>
    %cst_48 = arith.constant 1.000000e+00 : f32
    %76 = vector.broadcast %cst_48 : f32 to vector<2x192xf32>
    %77 = arith.addf %76, %75 : vector<2x192xf32>
    %78 = arith.divf %76, %77 : vector<2x192xf32>
    %79 = vector.extract_strided_slice %72 {offsets = [0, 192], sizes = [2, 64], strides = [1, 1]} : vector<2x256xf32> to vector<2x64xf32>
    %80 = math.tanh %79 : vector<2x64xf32>
    %81 = vector.extract_strided_slice %78 {offsets = [0, 0], sizes = [2, 64], strides = [1, 1]} : vector<2x192xf32> to vector<2x64xf32>
    %82 = vector.extract_strided_slice %78 {offsets = [0, 64], sizes = [2, 64], strides = [1, 1]} : vector<2x192xf32> to vector<2x64xf32>
    %83 = vector.extract_strided_slice %78 {offsets = [0, 128], sizes = [2, 64], strides = [1, 1]} : vector<2x192xf32> to vector<2x64xf32>
    %84 = arith.mulf %82, %57 : vector<2x64xf32>
    %85 = arith.mulf %81, %80 : vector<2x64xf32>
    %86 = arith.addf %84, %85 : vector<2x64xf32>
    %87 = math.tanh %86 : vector<2x64xf32>
    %88 = arith.mulf %83, %87 : vector<2x64xf32>
    %89 = vector.extract_strided_slice %88 {offsets = [0, 0], sizes = [2, 32], strides = [1, 1]} : vector<2x64xf32> to vector<2x32xf32>
    %90 = vector.extract_strided_slice %88 {offsets = [0, 32], sizes = [2, 32], strides = [1, 1]} : vector<2x64xf32> to vector<2x32xf32>
    %c4_49 = arith.constant 4 : index
    %c0_50 = arith.constant 0 : index
    %91 = vector.load %arg16[%c4_49, %c0_50] : memref<16x128xf32, #tpu.memory_space<vmem>>, vector<2x128xf32>
    %cst_51 = arith.constant dense<0.000000e+00> : vector<2x128xf32>
    %92 = tpu.matmul %89, %1, %cst_51 {dimension_numbers = #tpu.dot_dimension_numbers<[1], [0], [0], [1], [0, 0, 1, 1], [], []>} : vector<2x32xf32>, vector<32x128xf32>, vector<2x128xf32> -> vector<2x128xf32>
    %93 = arith.addf %91, %92 : vector<2x128xf32>
    %c4_52 = arith.constant 4 : index
    %c0_53 = arith.constant 0 : index
    %94 = vector.load %arg16[%c4_52, %c0_53] : memref<16x128xf32, #tpu.memory_space<vmem>>, vector<2x128xf32>
    tpu.vector_store %arg16[%c4_52, %c0_53], %93 {strides = array<i32>} : memref<16x128xf32, #tpu.memory_space<vmem>>, vector<2x128xf32>,
    %c10 = arith.constant 10 : index
    %c0_54 = arith.constant 0 : index
    %95 = vector.load %arg16[%c10, %c0_54] : memref<16x128xf32, #tpu.memory_space<vmem>>, vector<2x128xf32>
    %cst_55 = arith.constant dense<0.000000e+00> : vector<2x128xf32>
    %96 = tpu.matmul %90, %2, %cst_55 {dimension_numbers = #tpu.dot_dimension_numbers<[1], [0], [0], [1], [0, 0, 1, 1], [], []>} : vector<2x32xf32>, vector<32x128xf32>, vector<2x128xf32> -> vector<2x128xf32>
    %97 = arith.addf %95, %96 : vector<2x128xf32>
    %c10_56 = arith.constant 10 : index
    %c0_57 = arith.constant 0 : index
    %98 = vector.load %arg16[%c10_56, %c0_57] : memref<16x128xf32, #tpu.memory_space<vmem>>, vector<2x128xf32>
    tpu.vector_store %arg16[%c10_56, %c0_57], %97 {strides = array<i32>} : memref<16x128xf32, #tpu.memory_space<vmem>>, vector<2x128xf32>,
    %c6 = arith.constant 6 : index
    %c0_58 = arith.constant 0 : index
    %99 = vector.load %arg15[%c6, %c0_58] : memref<16x256xf32, #tpu.memory_space<vmem>>, vector<2x256xf32>
    %cst_59 = arith.constant dense<0.000000e+00> : vector<2x256xf32>
    %100 = tpu.matmul %88, %0, %cst_59 {dimension_numbers = #tpu.dot_dimension_numbers<[1], [0], [0], [1], [0, 0, 1, 1], [], []>} : vector<2x64xf32>, vector<64x256xf32>, vector<2x256xf32> -> vector<2x256xf32>
    %101 = arith.addf %99, %100 : vector<2x256xf32>
    %102 = vector.extract_strided_slice %101 {offsets = [0, 0], sizes = [2, 192], strides = [1, 1]} : vector<2x256xf32> to vector<2x192xf32>
    %103 = arith.negf %102 : vector<2x192xf32>
    %104 = math.exp %103 : vector<2x192xf32>
    %cst_60 = arith.constant 1.000000e+00 : f32
    %105 = vector.broadcast %cst_60 : f32 to vector<2x192xf32>
    %106 = arith.addf %105, %104 : vector<2x192xf32>
    %107 = arith.divf %105, %106 : vector<2x192xf32>
    %108 = vector.extract_strided_slice %101 {offsets = [0, 192], sizes = [2, 64], strides = [1, 1]} : vector<2x256xf32> to vector<2x64xf32>
    %109 = math.tanh %108 : vector<2x64xf32>
    %110 = vector.extract_strided_slice %107 {offsets = [0, 0], sizes = [2, 64], strides = [1, 1]} : vector<2x192xf32> to vector<2x64xf32>
    %111 = vector.extract_strided_slice %107 {offsets = [0, 64], sizes = [2, 64], strides = [1, 1]} : vector<2x192xf32> to vector<2x64xf32>
    %112 = vector.extract_strided_slice %107 {offsets = [0, 128], sizes = [2, 64], strides = [1, 1]} : vector<2x192xf32> to vector<2x64xf32>
    %113 = arith.mulf %111, %86 : vector<2x64xf32>
    %114 = arith.mulf %110, %109 : vector<2x64xf32>
    %115 = arith.addf %113, %114 : vector<2x64xf32>
    %116 = math.tanh %115 : vector<2x64xf32>
    %117 = arith.mulf %112, %116 : vector<2x64xf32>
    %118 = vector.extract_strided_slice %117 {offsets = [0, 0], sizes = [2, 32], strides = [1, 1]} : vector<2x64xf32> to vector<2x32xf32>
    %119 = vector.extract_strided_slice %117 {offsets = [0, 32], sizes = [2, 32], strides = [1, 1]} : vector<2x64xf32> to vector<2x32xf32>
    %c6_61 = arith.constant 6 : index
    %c0_62 = arith.constant 0 : index
    %120 = vector.load %arg16[%c6_61, %c0_62] : memref<16x128xf32, #tpu.memory_space<vmem>>, vector<2x128xf32>
    %cst_63 = arith.constant dense<0.000000e+00> : vector<2x128xf32>
    %121 = tpu.matmul %118, %1, %cst_63 {dimension_numbers = #tpu.dot_dimension_numbers<[1], [0], [0], [1], [0, 0, 1, 1], [], []>} : vector<2x32xf32>, vector<32x128xf32>, vector<2x128xf32> -> vector<2x128xf32>
    %122 = arith.addf %120, %121 : vector<2x128xf32>
    %c6_64 = arith.constant 6 : index
    %c0_65 = arith.constant 0 : index
    %123 = vector.load %arg16[%c6_64, %c0_65] : memref<16x128xf32, #tpu.memory_space<vmem>>, vector<2x128xf32>
    tpu.vector_store %arg16[%c6_64, %c0_65], %122 {strides = array<i32>} : memref<16x128xf32, #tpu.memory_space<vmem>>, vector<2x128xf32>,
    %c8 = arith.constant 8 : index
    %c0_66 = arith.constant 0 : index
    %124 = vector.load %arg16[%c8, %c0_66] : memref<16x128xf32, #tpu.memory_space<vmem>>, vector<2x128xf32>
    %cst_67 = arith.constant dense<0.000000e+00> : vector<2x128xf32>
    %125 = tpu.matmul %119, %2, %cst_67 {dimension_numbers = #tpu.dot_dimension_numbers<[1], [0], [0], [1], [0, 0, 1, 1], [], []>} : vector<2x32xf32>, vector<32x128xf32>, vector<2x128xf32> -> vector<2x128xf32>
    %126 = arith.addf %124, %125 : vector<2x128xf32>
    %c8_68 = arith.constant 8 : index
    %c0_69 = arith.constant 0 : index
    %127 = vector.load %arg16[%c8_68, %c0_69] : memref<16x128xf32, #tpu.memory_space<vmem>>, vector<2x128xf32>
    tpu.vector_store %arg16[%c8_68, %c0_69], %126 {strides = array<i32>} : memref<16x128xf32, #tpu.memory_space<vmem>>, vector<2x128xf32>,
    %c8_70 = arith.constant 8 : index
    %c0_71 = arith.constant 0 : index
    %128 = vector.load %arg15[%c8_70, %c0_71] : memref<16x256xf32, #tpu.memory_space<vmem>>, vector<2x256xf32>
    %cst_72 = arith.constant dense<0.000000e+00> : vector<2x256xf32>
    %129 = tpu.matmul %117, %0, %cst_72 {dimension_numbers = #tpu.dot_dimension_numbers<[1], [0], [0], [1], [0, 0, 1, 1], [], []>} : vector<2x64xf32>, vector<64x256xf32>, vector<2x256xf32> -> vector<2x256xf32>
    %130 = arith.addf %128, %129 : vector<2x256xf32>
    %131 = vector.extract_strided_slice %130 {offsets = [0, 0], sizes = [2, 192], strides = [1, 1]} : vector<2x256xf32> to vector<2x192xf32>
    %132 = arith.negf %131 : vector<2x192xf32>
    %133 = math.exp %132 : vector<2x192xf32>
    %cst_73 = arith.constant 1.000000e+00 : f32
    %134 = vector.broadcast %cst_73 : f32 to vector<2x192xf32>
    %135 = arith.addf %134, %133 : vector<2x192xf32>
    %136 = arith.divf %134, %135 : vector<2x192xf32>
    %137 = vector.extract_strided_slice %130 {offsets = [0, 192], sizes = [2, 64], strides = [1, 1]} : vector<2x256xf32> to vector<2x64xf32>
    %138 = math.tanh %137 : vector<2x64xf32>
    %139 = vector.extract_strided_slice %136 {offsets = [0, 0], sizes = [2, 64], strides = [1, 1]} : vector<2x192xf32> to vector<2x64xf32>
    %140 = vector.extract_strided_slice %136 {offsets = [0, 64], sizes = [2, 64], strides = [1, 1]} : vector<2x192xf32> to vector<2x64xf32>
    %141 = vector.extract_strided_slice %136 {offsets = [0, 128], sizes = [2, 64], strides = [1, 1]} : vector<2x192xf32> to vector<2x64xf32>
    %142 = arith.mulf %140, %115 : vector<2x64xf32>
    %143 = arith.mulf %139, %138 : vector<2x64xf32>
    %144 = arith.addf %142, %143 : vector<2x64xf32>
    %145 = math.tanh %144 : vector<2x64xf32>
    %146 = arith.mulf %141, %145 : vector<2x64xf32>
    %147 = vector.extract_strided_slice %146 {offsets = [0, 0], sizes = [2, 32], strides = [1, 1]} : vector<2x64xf32> to vector<2x32xf32>
    %148 = vector.extract_strided_slice %146 {offsets = [0, 32], sizes = [2, 32], strides = [1, 1]} : vector<2x64xf32> to vector<2x32xf32>
    %c8_74 = arith.constant 8 : index
    %c0_75 = arith.constant 0 : index
    %149 = vector.load %arg16[%c8_74, %c0_75] : memref<16x128xf32, #tpu.memory_space<vmem>>, vector<2x128xf32>
    %cst_76 = arith.constant dense<0.000000e+00> : vector<2x128xf32>
    %150 = tpu.matmul %147, %1, %cst_76 {dimension_numbers = #tpu.dot_dimension_numbers<[1], [0], [0], [1], [0, 0, 1, 1], [], []>} : vector<2x32xf32>, vector<32x128xf32>, vector<2x128xf32> -> vector<2x128xf32>
    %151 = arith.addf %149, %150 : vector<2x128xf32>
    %c8_77 = arith.constant 8 : index
    %c0_78 = arith.constant 0 : index
    %152 = vector.load %arg16[%c8_77, %c0_78] : memref<16x128xf32, #tpu.memory_space<vmem>>, vector<2x128xf32>
    tpu.vector_store %arg16[%c8_77, %c0_78], %151 {strides = array<i32>} : memref<16x128xf32, #tpu.memory_space<vmem>>, vector<2x128xf32>,
    %c6_79 = arith.constant 6 : index
    %c0_80 = arith.constant 0 : index
    %153 = vector.load %arg16[%c6_79, %c0_80] : memref<16x128xf32, #tpu.memory_space<vmem>>, vector<2x128xf32>
    %cst_81 = arith.constant dense<0.000000e+00> : vector<2x128xf32>
    %154 = tpu.matmul %148, %2, %cst_81 {dimension_numbers = #tpu.dot_dimension_numbers<[1], [0], [0], [1], [0, 0, 1, 1], [], []>} : vector<2x32xf32>, vector<32x128xf32>, vector<2x128xf32> -> vector<2x128xf32>
    %155 = arith.addf %153, %154 : vector<2x128xf32>
    %c6_82 = arith.constant 6 : index
    %c0_83 = arith.constant 0 : index
    %156 = vector.load %arg16[%c6_82, %c0_83] : memref<16x128xf32, #tpu.memory_space<vmem>>, vector<2x128xf32>
    tpu.vector_store %arg16[%c6_82, %c0_83], %155 {strides = array<i32>} : memref<16x128xf32, #tpu.memory_space<vmem>>, vector<2x128xf32>,
    %c10_84 = arith.constant 10 : index
    %c0_85 = arith.constant 0 : index
    %157 = vector.load %arg15[%c10_84, %c0_85] : memref<16x256xf32, #tpu.memory_space<vmem>>, vector<2x256xf32>
    %cst_86 = arith.constant dense<0.000000e+00> : vector<2x256xf32>
    %158 = tpu.matmul %146, %0, %cst_86 {dimension_numbers = #tpu.dot_dimension_numbers<[1], [0], [0], [1], [0, 0, 1, 1], [], []>} : vector<2x64xf32>, vector<64x256xf32>, vector<2x256xf32> -> vector<2x256xf32>
    %159 = arith.addf %157, %158 : vector<2x256xf32>
    %160 = vector.extract_strided_slice %159 {offsets = [0, 0], sizes = [2, 192], strides = [1, 1]} : vector<2x256xf32> to vector<2x192xf32>
    %161 = arith.negf %160 : vector<2x192xf32>
    %162 = math.exp %161 : vector<2x192xf32>
    %cst_87 = arith.constant 1.000000e+00 : f32
    %163 = vector.broadcast %cst_87 : f32 to vector<2x192xf32>
    %164 = arith.addf %163, %162 : vector<2x192xf32>
    %165 = arith.divf %163, %164 : vector<2x192xf32>
    %166 = vector.extract_strided_slice %159 {offsets = [0, 192], sizes = [2, 64], strides = [1, 1]} : vector<2x256xf32> to vector<2x64xf32>
    %167 = math.tanh %166 : vector<2x64xf32>
    %168 = vector.extract_strided_slice %165 {offsets = [0, 0], sizes = [2, 64], strides = [1, 1]} : vector<2x192xf32> to vector<2x64xf32>
    %169 = vector.extract_strided_slice %165 {offsets = [0, 64], sizes = [2, 64], strides = [1, 1]} : vector<2x192xf32> to vector<2x64xf32>
    %170 = vector.extract_strided_slice %165 {offsets = [0, 128], sizes = [2, 64], strides = [1, 1]} : vector<2x192xf32> to vector<2x64xf32>
    %171 = arith.mulf %169, %144 : vector<2x64xf32>
    %172 = arith.mulf %168, %167 : vector<2x64xf32>
    %173 = arith.addf %171, %172 : vector<2x64xf32>
    %174 = math.tanh %173 : vector<2x64xf32>
    %175 = arith.mulf %170, %174 : vector<2x64xf32>
    %176 = vector.extract_strided_slice %175 {offsets = [0, 0], sizes = [2, 32], strides = [1, 1]} : vector<2x64xf32> to vector<2x32xf32>
    %177 = vector.extract_strided_slice %175 {offsets = [0, 32], sizes = [2, 32], strides = [1, 1]} : vector<2x64xf32> to vector<2x32xf32>
    %c10_88 = arith.constant 10 : index
    %c0_89 = arith.constant 0 : index
    %178 = vector.load %arg16[%c10_88, %c0_89] : memref<16x128xf32, #tpu.memory_space<vmem>>, vector<2x128xf32>
    %cst_90 = arith.constant dense<0.000000e+00> : vector<2x128xf32>
    %179 = tpu.matmul %176, %1, %cst_90 {dimension_numbers = #tpu.dot_dimension_numbers<[1], [0], [0], [1], [0, 0, 1, 1], [], []>} : vector<2x32xf32>, vector<32x128xf32>, vector<2x128xf32> -> vector<2x128xf32>
    %180 = arith.addf %178, %179 : vector<2x128xf32>
    %c10_91 = arith.constant 10 : index
    %c0_92 = arith.constant 0 : index
    %181 = vector.load %arg16[%c10_91, %c0_92] : memref<16x128xf32, #tpu.memory_space<vmem>>, vector<2x128xf32>
    tpu.vector_store %arg16[%c10_91, %c0_92], %180 {strides = array<i32>} : memref<16x128xf32, #tpu.memory_space<vmem>>, vector<2x128xf32>,
    %c4_93 = arith.constant 4 : index
    %c0_94 = arith.constant 0 : index
    %182 = vector.load %arg16[%c4_93, %c0_94] : memref<16x128xf32, #tpu.memory_space<vmem>>, vector<2x128xf32>
    %cst_95 = arith.constant dense<0.000000e+00> : vector<2x128xf32>
    %183 = tpu.matmul %177, %2, %cst_95 {dimension_numbers = #tpu.dot_dimension_numbers<[1], [0], [0], [1], [0, 0, 1, 1], [], []>} : vector<2x32xf32>, vector<32x128xf32>, vector<2x128xf32> -> vector<2x128xf32>
    %184 = arith.addf %182, %183 : vector<2x128xf32>
    %c4_96 = arith.constant 4 : index
    %c0_97 = arith.constant 0 : index
    %185 = vector.load %arg16[%c4_96, %c0_97] : memref<16x128xf32, #tpu.memory_space<vmem>>, vector<2x128xf32>
    tpu.vector_store %arg16[%c4_96, %c0_97], %184 {strides = array<i32>} : memref<16x128xf32, #tpu.memory_space<vmem>>, vector<2x128xf32>,
    %c12_98 = arith.constant 12 : index
    %c0_99 = arith.constant 0 : index
    %186 = vector.load %arg15[%c12_98, %c0_99] : memref<16x256xf32, #tpu.memory_space<vmem>>, vector<2x256xf32>
    %cst_100 = arith.constant dense<0.000000e+00> : vector<2x256xf32>
    %187 = tpu.matmul %175, %0, %cst_100 {dimension_numbers = #tpu.dot_dimension_numbers<[1], [0], [0], [1], [0, 0, 1, 1], [], []>} : vector<2x64xf32>, vector<64x256xf32>, vector<2x256xf32> -> vector<2x256xf32>
    %188 = arith.addf %186, %187 : vector<2x256xf32>
    %189 = vector.extract_strided_slice %188 {offsets = [0, 0], sizes = [2, 192], strides = [1, 1]} : vector<2x256xf32> to vector<2x192xf32>
    %190 = arith.negf %189 : vector<2x192xf32>
    %191 = math.exp %190 : vector<2x192xf32>
    %cst_101 = arith.constant 1.000000e+00 : f32
    %192 = vector.broadcast %cst_101 : f32 to vector<2x192xf32>
    %193 = arith.addf %192, %191 : vector<2x192xf32>
    %194 = arith.divf %192, %193 : vector<2x192xf32>
    %195 = vector.extract_strided_slice %188 {offsets = [0, 192], sizes = [2, 64], strides = [1, 1]} : vector<2x256xf32> to vector<2x64xf32>
    %196 = math.tanh %195 : vector<2x64xf32>
    %197 = vector.extract_strided_slice %194 {offsets = [0, 0], sizes = [2, 64], strides = [1, 1]} : vector<2x192xf32> to vector<2x64xf32>
    %198 = vector.extract_strided_slice %194 {offsets = [0, 64], sizes = [2, 64], strides = [1, 1]} : vector<2x192xf32> to vector<2x64xf32>
    %199 = vector.extract_strided_slice %194 {offsets = [0, 128], sizes = [2, 64], strides = [1, 1]} : vector<2x192xf32> to vector<2x64xf32>
    %200 = arith.mulf %198, %173 : vector<2x64xf32>
    %201 = arith.mulf %197, %196 : vector<2x64xf32>
    %202 = arith.addf %200, %201 : vector<2x64xf32>
    %203 = math.tanh %202 : vector<2x64xf32>
    %204 = arith.mulf %199, %203 : vector<2x64xf32>
    %205 = vector.extract_strided_slice %204 {offsets = [0, 0], sizes = [2, 32], strides = [1, 1]} : vector<2x64xf32> to vector<2x32xf32>
    %206 = vector.extract_strided_slice %204 {offsets = [0, 32], sizes = [2, 32], strides = [1, 1]} : vector<2x64xf32> to vector<2x32xf32>
    %c12_102 = arith.constant 12 : index
    %c0_103 = arith.constant 0 : index
    %207 = vector.load %arg16[%c12_102, %c0_103] : memref<16x128xf32, #tpu.memory_space<vmem>>, vector<2x128xf32>
    %cst_104 = arith.constant dense<0.000000e+00> : vector<2x128xf32>
    %208 = tpu.matmul %205, %1, %cst_104 {dimension_numbers = #tpu.dot_dimension_numbers<[1], [0], [0], [1], [0, 0, 1, 1], [], []>} : vector<2x32xf32>, vector<32x128xf32>, vector<2x128xf32> -> vector<2x128xf32>
    %209 = arith.addf %207, %208 : vector<2x128xf32>
    %c12_105 = arith.constant 12 : index
    %c0_106 = arith.constant 0 : index
    %210 = vector.load %arg16[%c12_105, %c0_106] : memref<16x128xf32, #tpu.memory_space<vmem>>, vector<2x128xf32>
    tpu.vector_store %arg16[%c12_105, %c0_106], %209 {strides = array<i32>} : memref<16x128xf32, #tpu.memory_space<vmem>>, vector<2x128xf32>,
    %c2_107 = arith.constant 2 : index
    %c0_108 = arith.constant 0 : index
    %211 = vector.load %arg16[%c2_107, %c0_108] : memref<16x128xf32, #tpu.memory_space<vmem>>, vector<2x128xf32>
    %cst_109 = arith.constant dense<0.000000e+00> : vector<2x128xf32>
    %212 = tpu.matmul %206, %2, %cst_109 {dimension_numbers = #tpu.dot_dimension_numbers<[1], [0], [0], [1], [0, 0, 1, 1], [], []>} : vector<2x32xf32>, vector<32x128xf32>, vector<2x128xf32> -> vector<2x128xf32>
    %213 = arith.addf %211, %212 : vector<2x128xf32>
    %c2_110 = arith.constant 2 : index
    %c0_111 = arith.constant 0 : index
    %214 = vector.load %arg16[%c2_110, %c0_111] : memref<16x128xf32, #tpu.memory_space<vmem>>, vector<2x128xf32>
    tpu.vector_store %arg16[%c2_110, %c0_111], %213 {strides = array<i32>} : memref<16x128xf32, #tpu.memory_space<vmem>>, vector<2x128xf32>,
    %c14_112 = arith.constant 14 : index
    %c0_113 = arith.constant 0 : index
    %215 = vector.load %arg15[%c14_112, %c0_113] : memref<16x256xf32, #tpu.memory_space<vmem>>, vector<2x256xf32>
    %cst_114 = arith.constant dense<0.000000e+00> : vector<2x256xf32>
    %216 = tpu.matmul %204, %0, %cst_114 {dimension_numbers = #tpu.dot_dimension_numbers<[1], [0], [0], [1], [0, 0, 1, 1], [], []>} : vector<2x64xf32>, vector<64x256xf32>, vector<2x256xf32> -> vector<2x256xf32>
    %217 = arith.addf %215, %216 : vector<2x256xf32>
    %218 = vector.extract_strided_slice %217 {offsets = [0, 0], sizes = [2, 192], strides = [1, 1]} : vector<2x256xf32> to vector<2x192xf32>
    %219 = arith.negf %218 : vector<2x192xf32>
    %220 = math.exp %219 : vector<2x192xf32>
    %cst_115 = arith.constant 1.000000e+00 : f32
    %221 = vector.broadcast %cst_115 : f32 to vector<2x192xf32>
    %222 = arith.addf %221, %220 : vector<2x192xf32>
    %223 = arith.divf %221, %222 : vector<2x192xf32>
    %224 = vector.extract_strided_slice %217 {offsets = [0, 192], sizes = [2, 64], strides = [1, 1]} : vector<2x256xf32> to vector<2x64xf32>
    %225 = math.tanh %224 : vector<2x64xf32>
    %226 = vector.extract_strided_slice %223 {offsets = [0, 0], sizes = [2, 64], strides = [1, 1]} : vector<2x192xf32> to vector<2x64xf32>
    %227 = vector.extract_strided_slice %223 {offsets = [0, 64], sizes = [2, 64], strides = [1, 1]} : vector<2x192xf32> to vector<2x64xf32>
    %228 = vector.extract_strided_slice %223 {offsets = [0, 128], sizes = [2, 64], strides = [1, 1]} : vector<2x192xf32> to vector<2x64xf32>
    %229 = arith.mulf %227, %202 : vector<2x64xf32>
    %230 = arith.mulf %226, %225 : vector<2x64xf32>
    %231 = arith.addf %229, %230 : vector<2x64xf32>
    %232 = math.tanh %231 : vector<2x64xf32>
    %233 = arith.mulf %228, %232 : vector<2x64xf32>
    %234 = vector.extract_strided_slice %233 {offsets = [0, 0], sizes = [2, 32], strides = [1, 1]} : vector<2x64xf32> to vector<2x32xf32>
    %235 = vector.extract_strided_slice %233 {offsets = [0, 32], sizes = [2, 32], strides = [1, 1]} : vector<2x64xf32> to vector<2x32xf32>
    %c14_116 = arith.constant 14 : index
    %c0_117 = arith.constant 0 : index
    %236 = vector.load %arg16[%c14_116, %c0_117] : memref<16x128xf32, #tpu.memory_space<vmem>>, vector<2x128xf32>
    %cst_118 = arith.constant dense<0.000000e+00> : vector<2x128xf32>
    %237 = tpu.matmul %234, %1, %cst_118 {dimension_numbers = #tpu.dot_dimension_numbers<[1], [0], [0], [1], [0, 0, 1, 1], [], []>} : vector<2x32xf32>, vector<32x128xf32>, vector<2x128xf32> -> vector<2x128xf32>
    %238 = arith.addf %236, %237 : vector<2x128xf32>
    %c14_119 = arith.constant 14 : index
    %c0_120 = arith.constant 0 : index
    %239 = vector.load %arg16[%c14_119, %c0_120] : memref<16x128xf32, #tpu.memory_space<vmem>>, vector<2x128xf32>
    tpu.vector_store %arg16[%c14_119, %c0_120], %238 {strides = array<i32>} : memref<16x128xf32, #tpu.memory_space<vmem>>, vector<2x128xf32>,
    %c0_121 = arith.constant 0 : index
    %c0_122 = arith.constant 0 : index
    %240 = vector.load %arg16[%c0_121, %c0_122] : memref<16x128xf32, #tpu.memory_space<vmem>>, vector<2x128xf32>
    %cst_123 = arith.constant dense<0.000000e+00> : vector<2x128xf32>
    %241 = tpu.matmul %235, %2, %cst_123 {dimension_numbers = #tpu.dot_dimension_numbers<[1], [0], [0], [1], [0, 0, 1, 1], [], []>} : vector<2x32xf32>, vector<32x128xf32>, vector<2x128xf32> -> vector<2x128xf32>
    %242 = arith.addf %240, %241 : vector<2x128xf32>
    %c0_124 = arith.constant 0 : index
    %c0_125 = arith.constant 0 : index
    %243 = vector.load %arg16[%c0_124, %c0_125] : memref<16x128xf32, #tpu.memory_space<vmem>>, vector<2x128xf32>
    tpu.vector_store %arg16[%c0_124, %c0_125], %242 {strides = array<i32>} : memref<16x128xf32, #tpu.memory_space<vmem>>, vector<2x128xf32>,
    %244 = vector.extract_strided_slice %233 {offsets = [0, 0], sizes = [2, 32], strides = [1, 1]} : vector<2x64xf32> to vector<2x32xf32>
    %c0_126 = arith.constant 0 : index
    %c0_127 = arith.constant 0 : index
    %245 = vector.load %arg8[%c0_126, %c0_127] : memref<32x128xf32, #tpu.memory_space<vmem>>, vector<32x128xf32>
    %cst_128 = arith.constant dense<0.000000e+00> : vector<2x128xf32>
    %246 = tpu.matmul %244, %245, %cst_128 {dimension_numbers = #tpu.dot_dimension_numbers<[1], [0], [0], [1], [0, 0, 1, 1], [], []>} : vector<2x32xf32>, vector<32x128xf32>, vector<2x128xf32> -> vector<2x128xf32>
    %247 = arith.addf %40, %246 : vector<2x128xf32>
    %c0_129 = arith.constant 0 : index
    %c0_130 = arith.constant 0 : index
    %248 = vector.load %arg10[%c0_129, %c0_130] : memref<1x128xf32, #tpu.memory_space<vmem>>, vector<1x128xf32>
    %249 = vector.broadcast %248 : vector<1x128xf32> to vector<2x128xf32>
    %250 = arith.addf %247, %249 : vector<2x128xf32>
    %251 = vector.extract_strided_slice %250 {offsets = [0, 0], sizes = [2, 96], strides = [1, 1]} : vector<2x128xf32> to vector<2x96xf32>
    %252 = arith.negf %251 : vector<2x96xf32>
    %253 = math.exp %252 : vector<2x96xf32>
    %cst_131 = arith.constant 1.000000e+00 : f32
    %254 = vector.broadcast %cst_131 : f32 to vector<2x96xf32>
    %255 = arith.addf %254, %253 : vector<2x96xf32>
    %256 = arith.divf %254, %255 : vector<2x96xf32>
    %257 = vector.extract_strided_slice %250 {offsets = [0, 96], sizes = [2, 32], strides = [1, 1]} : vector<2x128xf32> to vector<2x32xf32>
    %258 = math.tanh %257 : vector<2x32xf32>
    %259 = vector.extract_strided_slice %256 {offsets = [0, 0], sizes = [2, 32], strides = [1, 1]} : vector<2x96xf32> to vector<2x32xf32>
    %260 = vector.extract_strided_slice %256 {offsets = [0, 64], sizes = [2, 32], strides = [1, 1]} : vector<2x96xf32> to vector<2x32xf32>
    %261 = arith.mulf %259, %258 : vector<2x32xf32>
    %262 = math.tanh %261 : vector<2x32xf32>
    %263 = arith.mulf %260, %262 : vector<2x32xf32>
    %c0_132 = arith.constant 0 : index
    %c0_133 = arith.constant 0 : index
    %264 = vector.load %arg16[%c0_132, %c0_133] : memref<16x128xf32, #tpu.memory_space<vmem>>, vector<2x128xf32>
    %265 = vector.extract_strided_slice %264 {offsets = [0, 0], sizes = [2, 96], strides = [1, 1]} : vector<2x128xf32> to vector<2x96xf32>
    %266 = arith.negf %265 : vector<2x96xf32>
    %267 = math.exp %266 : vector<2x96xf32>
    %cst_134 = arith.constant 1.000000e+00 : f32
    %268 = vector.broadcast %cst_134 : f32 to vector<2x96xf32>
    %269 = arith.addf %268, %267 : vector<2x96xf32>
    %270 = arith.divf %268, %269 : vector<2x96xf32>
    %271 = vector.extract_strided_slice %264 {offsets = [0, 96], sizes = [2, 32], strides = [1, 1]} : vector<2x128xf32> to vector<2x32xf32>
    %272 = math.tanh %271 : vector<2x32xf32>
    %273 = vector.extract_strided_slice %270 {offsets = [0, 0], sizes = [2, 32], strides = [1, 1]} : vector<2x96xf32> to vector<2x32xf32>
    %274 = vector.extract_strided_slice %270 {offsets = [0, 64], sizes = [2, 32], strides = [1, 1]} : vector<2x96xf32> to vector<2x32xf32>
    %275 = arith.mulf %273, %272 : vector<2x32xf32>
    %276 = math.tanh %275 : vector<2x32xf32>
    %277 = arith.mulf %274, %276 : vector<2x32xf32>
    %c2_135 = arith.constant 2 : index
    %c0_136 = arith.constant 0 : index
    %278 = vector.load %arg16[%c2_135, %c0_136] : memref<16x128xf32, #tpu.memory_space<vmem>>, vector<2x128xf32>
    %cst_137 = arith.constant dense<0.000000e+00> : vector<2x128xf32>
    %279 = tpu.matmul %277, %3, %cst_137 {dimension_numbers = #tpu.dot_dimension_numbers<[1], [0], [0], [1], [0, 0, 1, 1], [], []>} : vector<2x32xf32>, vector<32x128xf32>, vector<2x128xf32> -> vector<2x128xf32>
    %280 = arith.addf %278, %279 : vector<2x128xf32>
    %281 = vector.extract_strided_slice %280 {offsets = [0, 0], sizes = [2, 96], strides = [1, 1]} : vector<2x128xf32> to vector<2x96xf32>
    %282 = arith.negf %281 : vector<2x96xf32>
    %283 = math.exp %282 : vector<2x96xf32>
    %cst_138 = arith.constant 1.000000e+00 : f32
    %284 = vector.broadcast %cst_138 : f32 to vector<2x96xf32>
    %285 = arith.addf %284, %283 : vector<2x96xf32>
    %286 = arith.divf %284, %285 : vector<2x96xf32>
    %287 = vector.extract_strided_slice %280 {offsets = [0, 96], sizes = [2, 32], strides = [1, 1]} : vector<2x128xf32> to vector<2x32xf32>
    %288 = math.tanh %287 : vector<2x32xf32>
    %289 = vector.extract_strided_slice %286 {offsets = [0, 0], sizes = [2, 32], strides = [1, 1]} : vector<2x96xf32> to vector<2x32xf32>
    %290 = vector.extract_strided_slice %286 {offsets = [0, 32], sizes = [2, 32], strides = [1, 1]} : vector<2x96xf32> to vector<2x32xf32>
    %291 = vector.extract_strided_slice %286 {offsets = [0, 64], sizes = [2, 32], strides = [1, 1]} : vector<2x96xf32> to vector<2x32xf32>
    %292 = arith.mulf %290, %275 : vector<2x32xf32>
    %293 = arith.mulf %289, %288 : vector<2x32xf32>
    %294 = arith.addf %292, %293 : vector<2x32xf32>
    %295 = math.tanh %294 : vector<2x32xf32>
    %296 = arith.mulf %291, %295 : vector<2x32xf32>
    %c4_139 = arith.constant 4 : index
    %c0_140 = arith.constant 0 : index
    %297 = vector.load %arg16[%c4_139, %c0_140] : memref<16x128xf32, #tpu.memory_space<vmem>>, vector<2x128xf32>
    %cst_141 = arith.constant dense<0.000000e+00> : vector<2x128xf32>
    %298 = tpu.matmul %296, %3, %cst_141 {dimension_numbers = #tpu.dot_dimension_numbers<[1], [0], [0], [1], [0, 0, 1, 1], [], []>} : vector<2x32xf32>, vector<32x128xf32>, vector<2x128xf32> -> vector<2x128xf32>
    %299 = arith.addf %297, %298 : vector<2x128xf32>
    %300 = vector.extract_strided_slice %299 {offsets = [0, 0], sizes = [2, 96], strides = [1, 1]} : vector<2x128xf32> to vector<2x96xf32>
    %301 = arith.negf %300 : vector<2x96xf32>
    %302 = math.exp %301 : vector<2x96xf32>
    %cst_142 = arith.constant 1.000000e+00 : f32
    %303 = vector.broadcast %cst_142 : f32 to vector<2x96xf32>
    %304 = arith.addf %303, %302 : vector<2x96xf32>
    %305 = arith.divf %303, %304 : vector<2x96xf32>
    %306 = vector.extract_strided_slice %299 {offsets = [0, 96], sizes = [2, 32], strides = [1, 1]} : vector<2x128xf32> to vector<2x32xf32>
    %307 = math.tanh %306 : vector<2x32xf32>
    %308 = vector.extract_strided_slice %305 {offsets = [0, 0], sizes = [2, 32], strides = [1, 1]} : vector<2x96xf32> to vector<2x32xf32>
    %309 = vector.extract_strided_slice %305 {offsets = [0, 32], sizes = [2, 32], strides = [1, 1]} : vector<2x96xf32> to vector<2x32xf32>
    %310 = vector.extract_strided_slice %305 {offsets = [0, 64], sizes = [2, 32], strides = [1, 1]} : vector<2x96xf32> to vector<2x32xf32>
    %311 = arith.mulf %309, %294 : vector<2x32xf32>
    %312 = arith.mulf %308, %307 : vector<2x32xf32>
    %313 = arith.addf %311, %312 : vector<2x32xf32>
    %314 = math.tanh %313 : vector<2x32xf32>
    %315 = arith.mulf %310, %314 : vector<2x32xf32>
    %c6_143 = arith.constant 6 : index
    %c0_144 = arith.constant 0 : index
    %316 = vector.load %arg16[%c6_143, %c0_144] : memref<16x128xf32, #tpu.memory_space<vmem>>, vector<2x128xf32>
    %cst_145 = arith.constant dense<0.000000e+00> : vector<2x128xf32>
    %317 = tpu.matmul %315, %3, %cst_145 {dimension_numbers = #tpu.dot_dimension_numbers<[1], [0], [0], [1], [0, 0, 1, 1], [], []>} : vector<2x32xf32>, vector<32x128xf32>, vector<2x128xf32> -> vector<2x128xf32>
    %318 = arith.addf %316, %317 : vector<2x128xf32>
    %319 = vector.extract_strided_slice %318 {offsets = [0, 0], sizes = [2, 96], strides = [1, 1]} : vector<2x128xf32> to vector<2x96xf32>
    %320 = arith.negf %319 : vector<2x96xf32>
    %321 = math.exp %320 : vector<2x96xf32>
    %cst_146 = arith.constant 1.000000e+00 : f32
    %322 = vector.broadcast %cst_146 : f32 to vector<2x96xf32>
    %323 = arith.addf %322, %321 : vector<2x96xf32>
    %324 = arith.divf %322, %323 : vector<2x96xf32>
    %325 = vector.extract_strided_slice %318 {offsets = [0, 96], sizes = [2, 32], strides = [1, 1]} : vector<2x128xf32> to vector<2x32xf32>
    %326 = math.tanh %325 : vector<2x32xf32>
    %327 = vector.extract_strided_slice %324 {offsets = [0, 0], sizes = [2, 32], strides = [1, 1]} : vector<2x96xf32> to vector<2x32xf32>
    %328 = vector.extract_strided_slice %324 {offsets = [0, 32], sizes = [2, 32], strides = [1, 1]} : vector<2x96xf32> to vector<2x32xf32>
    %329 = vector.extract_strided_slice %324 {offsets = [0, 64], sizes = [2, 32], strides = [1, 1]} : vector<2x96xf32> to vector<2x32xf32>
    %330 = arith.mulf %328, %313 : vector<2x32xf32>
    %331 = arith.mulf %327, %326 : vector<2x32xf32>
    %332 = arith.addf %330, %331 : vector<2x32xf32>
    %333 = math.tanh %332 : vector<2x32xf32>
    %334 = arith.mulf %329, %333 : vector<2x32xf32>
    %c8_147 = arith.constant 8 : index
    %c0_148 = arith.constant 0 : index
    %335 = vector.load %arg16[%c8_147, %c0_148] : memref<16x128xf32, #tpu.memory_space<vmem>>, vector<2x128xf32>
    %cst_149 = arith.constant dense<0.000000e+00> : vector<2x128xf32>
    %336 = tpu.matmul %334, %3, %cst_149 {dimension_numbers = #tpu.dot_dimension_numbers<[1], [0], [0], [1], [0, 0, 1, 1], [], []>} : vector<2x32xf32>, vector<32x128xf32>, vector<2x128xf32> -> vector<2x128xf32>
    %337 = arith.addf %335, %336 : vector<2x128xf32>
    %338 = vector.extract_strided_slice %337 {offsets = [0, 0], sizes = [2, 96], strides = [1, 1]} : vector<2x128xf32> to vector<2x96xf32>
    %339 = arith.negf %338 : vector<2x96xf32>
    %340 = math.exp %339 : vector<2x96xf32>
    %cst_150 = arith.constant 1.000000e+00 : f32
    %341 = vector.broadcast %cst_150 : f32 to vector<2x96xf32>
    %342 = arith.addf %341, %340 : vector<2x96xf32>
    %343 = arith.divf %341, %342 : vector<2x96xf32>
    %344 = vector.extract_strided_slice %337 {offsets = [0, 96], sizes = [2, 32], strides = [1, 1]} : vector<2x128xf32> to vector<2x32xf32>
    %345 = math.tanh %344 : vector<2x32xf32>
    %346 = vector.extract_strided_slice %343 {offsets = [0, 0], sizes = [2, 32], strides = [1, 1]} : vector<2x96xf32> to vector<2x32xf32>
    %347 = vector.extract_strided_slice %343 {offsets = [0, 32], sizes = [2, 32], strides = [1, 1]} : vector<2x96xf32> to vector<2x32xf32>
    %348 = vector.extract_strided_slice %343 {offsets = [0, 64], sizes = [2, 32], strides = [1, 1]} : vector<2x96xf32> to vector<2x32xf32>
    %349 = arith.mulf %347, %332 : vector<2x32xf32>
    %350 = arith.mulf %346, %345 : vector<2x32xf32>
    %351 = arith.addf %349, %350 : vector<2x32xf32>
    %352 = math.tanh %351 : vector<2x32xf32>
    %353 = arith.mulf %348, %352 : vector<2x32xf32>
    %c10_151 = arith.constant 10 : index
    %c0_152 = arith.constant 0 : index
    %354 = vector.load %arg16[%c10_151, %c0_152] : memref<16x128xf32, #tpu.memory_space<vmem>>, vector<2x128xf32>
    %cst_153 = arith.constant dense<0.000000e+00> : vector<2x128xf32>
    %355 = tpu.matmul %353, %3, %cst_153 {dimension_numbers = #tpu.dot_dimension_numbers<[1], [0], [0], [1], [0, 0, 1, 1], [], []>} : vector<2x32xf32>, vector<32x128xf32>, vector<2x128xf32> -> vector<2x128xf32>
    %356 = arith.addf %354, %355 : vector<2x128xf32>
    %357 = vector.extract_strided_slice %356 {offsets = [0, 0], sizes = [2, 96], strides = [1, 1]} : vector<2x128xf32> to vector<2x96xf32>
    %358 = arith.negf %357 : vector<2x96xf32>
    %359 = math.exp %358 : vector<2x96xf32>
    %cst_154 = arith.constant 1.000000e+00 : f32
    %360 = vector.broadcast %cst_154 : f32 to vector<2x96xf32>
    %361 = arith.addf %360, %359 : vector<2x96xf32>
    %362 = arith.divf %360, %361 : vector<2x96xf32>
    %363 = vector.extract_strided_slice %356 {offsets = [0, 96], sizes = [2, 32], strides = [1, 1]} : vector<2x128xf32> to vector<2x32xf32>
    %364 = math.tanh %363 : vector<2x32xf32>
    %365 = vector.extract_strided_slice %362 {offsets = [0, 0], sizes = [2, 32], strides = [1, 1]} : vector<2x96xf32> to vector<2x32xf32>
    %366 = vector.extract_strided_slice %362 {offsets = [0, 32], sizes = [2, 32], strides = [1, 1]} : vector<2x96xf32> to vector<2x32xf32>
    %367 = vector.extract_strided_slice %362 {offsets = [0, 64], sizes = [2, 32], strides = [1, 1]} : vector<2x96xf32> to vector<2x32xf32>
    %368 = arith.mulf %366, %351 : vector<2x32xf32>
    %369 = arith.mulf %365, %364 : vector<2x32xf32>
    %370 = arith.addf %368, %369 : vector<2x32xf32>
    %371 = math.tanh %370 : vector<2x32xf32>
    %372 = arith.mulf %367, %371 : vector<2x32xf32>
    %c12_155 = arith.constant 12 : index
    %c0_156 = arith.constant 0 : index
    %373 = vector.load %arg16[%c12_155, %c0_156] : memref<16x128xf32, #tpu.memory_space<vmem>>, vector<2x128xf32>
    %cst_157 = arith.constant dense<0.000000e+00> : vector<2x128xf32>
    %374 = tpu.matmul %372, %3, %cst_157 {dimension_numbers = #tpu.dot_dimension_numbers<[1], [0], [0], [1], [0, 0, 1, 1], [], []>} : vector<2x32xf32>, vector<32x128xf32>, vector<2x128xf32> -> vector<2x128xf32>
    %375 = arith.addf %373, %374 : vector<2x128xf32>
    %376 = vector.extract_strided_slice %375 {offsets = [0, 0], sizes = [2, 96], strides = [1, 1]} : vector<2x128xf32> to vector<2x96xf32>
    %377 = arith.negf %376 : vector<2x96xf32>
    %378 = math.exp %377 : vector<2x96xf32>
    %cst_158 = arith.constant 1.000000e+00 : f32
    %379 = vector.broadcast %cst_158 : f32 to vector<2x96xf32>
    %380 = arith.addf %379, %378 : vector<2x96xf32>
    %381 = arith.divf %379, %380 : vector<2x96xf32>
    %382 = vector.extract_strided_slice %375 {offsets = [0, 96], sizes = [2, 32], strides = [1, 1]} : vector<2x128xf32> to vector<2x32xf32>
    %383 = math.tanh %382 : vector<2x32xf32>
    %384 = vector.extract_strided_slice %381 {offsets = [0, 0], sizes = [2, 32], strides = [1, 1]} : vector<2x96xf32> to vector<2x32xf32>
    %385 = vector.extract_strided_slice %381 {offsets = [0, 32], sizes = [2, 32], strides = [1, 1]} : vector<2x96xf32> to vector<2x32xf32>
    %386 = vector.extract_strided_slice %381 {offsets = [0, 64], sizes = [2, 32], strides = [1, 1]} : vector<2x96xf32> to vector<2x32xf32>
    %387 = arith.mulf %385, %370 : vector<2x32xf32>
    %388 = arith.mulf %384, %383 : vector<2x32xf32>
    %389 = arith.addf %387, %388 : vector<2x32xf32>
    %390 = math.tanh %389 : vector<2x32xf32>
    %391 = arith.mulf %386, %390 : vector<2x32xf32>
    %c14_159 = arith.constant 14 : index
    %c0_160 = arith.constant 0 : index
    %392 = vector.load %arg16[%c14_159, %c0_160] : memref<16x128xf32, #tpu.memory_space<vmem>>, vector<2x128xf32>
    %cst_161 = arith.constant dense<0.000000e+00> : vector<2x128xf32>
    %393 = tpu.matmul %391, %3, %cst_161 {dimension_numbers = #tpu.dot_dimension_numbers<[1], [0], [0], [1], [0, 0, 1, 1], [], []>} : vector<2x32xf32>, vector<32x128xf32>, vector<2x128xf32> -> vector<2x128xf32>
    %394 = arith.addf %392, %393 : vector<2x128xf32>
    %395 = vector.extract_strided_slice %394 {offsets = [0, 0], sizes = [2, 96], strides = [1, 1]} : vector<2x128xf32> to vector<2x96xf32>
    %396 = arith.negf %395 : vector<2x96xf32>
    %397 = math.exp %396 : vector<2x96xf32>
    %cst_162 = arith.constant 1.000000e+00 : f32
    %398 = vector.broadcast %cst_162 : f32 to vector<2x96xf32>
    %399 = arith.addf %398, %397 : vector<2x96xf32>
    %400 = arith.divf %398, %399 : vector<2x96xf32>
    %401 = vector.extract_strided_slice %394 {offsets = [0, 96], sizes = [2, 32], strides = [1, 1]} : vector<2x128xf32> to vector<2x32xf32>
    %402 = math.tanh %401 : vector<2x32xf32>
    %403 = vector.extract_strided_slice %400 {offsets = [0, 0], sizes = [2, 32], strides = [1, 1]} : vector<2x96xf32> to vector<2x32xf32>
    %404 = vector.extract_strided_slice %400 {offsets = [0, 32], sizes = [2, 32], strides = [1, 1]} : vector<2x96xf32> to vector<2x32xf32>
    %405 = vector.extract_strided_slice %400 {offsets = [0, 64], sizes = [2, 32], strides = [1, 1]} : vector<2x96xf32> to vector<2x32xf32>
    %406 = arith.mulf %404, %389 : vector<2x32xf32>
    %407 = arith.mulf %403, %402 : vector<2x32xf32>
    %408 = arith.addf %406, %407 : vector<2x32xf32>
    %409 = math.tanh %408 : vector<2x32xf32>
    %410 = arith.mulf %405, %409 : vector<2x32xf32>
    %c0_163 = arith.constant 0 : index
    %c0_164 = arith.constant 0 : index
    %411 = vector.load %arg11[%c0_163, %c0_164] : memref<32x134xf32, #tpu.memory_space<vmem>>, vector<32x134xf32>
    %cst_165 = arith.constant dense<0.000000e+00> : vector<2x134xf32>
    %412 = tpu.matmul %410, %411, %cst_165 {dimension_numbers = #tpu.dot_dimension_numbers<[1], [0], [0], [1], [0, 0, 1, 1], [], []>} : vector<2x32xf32>, vector<32x134xf32>, vector<2x134xf32> -> vector<2x134xf32>
    %c0_166 = arith.constant 0 : index
    %c0_167 = arith.constant 0 : index
    %413 = vector.load %arg12[%c0_166, %c0_167] : memref<32x134xf32, #tpu.memory_space<vmem>>, vector<32x134xf32>
    %cst_168 = arith.constant dense<0.000000e+00> : vector<2x134xf32>
    %414 = tpu.matmul %263, %413, %cst_168 {dimension_numbers = #tpu.dot_dimension_numbers<[1], [0], [0], [1], [0, 0, 1, 1], [], []>} : vector<2x32xf32>, vector<32x134xf32>, vector<2x134xf32> -> vector<2x134xf32>
    %415 = arith.addf %412, %414 : vector<2x134xf32>
    %c0_169 = arith.constant 0 : index
    %c0_170 = arith.constant 0 : index
    %416 = vector.load %arg13[%c0_169, %c0_170] : memref<1x134xf32, #tpu.memory_space<vmem>>, vector<1x134xf32>
    %417 = vector.broadcast %416 : vector<1x134xf32> to vector<2x134xf32>
    %418 = arith.addf %415, %417 : vector<2x134xf32>
    %419 = tpu.iota {dimensions = array<i32: 1>} : vector<2x134xi32>
    %c1_i32 = arith.constant 1 : i32
    %420 = vector.broadcast %c1_i32 : i32 to vector<2x134xi32>
    %421 = arith.cmpi eq, %419, %420 : vector<2x134xi32>
    %c3_i32 = arith.constant 3 : i32
    %422 = vector.broadcast %c3_i32 : i32 to vector<2x134xi32>
    %423 = arith.cmpi eq, %419, %422 : vector<2x134xi32>
    %424 = arith.ori %421, %423 : vector<2x134xi1>
    %c133_i32 = arith.constant 133 : i32
    %425 = vector.broadcast %c133_i32 : i32 to vector<2x134xi32>
    %426 = arith.cmpi eq, %419, %425 : vector<2x134xi32>
    %427 = arith.ori %424, %426 : vector<2x134xi1>
    %c4_i32 = arith.constant 4 : i32
    %428 = vector.broadcast %c4_i32 : i32 to vector<2x134xi32>
    %429 = arith.cmpi sge, %419, %428 : vector<2x134xi32>
    %c132_i32 = arith.constant 132 : i32
    %430 = vector.broadcast %c132_i32 : i32 to vector<2x134xi32>
    %431 = arith.cmpi slt, %419, %430 : vector<2x134xi32>
    %432 = arith.andi %429, %431 : vector<2x134xi1>
    %cst_171 = arith.constant -1.000000e+30 : f32
    %433 = vector.broadcast %cst_171 : f32 to vector<2x134xf32>
    %434 = arith.select %432, %418, %433 : vector<2x134xi1>, vector<2x134xf32>
    %cst_172 = arith.constant dense<0xFF800000> : vector<2xf32>
    %435 = vector.multi_reduction <maximumf>, %434, %cst_172 [1] : vector<2x134xf32> to vector<2xf32>
    %436 = vector.shape_cast %435 : vector<2xf32> to vector<2x1xf32>
    %437 = vector.broadcast %436 : vector<2x1xf32> to vector<2x134xf32>
    %438 = arith.subf %434, %437 : vector<2x134xf32>
    %439 = math.exp %438 : vector<2x134xf32>
    %cst_173 = arith.constant dense<0.000000e+00> : vector<2xf32>
    %440 = vector.multi_reduction <add>, %439, %cst_173 [1] : vector<2x134xf32> to vector<2xf32>
    %441 = vector.shape_cast %440 : vector<2xf32> to vector<2x1xf32>
    %442 = vector.broadcast %441 : vector<2x1xf32> to vector<2x134xf32>
    %443 = arith.divf %439, %442 : vector<2x134xf32>
    %cst_174 = arith.constant 1.000000e-10 : f32
    %444 = vector.broadcast %cst_174 : f32 to vector<2x134xf32>
    %445 = arith.addf %443, %444 : vector<2x134xf32>
    %446 = math.log %445 : vector<2x134xf32>
    %447 = math.exp %418 : vector<2x134xf32>
    %448 = arith.select %427, %447, %418 : vector<2x134xi1>, vector<2x134xf32>
    %449 = arith.select %432, %446, %448 : vector<2x134xi1>, vector<2x134xf32>
    %c0_175 = arith.constant 0 : index
    %c0_176 = arith.constant 0 : index
    %450 = vector.load %arg14[%c0_175, %c0_176] : memref<2x134xf32, #tpu.memory_space<vmem>>, vector<2x134xf32>
    tpu.vector_store %arg14[%c0_175, %c0_176], %449 {strides = array<i32>} : memref<2x134xf32, #tpu.memory_space<vmem>>, vector<2x134xf32>,
    return
  }
}

</mosaic_0001>

<bundles_post_ra>
// kernel: note_event_predictor.1
= control target key start
LH: loop header
LB: loop body
LE: loop exit
PB: predicated region body
PF: predicated region fallthrough
CT: control target
= control target key end

     0   :  { %19 = vsyncpa [#allocation5], 0  ;;  %s5508_s0 = inlined_call_operand.vmem [shape: f32[16,8], index: 0, kind: input, shape index: {}]   ;;  %s5509_s1 = inlined_call_operand.hbm [shape: f32[8,256], index: 1, kind: input, shape index: {}]   ;;  %s5510_s2 = inlined_call_operand.hbm [shape: f32[64,256], index: 2, kind: input, shape index: {}]   ;;  %s5511_s3 = inlined_call_operand.hbm [shape: f32[1,256], index: 3, kind: input, shape index: {}]   ;;  %s5512_s4 = inlined_call_operand.hbm [shape: f32[32,128], index: 4, kind: input, shape index: {}]   ;;  %s5513_s5 = inlined_call_operand.hbm [shape: f32[32,128], index: 5, kind: input, shape index: {}]   ;;  %s5514_s6 = inlined_call_operand.hbm [shape: f32[32,128], index: 6, kind: input, shape index: {}]   ;;  %s5515_s7 = inlined_call_operand.vmem [shape: f32[1,128], index: 7, kind: input, shape index: {}]   ;;  %s5516_s8 = inlined_call_operand.hbm [shape: f32[32,128], index: 8, kind: input, shape index: {}]   ;;  %s5517_s9 = inlined_call_operand.hbm [shape: f32[32,128], index: 9, kind: input, shape index: {}]   ;;  %s5518_s10 = inlined_call_operand.hbm [shape: f32[1,128], index: 10, kind: input, shape index: {}]   ;;  %s5519_s11 = inlined_call_operand.vmem [shape: f32[32,134], index: 11, kind: input, shape index: {}]   ;;  %s5520_s12 = inlined_call_operand.vmem [shape: f32[32,134], index: 12, kind: input, shape index: {}]   ;;  %s5521_s13 = inlined_call_operand.hbm [shape: f32[1,134], index: 13, kind: input, shape index: {}]   ;;  %s5522_s14 = inlined_call_operand.hbm [shape: f32[2,134], index: 14, kind: output, shape index: {}]  }
   0x1   :  { %20 = vsyncpa [#allocation8], 0 }
   0x2   :  { %21 = vsyncpa [#allocation11], 0 }
   0x3   :  { %22 = vsyncpa [#allocation14], 0 }
   0x4   :  { %23 = vsyncpa [#allocation17], 0 }
   0x5   :  { %24 = vsyncpa [#allocation20], 0 }
   0x6   :  { %25 = vsyncpa [#allocation6], 0  ;;  %s4758_s29 = smov [#allocation7]   ;;  %s4502_s17 = scalar_lea.hbm %s5510_s2, 2048 }
   0x7   :  { %s43_s30 = sshll.u32 %s4758_s29, 4  ;;  %p4503_p0 = scmp.ne.s32.totalorder %s5510_s2, %s4502_s17  ;;  %s44_s30 = int_to_ptr.vmem [resolvable:$true] %s43_s30 }
   0x8   :  { %p4506_p1 = scmp.lt.u32.totalorder %s4502_s17, %s5510_s2 }
   0xa   :  { %p4508_p2 = pnand %p4506_p1, %p4503_p0 }
   0xc   :  { %4511 = shalt.err (!%p4508_p2)
}
   0xd   :  { %s4512_s22 = scalar_lea.vmem %s44_s30, 2048  ;;  %p4517_p4 = scmp.lt.s32.totalorder %s44_s30, %s44_s30 }
   0xe   :  { %p4513_p3 = scmp.ne.s32.totalorder %s44_s30, %s4512_s22  ;;  %p4518_p5 = scmp.lt.s32.totalorder %s4512_s22, %s4512_s22 }
  0x10   :  { %p4519_p6 = por %p4518_p5, %p4517_p4 }
  0x12   :  { %p4520_p7 = pnand %p4519_p6, %p4513_p3 }
  0x14   :  { %4523 = shalt.err (!%p4520_p7)
}
  0x15   :  { %s4759_s23 = smov 256   ;;  %s4760_s24 = smov 16  }
  0x16   :  { %49 = dma.hbm_to_vmem [thread:$0]  %s5510_s2, 2048, %s44_s30, [#allocation8], %s4759_s23, %s4759_s23, %s4760_s24  }
  0x17   :  { %s4761_s27 = smov [#allocation10]   ;;  %s4524_s16 = scalar_lea.hbm %s5512_s4, 512 }
  0x18   :  { %s65_s28 = sshll.u32 %s4761_s27, 4  ;;  %p4525_p8 = scmp.ne.s32.totalorder %s5512_s4, %s4524_s16  ;;  %s66_s28 = int_to_ptr.vmem [resolvable:$true] %s65_s28 }
  0x19   :  { %p4528_p9 = scmp.lt.u32.totalorder %s4524_s16, %s5512_s4 }
  0x1b   :  { %p4530_p10 = pnand %p4528_p9, %p4525_p8 }
  0x1d   :  { %4533 = shalt.err (!%p4530_p10)
}
  0x1e   :  { %s4534_s21 = scalar_lea.vmem %s66_s28, 512  ;;  %p4539_p12 = scmp.lt.s32.totalorder %s66_s28, %s66_s28 }
  0x1f   :  { %p4535_p11 = scmp.ne.s32.totalorder %s66_s28, %s4534_s21  ;;  %p4540_p13 = scmp.lt.s32.totalorder %s4534_s21, %s4534_s21 }
  0x21   :  { %p4541_p0 = por %p4540_p13, %p4539_p12 }
  0x23   :  { %p4542_p1 = pnand %p4541_p0, %p4535_p11 }
  0x25   :  { %4545 = shalt.err (!%p4542_p1)
}
  0x26   :  { %s4762_s2 = smov 128   ;;  %s4763_s30 = smov 8  }
  0x27   :  { %71 = dma.hbm_to_vmem [thread:$0]  %s5512_s4, 512, %s66_s28, [#allocation11], %s4762_s2, %s4762_s2, %s4763_s30  }
  0x28   :  { %s4764_s24 = smov [#allocation13]   ;;  %s4765_s26 = smov [#allocation16]  }
  0x29   :  { %s89_s25 = sshll.u32 %s4764_s24, 4  ;;  %s115_s27 = sshll.u32 %s4765_s26, 4  ;;  %s90_s25 = int_to_ptr.vmem [resolvable:$true] %s89_s25  ;;  %s4882_s27 = int_to_ptr.vmem [resolvable:$true] %s115_s27 }
  0x2a   :  { %s4546_s16 = scalar_lea.hbm %s5514_s6, 512 }
  0x2b   :  { %p4547_p2 = scmp.ne.s32.totalorder %s5514_s6, %s4546_s16  ;;  %p4550_p3 = scmp.lt.u32.totalorder %s4546_s16, %s5514_s6 }
  0x2d   :  { %p4552_p4 = pnand %p4550_p3, %p4547_p2 }
  0x2f   :  { %4555 = shalt.err (!%p4552_p4)
}
  0x30   :  { %s4556_s4 = scalar_lea.vmem %s90_s25, 512  ;;  %p4561_p6 = scmp.lt.s32.totalorder %s90_s25, %s90_s25 }
  0x31   :  { %p4557_p5 = scmp.ne.s32.totalorder %s90_s25, %s4556_s4  ;;  %p4562_p7 = scmp.lt.s32.totalorder %s4556_s4, %s4556_s4 }
  0x33   :  { %p4563_p8 = por %p4562_p7, %p4561_p6 }
  0x35   :  { %p4564_p9 = pnand %p4563_p8, %p4557_p5 }
  0x37   :  { %4567 = shalt.err (!%p4564_p9)
}
  0x38   :  { %95 = dma.hbm_to_vmem [thread:$0]  %s5514_s6, 512, %s90_s25, [#allocation14], %s4762_s2, %s4762_s2, %s4763_s30  }
  0x39   :  { %s4568_s24 = scalar_lea.hbm %s5517_s9, 512 }
  0x3a   :  { %p4569_p10 = scmp.ne.s32.totalorder %s5517_s9, %s4568_s24  ;;  %p4572_p11 = scmp.lt.u32.totalorder %s4568_s24, %s5517_s9 }
  0x3c   :  { %p4574_p12 = pnand %p4572_p11, %p4569_p10 }
  0x3e   :  { %4577 = shalt.err (!%p4574_p12)
}
  0x3f   :  { %s4578_s17 = scalar_lea.vmem %s4882_s27, 512  ;;  %p4583_p0 = scmp.lt.s32.totalorder %s4882_s27, %s4882_s27 }
  0x40   :  { %p4579_p13 = scmp.ne.s32.totalorder %s4882_s27, %s4578_s17  ;;  %p4584_p1 = scmp.lt.s32.totalorder %s4578_s17, %s4578_s17 }
  0x42   :  { %p4585_p2 = por %p4584_p1, %p4583_p0 }
  0x44   :  { %p4586_p3 = pnand %p4585_p2, %p4579_p13 }
  0x46   :  { %4589 = shalt.err (!%p4586_p3)
}
  0x47   :  { %121 = dma.hbm_to_vmem [thread:$0]  %s5517_s9, 512, %s4882_s27, [#allocation17], %s4762_s2, %s4762_s2, %s4763_s30  }
  0x48   :  { %s4766_s18 = smov [#allocation4]   ;;  %s4767_s20 = smov [#allocation9]  }
  0x49   :  { %s34_s19 = sshll.u32 %s4766_s18, 4  ;;  %s56_s4 = sshll.u32 %s4767_s20, 4  ;;  %s35_s19 = int_to_ptr.vmem [resolvable:$true] %s34_s19  ;;  %s57_s4 = int_to_ptr.vmem [resolvable:$true] %s56_s4 }
  0x4a   :  { %s4590_s22 = scalar_lea.hbm %s5509_s1, 256 }
  0x4b   :  { %p4591_p4 = scmp.ne.s32.totalorder %s5509_s1, %s4590_s22  ;;  %p4594_p5 = scmp.lt.u32.totalorder %s4590_s22, %s5509_s1 }
  0x4d   :  { %p4596_p6 = pnand %p4594_p5, %p4591_p4 }
  0x4f   :  { %4599 = shalt.err (!%p4596_p6)
}
  0x50   :  { %s4600_s9 = scalar_lea.vmem %s35_s19, 256  ;;  %p4605_p8 = scmp.lt.s32.totalorder %s35_s19, %s35_s19 }
  0x51   :  { %p4601_p7 = scmp.ne.s32.totalorder %s35_s19, %s4600_s9  ;;  %p4606_p9 = scmp.lt.s32.totalorder %s4600_s9, %s4600_s9 }
  0x53   :  { %p4607_p10 = por %p4606_p9, %p4605_p8 }
  0x55   :  { %p4608_p11 = pnand %p4607_p10, %p4601_p7 }
  0x57   :  { %4611 = shalt.err (!%p4608_p11)
}
  0x58   :  { %37 = dma.hbm_to_vmem [thread:$0]  %s5509_s1, 256, %s35_s19, [#allocation5]  }
  0x59   :  { %s4612_s6 = scalar_lea.hbm %s5511_s3, 32 }
  0x5a   :  { %p4613_p12 = scmp.ne.s32.totalorder %s5511_s3, %s4612_s6  ;;  %p4616_p13 = scmp.lt.u32.totalorder %s4612_s6, %s5511_s3 }
  0x5c   :  { %p4618_p0 = pnand %p4616_p13, %p4613_p12 }
  0x5e   :  { %4621 = shalt.err (!%p4618_p0)
}
  0x5f   :  { %s4622_s21 = scalar_lea.vmem %s57_s4, 32  ;;  %p4627_p2 = scmp.lt.s32.totalorder %s57_s4, %s57_s4 }
  0x60   :  { %p4623_p1 = scmp.ne.s32.totalorder %s57_s4, %s4622_s21  ;;  %p4628_p3 = scmp.lt.s32.totalorder %s4622_s21, %s4622_s21 }
  0x62   :  { %p4629_p4 = por %p4628_p3, %p4627_p2 }
  0x64   :  { %p4630_p5 = pnand %p4629_p4, %p4623_p1 }
  0x66   :  { %4633 = shalt.err (!%p4630_p5)
}
  0x67   :  { %59 = dma.hbm_to_vmem [thread:$0]  %s5511_s3, 32, %s57_s4, [#allocation8]  }
  0x68   :  { %s4768_s22 = smov [#allocation12]   ;;  %s4769_s24 = smov [#allocation15]  }
  0x69   :  { %s77_s23 = sshll.u32 %s4768_s22, 4  ;;  %s103_s26 = sshll.u32 %s4769_s24, 4  ;;  %s78_s23 = int_to_ptr.vmem [resolvable:$true] %s77_s23  ;;  %s4943_s26 = int_to_ptr.vmem [resolvable:$true] %s103_s26 }
  0x6a   :  { %s4634_s27 = scalar_lea.hbm %s5513_s5, 512 }
  0x6b   :  { %p4635_p6 = scmp.ne.s32.totalorder %s5513_s5, %s4634_s27  ;;  %p4638_p7 = scmp.lt.u32.totalorder %s4634_s27, %s5513_s5 }
  0x6d   :  { %p4640_p8 = pnand %p4638_p7, %p4635_p6 }
  0x6f   :  { %4643 = shalt.err (!%p4640_p8)
}
  0x70   :  { %s4644_s3 = scalar_lea.vmem %s78_s23, 512  ;;  %p4649_p10 = scmp.lt.s32.totalorder %s78_s23, %s78_s23 }
  0x71   :  { %p4645_p9 = scmp.ne.s32.totalorder %s78_s23, %s4644_s3  ;;  %p4650_p11 = scmp.lt.s32.totalorder %s4644_s3, %s4644_s3 }
  0x73   :  { %p4651_p12 = por %p4650_p11, %p4649_p10 }
  0x75   :  { %p4652_p13 = pnand %p4651_p12, %p4645_p9 }
  0x77   :  { %4655 = shalt.err (!%p4652_p13)
}
  0x78   :  { %83 = dma.hbm_to_vmem [thread:$0]  %s5513_s5, 512, %s78_s23, [#allocation11], %s4762_s2, %s4762_s2, %s4763_s30  }
  0x79   :  { %s4656_s28 = scalar_lea.hbm %s5516_s8, 512 }
  0x7a   :  { %p4657_p0 = scmp.ne.s32.totalorder %s5516_s8, %s4656_s28  ;;  %p4660_p1 = scmp.lt.u32.totalorder %s4656_s28, %s5516_s8 }
  0x7c   :  { %p4662_p2 = pnand %p4660_p1, %p4657_p0 }
  0x7e   :  { %4665 = shalt.err (!%p4662_p2)
}
  0x7f   :  { %s4666_s24 = scalar_lea.vmem %s4943_s26, 512  ;;  %p4671_p4 = scmp.lt.s32.totalorder %s4943_s26, %s4943_s26 }
  0x80   :  { %p4667_p3 = scmp.ne.s32.totalorder %s4943_s26, %s4666_s24  ;;  %p4672_p5 = scmp.lt.s32.totalorder %s4666_s24, %s4666_s24 }
  0x82   :  { %p4673_p6 = por %p4672_p5, %p4671_p4 }
  0x84   :  { %p4674_p7 = pnand %p4673_p6, %p4667_p3 }
  0x86   :  { %4677 = shalt.err (!%p4674_p7)
}
  0x87   :  { %109 = dma.hbm_to_vmem [thread:$0]  %s5516_s8, 512, %s4943_s26, [#allocation14], %s4762_s2, %s4762_s2, %s4763_s30  }
  0x88   :  { %s4770_s29 = smov [#allocation18]   ;;  %s4771_s27 = smov [#allocation19]  }
  0x89   :  { %s128_s9 = sshll.u32 %s4770_s29, 4  ;;  %s142_s15 = sshll.u32 %s4771_s27, 4  ;;  %s129_s9 = int_to_ptr.vmem [resolvable:$true] %s128_s9  ;;  %s143_s15 = int_to_ptr.vmem [resolvable:$true] %s142_s15 }
  0x8a   :  { %s4678_s6 = scalar_lea.hbm %s5518_s10, 16 }
  0x8b   :  { %p4679_p8 = scmp.ne.s32.totalorder %s5518_s10, %s4678_s6  ;;  %p4682_p9 = scmp.lt.u32.totalorder %s4678_s6, %s5518_s10 }
  0x8d   :  { %p4684_p10 = pnand %p4682_p9, %p4679_p8 }
  0x8f   :  { %4687 = shalt.err (!%p4684_p10)
}
  0x90   :  { %s4688_s8 = scalar_lea.vmem %s129_s9, 16  ;;  %s4692_s2 = scalar_lea.vmem %s129_s9, 32 }
  0x91   :  { %p4689_p11 = scmp.ne.s32.totalorder %s129_s9, %s4688_s8  ;;  %p4693_p12 = scmp.lt.s32.totalorder %s129_s9, %s129_s9 }
  0x92   :  { %p4694_p13 = scmp.lt.s32.totalorder %s4692_s2, %s4688_s8 }
  0x94   :  { %p4695_p0 = por %p4694_p13, %p4693_p12 }
  0x96   :  { %p4696_p1 = pnand %p4695_p0, %p4689_p11 }
  0x98   :  { %4699 = shalt.err (!%p4696_p1)
}
  0x99   :  { %131 = dma.hbm_to_vmem [thread:$0]  %s5518_s10, 16, %s129_s9, [#allocation17]  }
  0x9a   :  { %s4700_s21 = scalar_lea.hbm %s5521_s13, 32 }
  0x9b   :  { %p4701_p2 = scmp.ne.s32.totalorder %s5521_s13, %s4700_s21  ;;  %p4704_p3 = scmp.lt.u32.totalorder %s4700_s21, %s5521_s13 }
  0x9d   :  { %p4706_p4 = pnand %p4704_p3, %p4701_p2 }
  0x9f   :  { %4709 = shalt.err (!%p4706_p4)
}
  0xa0   :  { %s4710_s5 = scalar_lea.vmem %s143_s15, 32  ;;  %p4715_p6 = scmp.lt.s32.totalorder %s143_s15, %s143_s15 }
  0xa1   :  { %p4711_p5 = scmp.ne.s32.totalorder %s143_s15, %s4710_s5  ;;  %p4716_p7 = scmp.lt.s32.totalorder %s4710_s5, %s4710_s5 }
  0xa3   :  { %p4717_p8 = por %p4716_p7, %p4715_p6 }
  0xa5   :  { %p4718_p9 = pnand %p4717_p8, %p4711_p5 }
  0xa7   :  { %4721 = shalt.err (!%p4718_p9)
}
  0xa8   :  { %145 = dma.hbm_to_vmem [thread:$0]  %s5521_s13, 32, %s143_s15, [#allocation20]  }
  0xa9   :  { %4744 = dma.done.wait [#allocation5], 256  }
  0xaa   :  { %4745 = vsyncadd [#allocation5], 4294967040 }
  0xab   :  { %4746 = dma.done.wait [#allocation8], 2080  }
  0xac   :  { %4747 = vsyncadd [#allocation8], 4294965216 }
  0xad   :  { %4748 = dma.done.wait [#allocation11], 1024  }
  0xae   :  { %4749 = vsyncadd [#allocation11], 4294966272 }
  0xaf   :  { %4750 = dma.done.wait [#allocation14], 1024  }
  0xb0   :  { %4751 = vsyncadd [#allocation14], 4294966272 }
  0xb1   :  { %4752 = dma.done.wait [#allocation17], 528  }
  0xb2   :  { %4753 = vsyncadd [#allocation17], 4294966768 }
  0xb3   :  { %4754 = dma.done.wait [#allocation20], 32  }
  0xb4   :  { %4755 = vsyncadd [#allocation20], 4294967264  ;;  %v4772_v0 = vmov 0.0   ;;  %v207_v1 = vld [vmem:[#allocation4 + $0x8] sm:$0xff]  ;;  %v206_v2 = vld [vmem:[#allocation4] sm:$0xff]  ;;  %vm220_vm0 = vcmask 64512   ;;  %v210_v4 = vlaneseq }
  0xb5   :  { %291 = vmatprep.mubr.f32.mxu1 %v4772_v0  ;;  %v204_v3 = vld [vmem:[%s5508_s0] sm:$0xff]  ;;  %227 = vmatprep.subr.mxu1 %v207_v1  ;;  %v193_v17 = vld [vmem:[#allocation10 + $0x8] sm:$0xff]  ;;  %v4773_v19 = vmov 0.0|0.0   ;;  %v194_v20 = vld [vmem:[#allocation10 + $0x10] sm:$0xff]  ;;  %s4774_s15 = smov 64   ;;  %vm4775_vm1 = vmmov 0  }
  0xb6   :  { %228 = vmatpush1.msra.mxu1 %v206_v2  ;;  %v5011_v5 = vshrl.u32 %v210_v4, 7  ;;  %v208_v7 = vld [vmem:[#allocation9] sm:$0x3]  ;;  %v192_v16 = vld [vmem:[#allocation10] sm:$0xff]  ;;  %4024 = vmatprep.subr.bf16.mxu0 %v4773_v19  ;;  %v179_v25 = vld [vmem:[#allocation7 + $0x18] sm:$0xff]  ;;  %vm340_vm2 = vcmask 261120  }
  0xb7   :  { %3555 = vmatmul.mubr.msk.f32.vlgmr.msra.gmra.mrb[0].mxu1 %vm220_vm0, %v204_v3  ;;  %v5025_v18 = vpack.c.bf16 %v193_v17, %v192_v16  ;;  %4018 = vmatprep.subr.bf16.mxu1 %v4773_v19  ;;  %v195_v21 = vld [vmem:[#allocation10 + $0x18] sm:$0xff]  ;;  %v205_v22 = vld [vmem:[%s5508_s0 + $0x8] sm:$0xff]  ;;  %v178_v41 = vld [vmem:[#allocation7 + $0x10] sm:$0xff]  ;;  %vm499_vm3 = vcmask 523264   ;;  %s4777_s17 = smov 32   ;;  %vm3486_vm6 = vcmask 1041408  }
  0xb8   :  { %297 = vmatprep.mubr.f32.mxu1 %v4772_v0  ;;  %v212_v6 = vsub.s32 0, %v5011_v5  ;;  %v216_v8 = vsub.s32 1, %v5011_v5  ;;  %v5034_v23 = vpack.c.bf16 %v195_v21, %v194_v20  ;;  %v177_v24 = vld [vmem:[#allocation7 + $0x8] sm:$0xff]  ;;  %3762 = vmatprep.mubr.msk.f32.mxu0 %vm4775_vm1, %v4772_v0  ;;  %v3557_v33 = vld [vmem:[%s5515_s7] ss:$0 sm:$0xff]  ;;  %v183_v43 = vld [vmem:[#allocation7 + $0x38] sm:$0xff] }
  0xb9   :  { %4020 = vmatpush3.bf16.msra.mxu1 %v5025_v18  ;;  %v5038_v27 = vpack.c.bf16 %v179_v25, %v177_v24  ;;  %315 = vst [vmem:[#allocation3] sm:$0xff] %v3557_v33  ;;  %316 = vst [vmem:[#allocation3 + $0x8] sm:$0xff] %v3557_v33  ;;  %v176_v40 = vld [vmem:[#allocation7] sm:$0xff]  ;;  %v181_v42 = vld [vmem:[#allocation7 + $0x28] sm:$0xff]  ;;  %s4776_s7 = smov 96   ;;  %vm3488_vm7 = vcmask 41984  }
  0xba   :  { %v5017_v9 = vrot.slane %v208_v7, %v212_v6  ;;  %v5021_v10 = vrot.slane %v208_v7, %v216_v8  ;;  %4021 = vmatprep.subr.bf16.mxu1 %v4773_v19  ;;  %v5050_v46 = vpack.c.bf16 %v178_v41, %v176_v40  ;;  %v5054_v48 = vpack.c.bf16 %v183_v43, %v181_v42  ;;  %v180_v49 = vld [vmem:[#allocation7 + $0x20] sm:$0xff]  ;;  %v182_v50 = vld [vmem:[#allocation7 + $0x30] sm:$0xff]  ;;  %v185_v51 = vld [vmem:[#allocation7 + $0x48] sm:$0xff] }
  0xbb   :  { %3556 = vmatmul.mubr.msk.f32.gmra.mrb[2].mxu1 %vm220_vm0, %v205_v22  ;;  %v187_v52 = vld [vmem:[#allocation7 + $0x58] sm:$0xff]  ;;  %v5059_v53 = vpack.c.bf16 %v182_v50, %v180_v49  ;;  %v184_v55 = vld [vmem:[#allocation7 + $0x40] sm:$0xff]  ;;  %v186_v56 = vld [vmem:[#allocation7 + $0x50] sm:$0xff]  ;;  %vm3532_vm12 = vcmask 44034  }
  0xbc   :  { %3751 = vmatprep.mubr.msk.f32.mxu1 %vm4775_vm1, %v4772_v0  ;;  %v5063_v54 = vpack.c.bf16 %v187_v52, %v185_v51  ;;  %v189_v57 = vld [vmem:[#allocation7 + $0x68] sm:$0xff]  ;;  %v191_v58 = vld [vmem:[#allocation7 + $0x78] sm:$0xff]  ;;  %v5066_v59 = vpack.c.bf16 %v186_v56, %v184_v55  ;;  %v188_v61 = vld [vmem:[#allocation7 + $0x60] sm:$0xff] }
  0xbd   :  { %4023 = vmatpush3.bf16.msra.mxu1 %v5034_v23  ;;  %v5069_v60 = vpack.c.bf16 %v191_v58, %v189_v57  ;;  %v190_v62 = vld [vmem:[#allocation7 + $0x70] sm:$0xff]  ;;  %vm3533_vm13 = vmor %vm3532_vm12, %vm3486_vm6 }
  0xbe   :  { %4031 = vmatprep.subr.bf16.mxu1 %v5038_v27  ;;  %v5072_v63 = vpack.c.bf16 %v190_v62, %v188_v61 }
 0x18a   :  { %v293_v11 = vpop.f32.mrb[0].mxu1 }
 0x18b   :  { %v294_v12 = vadd.f32 %v293_v11, %v5017_v9  ;;  %v295_v13 = vpop.f32.mrb[1].mxu1  ;;  %v339_v11 = vld [vmem:[#allocation3] sm:$0x3] }
 0x18c   :  { %v296_v14 = vadd.f32 %v295_v13, %v5021_v10 }
 0x18d   :  { %304 = vst [vmem:[#allocation2] sm:$0xff] %v294_v12 }
 0x18e   :  { %305 = vst [vmem:[#allocation2 + $0x8] sm:$0xff] %v296_v14  ;;  %v299_v1 = vpop.f32.mrb[2].mxu1 }
 0x18f   :  { %v300_v2 = vadd.f32 %v299_v1, %v5017_v9  ;;  %v301_v3 = vpop.f32.mrb[3].mxu1 }
 0x190   :  { %v302_v7 = vadd.f32 %v301_v3, %v5021_v10 }
 0x191   :  { %306 = vst [vmem:[#allocation2 + $0x10] sm:$0xff] %v300_v2 }
 0x192   :  { %307 = vst [vmem:[#allocation2 + $0x18] sm:$0xff] %v302_v7 }
 0x194   :  { %v317_v28 = vld [vmem:[#allocation2] sm:$0x3]  ;;  %v497_v24 = vld [vmem:[#allocation2] sm:$0xc]  ;;  %v770_v56 = vld [vmem:[#allocation2] sm:$0x30] }
 0x195   :  { %v318_v15 = vld [vmem:[#allocation2 + $0x8] sm:$0x3]  ;;  %v3558_v29 = vmul.f32 -1.442695, %v317_v28  ;;  %v498_v20 = vld [vmem:[#allocation2 + $0x8] sm:$0xc] }
 0x196   :  { %4320 = vtanh.f32 %v318_v15  ;;  %v3559_v30 = vmul.f32 -1.442695, %v318_v15  ;;  %v771_v50 = vld [vmem:[#allocation2 + $0x8] sm:$0x30] }
 0x197   :  { %4322 = vpow2.f32 %v3558_v29 }
 0x198   :  { %4324 = vpow2.f32 %v3559_v30 }
 0x1a0   :  { %v4321_v26 = vpop.eup %4320 }
 0x1a1   :  { %333 = vrot.lane.b32.xlu0 %v4321_v26, %s4774_s15  ;;  %v4323_v31 = vpop.eup %4322 }
 0x1a2   :  { %v325_v32 = vadd.f32 1.0, %v4323_v31  ;;  %v4325_v34 = vpop.eup %4324 }
 0x1a3   :  { %v326_v35 = vadd.f32 1.0, %v4325_v34 }
 0x1a4   :  { %4326 = vrcp.f32 %v325_v32 }
 0x1a5   :  { %4328 = vrcp.f32 %v326_v35 }
 0x1ae   :  { %v4327_v36 = vpop.eup %4326 }
 0x1af   :  { %v4329_v44 = vpop.eup %4328 }
 0x213   :  { %v334_v37 = vpop.permute.xlu0 %333 }
 0x214   :  { %v336_v38 = vmul.f32 %v4327_v36, %v334_v37 }
 0x216   :  { %4330 = vtanh.f32 %v336_v38  ;;  %v595_v39 = vrot.slane %v336_v38, 6 }
 0x218   :  { %596 = vrot.lane.b32.xlu1 %v595_v39, %s4774_s15 }
 0x220   :  { %v4331_v45 = vpop.eup %4330 }
 0x221   :  { %v5052_v47 = vmul.f32 %v4331_v45, %v4329_v44 }
 0x223   :  { %3752 = vmatmul.mubr.msk.f32.vlgmr.msra.gmra.mrb[4].mxu1 %vm340_vm2, %v5052_v47 }
 0x224   :  { %4033 = vmatpush1.bf16.msra.mxu1 %v5050_v46  ;;  %566 = vmatprep.mubr.f32.mxu1 %v4772_v0 }
 0x225   :  { %4035 = vmatprep.subr.bf16.mxu1 %v5054_v48 }
 0x228   :  { %4037 = vmatpush1.bf16.msra.mxu1 %v5059_v53 }
 0x229   :  { %4039 = vmatprep.subr.bf16.mxu1 %v5063_v54 }
 0x22c   :  { %4041 = vmatpush1.bf16.msra.mxu1 %v5066_v59 }
 0x22d   :  { %4043 = vmatprep.subr.bf16.mxu1 %v5069_v60 }
 0x230   :  { %4045 = vmatpush1.bf16.msra.mxu1 %v5072_v63 }
 0x231   :  { %4059 = vmatprep.subr.bf16.mxu1 %v5038_v27 }
 0x233   :  { %3562 = vmatmul.mubr.msk.f32.vlgmr.msra.gmra.mrb[6].mxu1 %vm499_vm3, %v5052_v47 }
 0x234   :  { %4061 = vmatpush1.bf16.msra.mxu1 %v5050_v46  ;;  %838 = vmatprep.mubr.f32.mxu1 %v4772_v0 }
 0x235   :  { %4063 = vmatprep.subr.bf16.mxu1 %v5054_v48 }
 0x238   :  { %4065 = vmatpush1.bf16.msra.mxu1 %v5059_v53 }
 0x239   :  { %4067 = vmatprep.subr.bf16.mxu1 %v5063_v54 }
 0x23c   :  { %4069 = vmatpush1.bf16.msra.mxu1 %v5066_v59 }
 0x23d   :  { %4071 = vmatprep.subr.bf16.mxu1 %v5069_v60 }
 0x240   :  { %4073 = vmatpush1.bf16.msra.mxu1 %v5072_v63 }
 0x241   :  { %4087 = vmatprep.subr.bf16.mxu1 %v5038_v27 }
 0x28a   :  { %v597_v32 = vpop.permute.xlu1 %596 }
 0x2f6   :  { %v410_v12 = vpop.f32.mrb[4].mxu1 }
 0x2f7   :  { %v414_v13 = vadd.f32 %v410_v12, %v339_v11  ;;  %v3753_v14 = vpop.f32.mrb[5].mxu1 }
 0x2f9   :  { %415 = vst [vmem:[#allocation3] sm:$0x3] %v414_v13 }
 0x306   :  { %v568_v15 = vpop.f32.mrb[6].mxu1 }
 0x307   :  { %v570_v16 = vpop.f32.mrb[7].mxu1  ;;  %v575_v9 = vrot.slane %v568_v15, 6 }
 0x308   :  { %v576_v17 = vrot.slane %v570_v16, 6 }
 0x309   :  { %v579_v25 = vadd.f32 %v575_v9, %v497_v24 }
 0x30a   :  { %v580_v21 = vadd.f32 %v576_v17, %v498_v20 }
 0x30b   :  { %v3563_v10 = vmul.f32 -1.442695, %v579_v25 }
 0x30c   :  { %4332 = vtanh.f32 %v580_v21  ;;  %v3564_v37 = vmul.f32 -1.442695, %v580_v21 }
 0x30d   :  { %4334 = vpow2.f32 %v3563_v10 }
 0x316   :  { %v4333_v22 = vpop.eup %4332 }
 0x317   :  { %601 = vrot.lane.b32.xlu0 %v4333_v22, %s4774_s15  ;;  %v4335_v26 = vpop.eup %4334 }
 0x318   :  { %v587_v28 = vadd.f32 1.0, %v4335_v26  ;;  %v1041_v26 = vld [vmem:[#allocation2 + $0x8] sm:$0xc0] }
 0x31a   :  { %4336 = vrcp.f32 %v587_v28 }
 0x324   :  { %v4337_v29 = vpop.eup %4336 }
 0x325   :  { %v599_v33 = vmul.f32 %v4337_v29, %v597_v32 }
 0x389   :  { %v602_v30 = vpop.permute.xlu0 %601 }
 0x38a   :  { %v604_v31 = vmul.f32 %v4337_v29, %v602_v30 }
 0x38c   :  { %606 = vrot.lane.b32.xlu1 %v604_v31, %s4774_s15  ;;  %v1040_v31 = vld [vmem:[#allocation2] sm:$0xc0] }
 0x3fe   :  { %v607_v34 = vpop.permute.xlu1 %606 }
 0x3ff   :  { %v609_v35 = vadd.f32 %v607_v34, %v599_v33 }
 0x401   :  { %4338 = vtanh.f32 %v609_v35  ;;  %v867_v7 = vrot.slane %v609_v35, 6 }
 0x402   :  { %4340 = vpow2.f32 %v3564_v37 }
 0x40b   :  { %v4339_v36 = vpop.eup %4338 }
 0x40c   :  { %612 = vrot.lane.b32.xlu0 %v4339_v36, %s4774_s15  ;;  %v4341_v38 = vpop.eup %4340 }
 0x40d   :  { %v588_v39 = vadd.f32 1.0, %v4341_v38 }
 0x40f   :  { %4342 = vrcp.f32 %v588_v39 }
 0x419   :  { %v4343_v40 = vpop.eup %4342 }
 0x47e   :  { %v613_v41 = vpop.permute.xlu0 %612 }
 0x47f   :  { %v615_v42 = vmul.f32 %v4343_v40, %v613_v41 }
 0x481   :  { %v5093_v43 = vrot.slane %v615_v42, 2 }
 0x483   :  { %3567 = vmatmul.mubr.msk.f32.vlgmr.msra.gmra.mrb[8].mxu1 %vm499_vm3, %v5093_v43 }
 0x484   :  { %4089 = vmatpush1.bf16.msra.mxu1 %v5050_v46  ;;  %1108 = vmatprep.mubr.f32.mxu1 %v4772_v0 }
 0x485   :  { %4091 = vmatprep.subr.bf16.mxu1 %v5054_v48 }
 0x488   :  { %4093 = vmatpush1.bf16.msra.mxu1 %v5059_v53 }
 0x489   :  { %4095 = vmatprep.subr.bf16.mxu1 %v5063_v54 }
 0x48c   :  { %4097 = vmatpush1.bf16.msra.mxu1 %v5066_v59 }
 0x48d   :  { %4099 = vmatprep.subr.bf16.mxu1 %v5069_v60 }
 0x490   :  { %4101 = vmatpush1.bf16.msra.mxu1 %v5072_v63 }
 0x491   :  { %4115 = vmatprep.subr.bf16.mxu1 %v5038_v27 }
 0x556   :  { %v840_v44 = vpop.f32.mrb[8].mxu1 }
 0x557   :  { %v842_v45 = vpop.f32.mrb[9].mxu1  ;;  %v847_v55 = vrot.slane %v840_v44, 4 }
 0x558   :  { %v848_v49 = vrot.slane %v842_v45, 4 }
 0x559   :  { %v851_v57 = vadd.f32 %v847_v55, %v770_v56 }
 0x55a   :  { %v852_v51 = vadd.f32 %v848_v49, %v771_v50 }
 0x55b   :  { %v3568_v58 = vmul.f32 -1.442695, %v851_v57 }
 0x55c   :  { %4344 = vtanh.f32 %v852_v51  ;;  %v3569_v15 = vmul.f32 -1.442695, %v852_v51 }
 0x55d   :  { %4346 = vpow2.f32 %v3568_v58  ;;  %v1311_v58 = vld [vmem:[#allocation2 + $0x18] sm:$0x3] }
 0x566   :  { %v4345_v52 = vpop.eup %4344 }
 0x567   :  { %871 = vrot.lane.b32.xlu1 %v4345_v52, %s4774_s15  ;;  %v4347_v61 = vpop.eup %4346 }
 0x568   :  { %v859_v62 = vadd.f32 1.0, %v4347_v61 }
 0x56a   :  { %4348 = vrcp.f32 %v859_v62 }
 0x574   :  { %v4349_v1 = vpop.eup %4348 }
 0x575   :  { %v869_v11 = vmul.f32 %v4349_v1, %v867_v7 }
 0x5d9   :  { %v872_v2 = vpop.permute.xlu1 %871 }
 0x5da   :  { %v874_v3 = vmul.f32 %v4349_v1, %v872_v2  ;;  %v1310_v2 = vld [vmem:[#allocation2 + $0x10] sm:$0x3] }
 0x5dc   :  { %876 = vrot.lane.b32.xlu0 %v874_v3, %s4774_s15 }
 0x64e   :  { %v877_v12 = vpop.permute.xlu0 %876 }
 0x64f   :  { %v879_v13 = vadd.f32 %v877_v12, %v869_v11 }
 0x651   :  { %4350 = vtanh.f32 %v879_v13  ;;  %v1137_v39 = vrot.slane %v879_v13, 6 }
 0x652   :  { %4352 = vpow2.f32 %v3569_v15 }
 0x65b   :  { %v4351_v14 = vpop.eup %4350 }
 0x65c   :  { %882 = vrot.lane.b32.xlu1 %v4351_v14, %s4774_s15  ;;  %v4353_v16 = vpop.eup %4352 }
 0x65d   :  { %v860_v17 = vadd.f32 1.0, %v4353_v16 }
 0x65f   :  { %4354 = vrcp.f32 %v860_v17 }
 0x669   :  { %v4355_v20 = vpop.eup %4354 }
 0x6ce   :  { %v883_v21 = vpop.permute.xlu1 %882 }
 0x6cf   :  { %v885_v22 = vmul.f32 %v4355_v20, %v883_v21 }
 0x6d1   :  { %v5109_v9 = vrot.slane %v885_v22, 4 }
 0x6d3   :  { %3572 = vmatmul.mubr.msk.f32.vlgmr.msra.gmra.mrb[10].mxu1 %vm499_vm3, %v5109_v9 }
 0x6d4   :  { %4117 = vmatpush1.bf16.msra.mxu1 %v5050_v46  ;;  %1378 = vmatprep.mubr.f32.mxu1 %v4772_v0 }
 0x6d5   :  { %4119 = vmatprep.subr.bf16.mxu1 %v5054_v48 }
 0x6d8   :  { %4121 = vmatpush1.bf16.msra.mxu1 %v5059_v53 }
 0x6d9   :  { %4123 = vmatprep.subr.bf16.mxu1 %v5063_v54 }
 0x6dc   :  { %4125 = vmatpush1.bf16.msra.mxu1 %v5066_v59 }
 0x6dd   :  { %4127 = vmatprep.subr.bf16.mxu1 %v5069_v60 }
 0x6e0   :  { %4129 = vmatpush1.bf16.msra.mxu1 %v5072_v63 }
 0x6e1   :  { %4143 = vmatprep.subr.bf16.mxu1 %v5038_v27 }
 0x7a6   :  { %v1110_v24 = vpop.f32.mrb[10].mxu1 }
 0x7a7   :  { %v1112_v25 = vpop.f32.mrb[11].mxu1  ;;  %v1117_v30 = vrot.slane %v1110_v24, 2 }
 0x7a8   :  { %v1118_v10 = vrot.slane %v1112_v25, 2 }
 0x7a9   :  { %v1121_v32 = vadd.f32 %v1117_v30, %v1040_v31 }
 0x7aa   :  { %v1122_v28 = vadd.f32 %v1118_v10, %v1041_v26 }
 0x7ab   :  { %v3573_v33 = vmul.f32 -1.442695, %v1121_v32 }
 0x7ac   :  { %4356 = vtanh.f32 %v1122_v28  ;;  %v3574_v45 = vmul.f32 -1.442695, %v1122_v28 }
 0x7ad   :  { %4358 = vpow2.f32 %v3573_v33  ;;  %v1574_v33 = vld [vmem:[#allocation2 + $0x18] sm:$0xc] }
 0x7b6   :  { %v4357_v29 = vpop.eup %4356 }
 0x7b7   :  { %1141 = vrot.lane.b32.xlu0 %v4357_v29, %s4774_s15  ;;  %v4359_v34 = vpop.eup %4358 }
 0x7b8   :  { %v1129_v35 = vadd.f32 1.0, %v4359_v34 }
 0x7ba   :  { %4360 = vrcp.f32 %v1129_v35 }
 0x7c4   :  { %v4361_v36 = vpop.eup %4360 }
 0x7c5   :  { %v1139_v40 = vmul.f32 %v4361_v36, %v1137_v39 }
 0x829   :  { %v1142_v37 = vpop.permute.xlu0 %1141 }
 0x82a   :  { %v1144_v38 = vmul.f32 %v4361_v36, %v1142_v37  ;;  %v1573_v37 = vld [vmem:[#allocation2 + $0x10] sm:$0xc] }
 0x82c   :  { %1146 = vrot.lane.b32.xlu1 %v1144_v38, %s4774_s15 }
 0x89e   :  { %v1147_v41 = vpop.permute.xlu1 %1146 }
 0x89f   :  { %v1149_v42 = vadd.f32 %v1147_v41, %v1139_v40 }
 0x8a1   :  { %4362 = vtanh.f32 %v1149_v42  ;;  %v1401_v16 = vrot.slane %v1149_v42, 6 }
 0x8a2   :  { %4364 = vpow2.f32 %v3574_v45 }
 0x8ab   :  { %v4363_v44 = vpop.eup %4362 }
 0x8ac   :  { %1152 = vrot.lane.b32.xlu0 %v4363_v44, %s4774_s15  ;;  %v4365_v49 = vpop.eup %4364 }
 0x8ad   :  { %v1130_v50 = vadd.f32 1.0, %v4365_v49 }
 0x8af   :  { %4366 = vrcp.f32 %v1130_v50 }
 0x8b9   :  { %v4367_v51 = vpop.eup %4366 }
 0x91e   :  { %v1153_v52 = vpop.permute.xlu0 %1152 }
 0x91f   :  { %v1155_v55 = vmul.f32 %v4367_v51, %v1153_v52 }
 0x921   :  { %v5125_v56 = vrot.slane %v1155_v55, 6 }
 0x923   :  { %3577 = vmatmul.mubr.msk.f32.vlgmr.msra.gmra.mrb[12].mxu1 %vm499_vm3, %v5125_v56 }
 0x924   :  { %4145 = vmatpush1.bf16.msra.mxu1 %v5050_v46  ;;  %1641 = vmatprep.mubr.f32.mxu1 %v4772_v0 }
 0x925   :  { %4147 = vmatprep.subr.bf16.mxu1 %v5054_v48 }
 0x928   :  { %4149 = vmatpush1.bf16.msra.mxu1 %v5059_v53 }
 0x929   :  { %4151 = vmatprep.subr.bf16.mxu1 %v5063_v54 }
 0x92c   :  { %4153 = vmatpush1.bf16.msra.mxu1 %v5066_v59 }
 0x92d   :  { %4155 = vmatprep.subr.bf16.mxu1 %v5069_v60 }
 0x930   :  { %4157 = vmatpush1.bf16.msra.mxu1 %v5072_v63 }
 0x931   :  { %4171 = vmatprep.subr.bf16.mxu1 %v5038_v27 }
 0x9f6   :  { %v1380_v57 = vpop.f32.mrb[12].mxu1 }
 0x9f7   :  { %v1382_v61 = vpop.f32.mrb[13].mxu1  ;;  %v1385_v3 = vadd.f32 %v1380_v57, %v1310_v2 }
 0x9f8   :  { %v1386_v62 = vadd.f32 %v1382_v61, %v1311_v58 }
 0x9f9   :  { %v3578_v7 = vmul.f32 -1.442695, %v1385_v3 }
 0x9fa   :  { %4368 = vtanh.f32 %v1386_v62  ;;  %v3579_v24 = vmul.f32 -1.442695, %v1386_v62 }
 0x9fb   :  { %4370 = vpow2.f32 %v3578_v7 }
 0xa04   :  { %v4369_v1 = vpop.eup %4368 }
 0xa05   :  { %1405 = vrot.lane.b32.xlu1 %v4369_v1, %s4774_s15  ;;  %v4371_v11 = vpop.eup %4370 }
 0xa06   :  { %v1393_v12 = vadd.f32 1.0, %v4371_v11 }
 0xa08   :  { %4372 = vrcp.f32 %v1393_v12 }
 0xa12   :  { %v4373_v13 = vpop.eup %4372 }
 0xa13   :  { %v1403_v17 = vmul.f32 %v4373_v13, %v1401_v16 }
 0xa77   :  { %v1406_v14 = vpop.permute.xlu1 %1405 }
 0xa78   :  { %v1408_v15 = vmul.f32 %v4373_v13, %v1406_v14 }
 0xa7a   :  { %1410 = vrot.lane.b32.xlu0 %v1408_v15, %s4774_s15 }
 0xaec   :  { %v1411_v20 = vpop.permute.xlu0 %1410 }
 0xaed   :  { %v1413_v21 = vadd.f32 %v1411_v20, %v1403_v17 }
 0xaef   :  { %4374 = vtanh.f32 %v1413_v21  ;;  %v1670_v45 = vrot.slane %v1413_v21, 6 }
 0xaf0   :  { %4376 = vpow2.f32 %v3579_v24 }
 0xaf9   :  { %v4375_v22 = vpop.eup %4374 }
 0xafa   :  { %1416 = vrot.lane.b32.xlu1 %v4375_v22, %s4774_s15  ;;  %v4377_v25 = vpop.eup %4376 }
 0xafb   :  { %v1394_v10 = vadd.f32 1.0, %v4377_v25 }
 0xafd   :  { %4378 = vrcp.f32 %v1394_v10 }
 0xb07   :  { %v4379_v26 = vpop.eup %4378 }
 0xb6c   :  { %v1417_v28 = vpop.permute.xlu1 %1416 }
 0xb6d   :  { %v5141_v29 = vmul.f32 %v4379_v26, %v1417_v28 }
 0xb6f   :  { %3582 = vmatmul.mubr.msk.f32.vlgmr.msra.gmra.mrb[14].mxu1 %vm499_vm3, %v5141_v29 }
 0xb70   :  { %4173 = vmatpush1.bf16.msra.mxu1 %v5050_v46  ;;  %1911 = vmatprep.mubr.f32.mxu1 %v4772_v0 }
 0xb71   :  { %4175 = vmatprep.subr.bf16.mxu1 %v5054_v48 }
 0xb74   :  { %4177 = vmatpush1.bf16.msra.mxu1 %v5059_v53 }
 0xb75   :  { %4179 = vmatprep.subr.bf16.mxu1 %v5063_v54 }
 0xb78   :  { %4181 = vmatpush1.bf16.msra.mxu1 %v5066_v59 }
 0xb79   :  { %4183 = vmatprep.subr.bf16.mxu1 %v5069_v60 }
 0xb7c   :  { %4185 = vmatpush1.bf16.msra.mxu1 %v5072_v63 }
 0xb7d   :  { %4199 = vmatprep.subr.bf16.mxu1 %v5038_v27 }
 0xc42   :  { %v1643_v30 = vpop.f32.mrb[14].mxu1 }
 0xc43   :  { %v1645_v31 = vpop.f32.mrb[15].mxu1  ;;  %v1650_v36 = vrot.slane %v1643_v30, 6 }
 0xc44   :  { %v1651_v32 = vrot.slane %v1645_v31, 6 }
 0xc45   :  { %v1654_v38 = vadd.f32 %v1650_v36, %v1573_v37 }
 0xc46   :  { %v1655_v34 = vadd.f32 %v1651_v32, %v1574_v33  ;;  %v196_v33 = vld [vmem:[#allocation12] sm:$0xff] }
 0xc47   :  { %v3583_v39 = vmul.f32 -1.442695, %v1654_v38 }
 0xc48   :  { %4380 = vtanh.f32 %v1655_v34  ;;  %v3584_v55 = vmul.f32 -1.442695, %v1655_v34  ;;  %v197_v34 = vld [vmem:[#allocation12 + $0x8] sm:$0xff] }
 0xc49   :  { %4382 = vpow2.f32 %v3583_v39  ;;  %v198_v39 = vld [vmem:[#allocation12 + $0x10] sm:$0xff] }
 0xc52   :  { %v4381_v35 = vpop.eup %4380 }
 0xc53   :  { %1674 = vrot.lane.b32.xlu0 %v4381_v35, %s4774_s15  ;;  %v4383_v40 = vpop.eup %4382  ;;  %v5182_v35 = vpack.c.bf16 %v197_v34, %v196_v33 }
 0xc54   :  { %v1662_v41 = vadd.f32 1.0, %v4383_v40  ;;  %v199_v40 = vld [vmem:[#allocation12 + $0x18] sm:$0xff] }
 0xc55   :  { %4026 = vmatpush3.bf16.msra.mxu0 %v5182_v35 }
 0xc56   :  { %4384 = vrcp.f32 %v1662_v41  ;;  %4027 = vmatprep.subr.bf16.mxu0 %v4773_v19  ;;  %v2114_v41 = vld [vmem:[#allocation2 + $0x18] sm:$0xc0] }
 0xc60   :  { %v4385_v42 = vpop.eup %4384 }
 0xc61   :  { %v1672_v49 = vmul.f32 %v4385_v42, %v1670_v45 }
 0xcc5   :  { %v1675_v44 = vpop.permute.xlu0 %1674 }
 0xcc6   :  { %v1677_v27 = vmul.f32 %v4385_v42, %v1675_v44  ;;  %v5186_v42 = vpack.c.bf16 %v199_v40, %v198_v39 }
 0xcc8   :  { %1679 = vrot.lane.b32.xlu1 %v1677_v27, %s4774_s15  ;;  %4029 = vmatpush3.bf16.msra.mxu0 %v5186_v42 }
 0xcc9   :  { %4046 = vmatprep.subr.bf16.mxu0 %v4773_v19 }
 0xd3a   :  { %v1680_v50 = vpop.permute.xlu1 %1679 }
 0xd3b   :  { %v1682_v51 = vadd.f32 %v1680_v50, %v1672_v49  ;;  %v2113_v49 = vld [vmem:[#allocation2 + $0x10] sm:$0xc0] }
 0xd3d   :  { %4386 = vtanh.f32 %v1682_v51  ;;  %v1940_v17 = vrot.slane %v1682_v51, 6 }
 0xd3e   :  { %4388 = vpow2.f32 %v3584_v55 }
 0xd47   :  { %v4387_v52 = vpop.eup %4386 }
 0xd48   :  { %1685 = vrot.lane.b32.xlu0 %v4387_v52, %s4774_s15  ;;  %v4389_v57 = vpop.eup %4388 }
 0xd49   :  { %v1663_v58 = vadd.f32 1.0, %v4389_v57 }
 0xd4b   :  { %4390 = vrcp.f32 %v1663_v58 }
 0xd55   :  { %v4391_v61 = vpop.eup %4390 }
 0xdba   :  { %v1686_v62 = vpop.permute.xlu0 %1685 }
 0xdbb   :  { %v1688_v1 = vmul.f32 %v4391_v61, %v1686_v62 }
 0xdbd   :  { %v5157_v2 = vrot.slane %v1688_v1, 2  ;;  %v2384_v1 = vld [vmem:[#allocation15 + $0x8] sm:$0xff] }
 0xdbf   :  { %3587 = vmatmul.mubr.msk.f32.vlgmr.msra.gmra.mrb[16].mxu1 %vm499_vm3, %v5157_v2 }
 0xdc0   :  { %4201 = vmatpush1.bf16.msra.mxu1 %v5050_v46  ;;  %2181 = vmatprep.mubr.f32.mxu1 %v4772_v0  ;;  %v1844_v46 = vld [vmem:[#allocation2 + $0x18] sm:$0x30] }
 0xdc1   :  { %4203 = vmatprep.subr.bf16.mxu1 %v5054_v48 }
 0xdc4   :  { %4205 = vmatpush1.bf16.msra.mxu1 %v5059_v53  ;;  %v1843_v53 = vld [vmem:[#allocation2 + $0x10] sm:$0x30] }
 0xdc5   :  { %4207 = vmatprep.subr.bf16.mxu1 %v5063_v54 }
 0xdc8   :  { %4209 = vmatpush1.bf16.msra.mxu1 %v5066_v59 }
 0xdc9   :  { %4211 = vmatprep.subr.bf16.mxu1 %v5069_v60 }
 0xdcc   :  { %4213 = vmatpush1.bf16.msra.mxu1 %v5072_v63 }
 0xdcd   :  { %4226 = vmatprep.subr.bf16.mxu1 %v4773_v19 }
 0xe92   :  { %v1913_v3 = vpop.f32.mrb[16].mxu1 }
 0xe93   :  { %v1915_v7 = vpop.f32.mrb[17].mxu1  ;;  %v1920_v48 = vrot.slane %v1913_v3, 4 }
 0xe94   :  { %v1921_v11 = vrot.slane %v1915_v7, 4 }
 0xe95   :  { %v1924_v54 = vadd.f32 %v1920_v48, %v1843_v53 }
 0xe96   :  { %v1925_v12 = vadd.f32 %v1921_v11, %v1844_v46  ;;  %v2385_v46 = vld [vmem:[#allocation15 + $0x10] sm:$0xff] }
 0xe97   :  { %v3588_v14 = vmul.f32 -1.442695, %v1924_v54 }
 0xe98   :  { %4392 = vtanh.f32 %v1925_v12  ;;  %v3589_v25 = vmul.f32 -1.442695, %v1925_v12  ;;  %v2386_v12 = vld [vmem:[#allocation15 + $0x18] sm:$0xff] }
 0xe99   :  { %4394 = vpow2.f32 %v3588_v14  ;;  %v4230_v48 = vpack.c.bf16 %v2386_v12, %v2385_v46 }
 0xea2   :  { %v4393_v13 = vpop.eup %4392 }
 0xea3   :  { %1944 = vrot.lane.b32.xlu1 %v4393_v13, %s4774_s15  ;;  %v4395_v59 = vpop.eup %4394 }
 0xea4   :  { %v1932_v60 = vadd.f32 1.0, %v4395_v59  ;;  %v416_v59 = vld [vmem:[#allocation3 + $0xe] sm:$0x3] }
 0xea6   :  { %4396 = vrcp.f32 %v1932_v60 }
 0xeb0   :  { %v4397_v63 = vpop.eup %4396 }
 0xeb1   :  { %v1942_v20 = vmul.f32 %v4397_v63, %v1940_v17 }
 0xf15   :  { %v1945_v15 = vpop.permute.xlu1 %1944 }
 0xf16   :  { %v1947_v16 = vmul.f32 %v4397_v63, %v1945_v15 }
 0xf18   :  { %1949 = vrot.lane.b32.xlu0 %v1947_v16, %s4774_s15 }
 0xf8a   :  { %v1950_v21 = vpop.permute.xlu0 %1949 }
 0xf8b   :  { %v5172_v22 = vadd.f32 %v1950_v21, %v1942_v20 }
 0xf8d   :  { %4398 = vtanh.f32 %v5172_v22  ;;  %v2210_v3 = vrot.slane %v5172_v22, 6 }
 0xf8e   :  { %4400 = vpow2.f32 %v3589_v25 }
 0xf97   :  { %v4399_v24 = vpop.eup %4398 }
 0xf98   :  { %1955 = vrot.lane.b32.xlu1 %v4399_v24, %s4774_s15  ;;  %v4401_v10 = vpop.eup %4400 }
 0xf99   :  { %v1933_v26 = vadd.f32 1.0, %v4401_v10 }
 0xf9b   :  { %4402 = vrcp.f32 %v1933_v26 }
 0xfa5   :  { %v4403_v28 = vpop.eup %4402 }
0x100a   :  { %v1956_v30 = vpop.permute.xlu1 %1955 }
0x100b   :  { %v1958_v31 = vmul.f32 %v4403_v28, %v1956_v30 }
0x100d   :  { %v5176_v32 = vrot.slane %v1958_v31, 4 }
0x100f   :  { %3592 = vmatmul.mubr.msk.f32.vlgmr.msra.gmra.mrb[18].mxu1 %vm499_vm3, %v5176_v32 }
0x1010   :  { %3927 = vmatprep.mubr.msk.f32.mxu1 %vm4775_vm1, %v4772_v0 }
0x10e2   :  { %v2183_v36 = vpop.f32.mrb[18].mxu1 }
0x10e3   :  { %v2185_v37 = vpop.f32.mrb[19].mxu1  ;;  %v2190_v45 = vrot.slane %v2183_v36, 2 }
0x10e4   :  { %v2191_v38 = vrot.slane %v2185_v37, 2 }
0x10e5   :  { %v2194_v50 = vadd.f32 %v2190_v45, %v2113_v49  ;;  %v493_v45 = vld [vmem:[#allocation16] sm:$0xff]  ;;  %v494_v49 = vld [vmem:[#allocation16 + $0x8] sm:$0xff] }
0x10e6   :  { %v5188_v44 = vadd.f32 %v2191_v38, %v2114_v41  ;;  %v1156_v41 = vld [vmem:[#allocation3 + $0x6] sm:$0x3] }
0x10e7   :  { %v3593_v51 = vmul.f32 -1.442695, %v2194_v50  ;;  %v4233_v50 = vpack.c.bf16 %v494_v49, %v493_v45  ;;  %v202_v45 = vld [vmem:[#allocation13 + $0x10] sm:$0xff] }
0x10e8   :  { %4404 = vtanh.f32 %v5188_v44 }
0x10e9   :  { %4406 = vpow2.f32 %v3593_v51  ;;  %v1233_v51 = vld [vmem:[#allocation3 + $0x8] sm:$0x3] }
0x10f2   :  { %v4405_v27 = vpop.eup %4404 }
0x10f3   :  { %2214 = vrot.lane.b32.xlu0 %v4405_v27, %s4774_s15  ;;  %v4407_v52 = vpop.eup %4406 }
0x10f4   :  { %v2202_v55 = vadd.f32 1.0, %v4407_v52  ;;  %v495_v52 = vld [vmem:[#allocation16 + $0x10] sm:$0xff] }
0x10f6   :  { %4408 = vrcp.f32 %v2202_v55  ;;  %v496_v55 = vld [vmem:[#allocation16 + $0x18] sm:$0xff] }
0x10f7   :  { %417 = vrot.lane.b32.xlu0 %v5052_v47, %s4776_s7  ;;  %v2383_v47 = vld [vmem:[#allocation15] sm:$0xff] }
0x10fb   :  { %964 = vrot.lane.b32.xlu0 %v5109_v9, %s4776_s7 }
0x1100   :  { %v4409_v57 = vpop.eup %4408 }
0x1101   :  { %v2212_v7 = vmul.f32 %v4409_v57, %v2210_v3 }
0x1165   :  { %v2215_v58 = vpop.permute.xlu0 %2214 }
0x1166   :  { %v2217_v61 = vmul.f32 %v4409_v57, %v2215_v58 }
0x1168   :  { %2219 = vrot.lane.b32.xlu1 %v2217_v61, %s4774_s15 }
0x1169   :  { %v5199_v62 = vpop.permute.xlu0 %417 }
0x116a   :  { %3763 = vmatmul.mubr.msk.f32.vlgmr.msra.gmra.mrb[0].mxu0 %vm340_vm2, %v5199_v62 }
0x116b   :  { %4048 = vmatpush3.bf16.msra.mxu0 %v5025_v18  ;;  %3773 = vmatprep.mubr.msk.f32.mxu0 %vm4775_vm1, %v4772_v0 }
0x116c   :  { %694 = vrot.lane.b32.xlu1 %v5093_v43, %s4776_s7  ;;  %4049 = vmatprep.subr.bf16.mxu0 %v4773_v19 }
0x116d   :  { %v965_v14 = vpop.permute.xlu0 %964 }
0x116f   :  { %4051 = vmatpush3.bf16.msra.mxu0 %v5034_v23 }
0x1170   :  { %1234 = vrot.lane.b32.xlu1 %v5125_v56, %s4776_s7  ;;  %4052 = vmatprep.subr.bf16.mxu0 %v4773_v19 }
0x1172   :  { %3774 = vmatmul.mubr.msk.f32.vlgmr.msra.gmra.mrb[2].mxu0 %vm340_vm2, %v5093_v43  ;;  %v4227_v43 = vpack.c.bf16 %v2384_v1, %v2383_v47  ;;  %v4236_v1 = vpack.c.bf16 %v496_v55, %v495_v52 }
0x1173   :  { %4054 = vmatpush3.bf16.msra.mxu0 %v5182_v35  ;;  %3784 = vmatprep.mubr.msk.f32.mxu0 %vm4775_vm1, %v4772_v0 }
0x1174   :  { %1497 = vrot.lane.b32.xlu1 %v5141_v29, %s4776_s7  ;;  %4055 = vmatprep.subr.bf16.mxu0 %v4773_v19 }
0x1175   :  { %4228 = vmatpush3.bf16.msra.mxu1 %v4227_v43 }
0x1176   :  { %4229 = vmatprep.subr.bf16.mxu1 %v4773_v19 }
0x1177   :  { %4057 = vmatpush3.bf16.msra.mxu0 %v5186_v42 }
0x1178   :  { %2037 = vrot.lane.b32.xlu1 %v5176_v32, %s4776_s7  ;;  %4074 = vmatprep.subr.bf16.mxu0 %v4773_v19 }
0x1179   :  { %4231 = vmatpush3.bf16.msra.mxu1 %v4230_v48 }
0x117a   :  { %4238 = vmatprep.subr.bf16.mxu1 %v4773_v19 }
0x11da   :  { %v2220_v11 = vpop.permute.xlu1 %2219 }
0x11db   :  { %v2222_v13 = vadd.f32 %v2220_v11, %v2212_v7 }
0x11dd   :  { %4410 = vtanh.f32 %v2222_v13 }
0x11de   :  { %v695_v53 = vpop.permute.xlu1 %694 }
0x11df   :  { %3785 = vmatmul.mubr.msk.f32.vlgmr.msra.gmra.mrb[4].mxu0 %vm340_vm2, %v695_v53 }
0x11e0   :  { %4076 = vmatpush3.bf16.msra.mxu0 %v5025_v18  ;;  %3795 = vmatprep.mubr.msk.f32.mxu0 %vm4775_vm1, %v4772_v0 }
0x11e1   :  { %4077 = vmatprep.subr.bf16.mxu0 %v4773_v19 }
0x11e4   :  { %4079 = vmatpush3.bf16.msra.mxu0 %v5034_v23 }
0x11e5   :  { %4080 = vmatprep.subr.bf16.mxu0 %v4773_v19 }
0x11e7   :  { %v4411_v54 = vpop.eup %4410  ;;  %3796 = vmatmul.mubr.msk.f32.vlgmr.msra.gmra.mrb[6].mxu0 %vm340_vm2, %v5109_v9  ;;  %v1235_v9 = vpop.permute.xlu1 %1234 }
0x11e8   :  { %4082 = vmatpush3.bf16.msra.mxu0 %v5182_v35  ;;  %2225 = vrot.lane.b32.xlu0 %v4411_v54, %s4774_s15 }
0x11e9   :  { %4083 = vmatprep.subr.bf16.mxu0 %v4773_v19  ;;  %3806 = vmatprep.mubr.msk.f32.mxu0 %vm4775_vm1, %v4772_v0 }
0x11ec   :  { %4085 = vmatpush3.bf16.msra.mxu0 %v5186_v42  ;;  %1767 = vrot.lane.b32.xlu0 %v5157_v2, %s4776_s7 }
0x11ed   :  { %4102 = vmatprep.subr.bf16.mxu0 %v4773_v19 }
0x11ef   :  { %3807 = vmatmul.mubr.msk.f32.vlgmr.msra.gmra.mrb[8].mxu0 %vm340_vm2, %v965_v14 }
0x11f0   :  { %4104 = vmatpush3.bf16.msra.mxu0 %v5025_v18  ;;  %3817 = vmatprep.mubr.msk.f32.mxu0 %vm4775_vm1, %v4772_v0 }
0x11f1   :  { %4105 = vmatprep.subr.bf16.mxu0 %v4773_v19 }
0x11f4   :  { %4107 = vmatpush3.bf16.msra.mxu0 %v5034_v23 }
0x11f5   :  { %4108 = vmatprep.subr.bf16.mxu0 %v4773_v19 }
0x11f7   :  { %3818 = vmatmul.mubr.msk.f32.vlgmr.msra.gmra.mrb[10].mxu0 %vm340_vm2, %v5125_v56  ;;  %v1498_v56 = vpop.permute.xlu1 %1497 }
0x11f8   :  { %4110 = vmatpush3.bf16.msra.mxu0 %v5182_v35  ;;  %3828 = vmatprep.mubr.msk.f32.mxu0 %vm4775_vm1, %v4772_v0 }
0x11f9   :  { %4111 = vmatprep.subr.bf16.mxu0 %v4773_v19 }
0x11fb   :  { %v2038_v30 = vpop.permute.xlu1 %2037 }
0x11fc   :  { %4113 = vmatpush3.bf16.msra.mxu0 %v5186_v42 }
0x11fd   :  { %4130 = vmatprep.subr.bf16.mxu0 %v4773_v19 }
0x11ff   :  { %3829 = vmatmul.mubr.msk.f32.vlgmr.msra.gmra.mrb[12].mxu0 %vm340_vm2, %v1235_v9 }
0x1200   :  { %4132 = vmatpush3.bf16.msra.mxu0 %v5025_v18  ;;  %3839 = vmatprep.mubr.msk.f32.mxu0 %vm4775_vm1, %v4772_v0 }
0x1201   :  { %4133 = vmatprep.subr.bf16.mxu0 %v4773_v19 }
0x1204   :  { %4135 = vmatpush3.bf16.msra.mxu0 %v5034_v23 }
0x1205   :  { %4136 = vmatprep.subr.bf16.mxu0 %v4773_v19 }
0x1207   :  { %3840 = vmatmul.mubr.msk.f32.vlgmr.msra.gmra.mrb[14].mxu0 %vm340_vm2, %v5141_v29  ;;  %v3594_v29 = vmul.f32 -1.442695, %v5188_v44 }
0x1208   :  { %4138 = vmatpush3.bf16.msra.mxu0 %v5182_v35  ;;  %3850 = vmatprep.mubr.msk.f32.mxu0 %vm4775_vm1, %v4772_v0 }
0x1209   :  { %4139 = vmatprep.subr.bf16.mxu0 %v4773_v19  ;;  %4412 = vpow2.f32 %v3594_v29 }
0x120c   :  { %4141 = vmatpush3.bf16.msra.mxu0 %v5186_v42 }
0x120d   :  { %4158 = vmatprep.subr.bf16.mxu0 %v4773_v19 }
0x120f   :  { %3851 = vmatmul.mubr.msk.f32.vlgmr.msra.gmra.mrb[16].mxu0 %vm340_vm2, %v1498_v56 }
0x1210   :  { %4160 = vmatpush3.bf16.msra.mxu0 %v5025_v18  ;;  %3861 = vmatprep.mubr.msk.f32.mxu0 %vm4775_vm1, %v4772_v0 }
0x1211   :  { %4161 = vmatprep.subr.bf16.mxu0 %v4773_v19 }
0x1213   :  { %v4413_v21 = vpop.eup %4412 }
0x1214   :  { %4163 = vmatpush3.bf16.msra.mxu0 %v5034_v23  ;;  %v2203_v22 = vadd.f32 1.0, %v4413_v21 }
0x1215   :  { %4164 = vmatprep.subr.bf16.mxu0 %v4773_v19 }
0x1216   :  { %4414 = vrcp.f32 %v2203_v22 }
0x1217   :  { %3862 = vmatmul.mubr.msk.f32.vlgmr.msra.gmra.mrb[18].mxu0 %vm340_vm2, %v5157_v2  ;;  %v616_v2 = vld [vmem:[#allocation3 + $0x2] sm:$0x3] }
0x1218   :  { %4166 = vmatpush3.bf16.msra.mxu0 %v5182_v35  ;;  %3872 = vmatprep.mubr.msk.f32.mxu0 %vm4775_vm1, %v4772_v0 }
0x1219   :  { %4167 = vmatprep.subr.bf16.mxu0 %v4773_v19 }
0x121c   :  { %4169 = vmatpush3.bf16.msra.mxu0 %v5186_v42 }
0x121d   :  { %4186 = vmatprep.subr.bf16.mxu0 %v4773_v19 }
0x1220   :  { %v4415_v24 = vpop.eup %4414 }
0x123d   :  { %v487_v60 = vpop.f32.mrb[0].mxu0 }
0x123e   :  { %v491_v63 = vadd.f32 %v487_v60, %v416_v59  ;;  %v3764_v15 = vpop.f32.mrb[1].mxu0 }
0x1240   :  { %492 = vst [vmem:[#allocation3 + $0xe] sm:$0x3] %v491_v63 }
0x1245   :  { %v687_v16 = vpop.f32.mrb[2].mxu0 }
0x1246   :  { %v691_v17 = vadd.f32 %v687_v16, %v616_v2  ;;  %v3775_v20 = vpop.f32.mrb[3].mxu0 }
0x1248   :  { %692 = vst [vmem:[#allocation3 + $0x2] sm:$0x3] %v691_v17 }
0x124f   :  { %v2036_v20 = vld [vmem:[#allocation3 + $0x2] sm:$0x3] }
0x125a   :  { %v2226_v25 = vpop.permute.xlu0 %2225 }
0x125b   :  { %v2228_v10 = vmul.f32 %v4415_v24, %v2226_v25  ;;  %v2229_v25 = vld [vmem:[#allocation3 + $0xe] sm:$0x3] }
0x125d   :  { %v2231_v26 = vrot.slane %v2228_v10, 6 }
0x125e   :  { %v1768_v28 = vpop.permute.xlu0 %1767 }
0x125f   :  { %3873 = vmatmul.mubr.msk.f32.vlgmr.msra.gmra.mrb[20].mxu0 %vm340_vm2, %v1768_v28  ;;  %2307 = vrot.lane.b32.xlu0 %v2231_v26, %s4776_s7 }
0x1260   :  { %4188 = vmatpush3.bf16.msra.mxu0 %v5025_v18  ;;  %3928 = vmatmul.mubr.msk.f32.vlgmr.msra.gmra.mrb[20].mxu1 %vm340_vm2, %v2231_v26 }
0x1261   :  { %4189 = vmatprep.subr.bf16.mxu0 %v4773_v19  ;;  %3883 = vmatprep.mubr.msk.f32.mxu0 %vm4775_vm1, %v4772_v0 }
0x1262   :  { %3949 = vmatprep.mubr.msk.f32.mxu1 %vm4775_vm1, %v4772_v0 }
0x1264   :  { %4191 = vmatpush3.bf16.msra.mxu0 %v5034_v23 }
0x1265   :  { %4192 = vmatprep.subr.bf16.mxu0 %v4773_v19 }
0x1267   :  { %3884 = vmatmul.mubr.msk.f32.vlgmr.msra.gmra.mrb[22].mxu0 %vm340_vm2, %v5176_v32 }
0x1268   :  { %4194 = vmatpush3.bf16.msra.mxu0 %v5182_v35  ;;  %3894 = vmatprep.mubr.msk.f32.mxu0 %vm4775_vm1, %v4772_v0 }
0x1269   :  { %4195 = vmatprep.subr.bf16.mxu0 %v4773_v19 }
0x126c   :  { %4197 = vmatpush3.bf16.msra.mxu0 %v5186_v42 }
0x126d   :  { %4214 = vmatprep.subr.bf16.mxu0 %v4773_v19 }
0x126f   :  { %3895 = vmatmul.mubr.msk.f32.vlgmr.msra.gmra.mrb[24].mxu0 %vm340_vm2, %v2038_v30  ;;  %v2306_v30 = vld [vmem:[#allocation3] sm:$0x3] }
0x1270   :  { %4216 = vmatpush3.bf16.msra.mxu0 %v5025_v18  ;;  %3905 = vmatprep.mubr.msk.f32.mxu0 %vm4775_vm1, %v4772_v0  ;;  %v693_v18 = vld [vmem:[#allocation3 + $0xc] sm:$0x3] }
0x1271   :  { %4217 = vmatprep.subr.bf16.mxu0 %v4773_v19 }
0x1274   :  { %4219 = vmatpush3.bf16.msra.mxu0 %v5034_v23  ;;  %v886_v23 = vld [vmem:[#allocation3 + $0x4] sm:$0x3] }
0x1275   :  { %4220 = vmatprep.subr.bf16.mxu0 %v4773_v19 }
0x1277   :  { %3906 = vmatmul.mubr.msk.f32.vlgmr.msra.gmra.mrb[26].mxu0 %vm340_vm2, %v2231_v26 }
0x1278   :  { %4222 = vmatpush3.bf16.msra.mxu0 %v5182_v35  ;;  %3916 = vmatprep.mubr.msk.f32.mxu0 %vm4775_vm1, %v4772_v0  ;;  %v963_v35 = vld [vmem:[#allocation3 + $0xa] sm:$0x3] }
0x1279   :  { %4223 = vmatprep.subr.bf16.mxu0 %v4773_v19 }
0x127c   :  { %4225 = vmatpush3.bf16.msra.mxu0 %v5186_v42 }
0x127d   :  { %4232 = vmatprep.subr.bf16.mxu0 %v4773_v19 }
0x12b2   :  { %v764_v31 = vpop.f32.mrb[4].mxu0 }
0x12b3   :  { %v768_v32 = vadd.f32 %v764_v31, %v693_v18  ;;  %v3786_v33 = vpop.f32.mrb[5].mxu0 }
0x12b5   :  { %769 = vst [vmem:[#allocation3 + $0xc] sm:$0x3] %v768_v32 }
0x12ba   :  { %v957_v34 = vpop.f32.mrb[6].mxu0 }
0x12bb   :  { %v961_v36 = vadd.f32 %v957_v34, %v886_v23  ;;  %v3797_v37 = vpop.f32.mrb[7].mxu0 }
0x12bc   :  { %v1959_v15 = vld [vmem:[#allocation3 + $0xc] sm:$0x3] }
0x12bd   :  { %962 = vst [vmem:[#allocation3 + $0x4] sm:$0x3] %v961_v36 }
0x12c2   :  { %v1034_v38 = vpop.f32.mrb[8].mxu0 }
0x12c3   :  { %v1038_v39 = vadd.f32 %v1034_v38, %v963_v35  ;;  %v3808_v40 = vpop.f32.mrb[9].mxu0 }
0x12c4   :  { %v1766_v56 = vld [vmem:[#allocation3 + $0x4] sm:$0x3] }
0x12c5   :  { %1039 = vst [vmem:[#allocation3 + $0xa] sm:$0x3] %v1038_v39 }
0x12ca   :  { %v1227_v44 = vpop.f32.mrb[10].mxu0 }
0x12cb   :  { %v1231_v42 = vadd.f32 %v1227_v44, %v1156_v41  ;;  %v3819_v27 = vpop.f32.mrb[11].mxu0 }
0x12cc   :  { %v1689_v53 = vld [vmem:[#allocation3 + $0xa] sm:$0x3] }
0x12cd   :  { %1232 = vst [vmem:[#allocation3 + $0x6] sm:$0x3] %v1231_v42  ;;  %v200_v42 = vld [vmem:[#allocation13] sm:$0xff]  ;;  %v201_v27 = vld [vmem:[#allocation13 + $0x8] sm:$0xff] }
0x12ce   :  { %v5337_v49 = vpack.c.bf16 %v201_v27, %v200_v42 }
0x12d0   :  { %4240 = vmatpush3.bf16.msra.mxu1 %v5337_v49 }
0x12d1   :  { %v2308_v57 = vpop.permute.xlu0 %2307  ;;  %4241 = vmatprep.subr.bf16.mxu1 %v4773_v19 }
0x12d2   :  { %v1304_v58 = vpop.f32.mrb[12].mxu0  ;;  %3917 = vmatmul.mubr.msk.f32.vlgmr.msra.gmra.mrb[28].mxu0 %vm340_vm2, %v2308_v57 }
0x12d3   :  { %v1308_v61 = vadd.f32 %v1304_v58, %v1233_v51  ;;  %v3830_v47 = vpop.f32.mrb[13].mxu0  ;;  %4234 = vmatpush3.bf16.msra.mxu0 %v4233_v50  ;;  %3938 = vmatprep.mubr.msk.f32.mxu0 %vm4775_vm1, %v4772_v0  ;;  %v203_v50 = vld [vmem:[#allocation13 + $0x18] sm:$0xff] }
0x12d4   :  { %4235 = vmatprep.subr.bf16.mxu0 %v4773_v19  ;;  %v1496_v46 = vld [vmem:[#allocation3 + $0x6] sm:$0x3]  ;;  %v5340_v51 = vpack.c.bf16 %v203_v50, %v202_v45 }
0x12d5   :  { %1309 = vst [vmem:[#allocation3 + $0x8] sm:$0x3] %v1308_v61 }
0x12d6   :  { %4243 = vmatpush3.bf16.msra.mxu1 %v5340_v51 }
0x12d7   :  { %4237 = vmatpush3.bf16.msra.mxu0 %v4236_v1  ;;  %4250 = vmatprep.subr.bf16.mxu1 %v4773_v19 }
0x12d8   :  { %4244 = vmatprep.subr.bf16.mxu0 %v4773_v19 }
0x12da   :  { %v1490_v43 = vpop.f32.mrb[14].mxu0  ;;  %3939 = vmatmul.mubr.msk.f32.vlgmr.msra.gmra.mrb[30].mxu0 %vm340_vm2, %v5199_v62 }
0x12db   :  { %v3841_v3 = vpop.f32.mrb[15].mxu0  ;;  %3960 = vmatprep.mubr.msk.f32.mxu0 %vm4775_vm1, %v4772_v0  ;;  %4246 = vmatpush3.bf16.msra.mxu0 %v5337_v49 }
0x12dc   :  { %v1420_v7 = vld [vmem:[#allocation3 + $0x8] sm:$0x3]  ;;  %4247 = vmatprep.subr.bf16.mxu0 %v4773_v19 }
0x12dd   :  { %v1494_v11 = vadd.f32 %v1490_v43, %v1420_v7 }
0x12df   :  { %1495 = vst [vmem:[#allocation3 + $0x8] sm:$0x3] %v1494_v11  ;;  %4249 = vmatpush3.bf16.msra.mxu0 %v5340_v51 }
0x12e0   :  { %4256 = vmatprep.subr.bf16.mxu0 %v4773_v19 }
0x12e2   :  { %v1567_v12 = vpop.f32.mrb[16].mxu0 }
0x12e3   :  { %v1571_v13 = vadd.f32 %v1567_v12, %v1496_v46  ;;  %v3852_v48 = vpop.f32.mrb[17].mxu0 }
0x12e5   :  { %1572 = vst [vmem:[#allocation3 + $0x6] sm:$0x3] %v1571_v13 }
0x12ea   :  { %v1760_v54 = vpop.f32.mrb[18].mxu0 }
0x12eb   :  { %v1764_v14 = vadd.f32 %v1760_v54, %v1689_v53  ;;  %v3863_v9 = vpop.f32.mrb[19].mxu0 }
0x12ed   :  { %1765 = vst [vmem:[#allocation3 + $0xa] sm:$0x3] %v1764_v14 }
0x1332   :  { %v1837_v29 = vpop.f32.mrb[20].mxu0 }
0x1333   :  { %v1841_v62 = vadd.f32 %v1837_v29, %v1766_v56  ;;  %v2453_v59 = vpop.f32.mrb[20].mxu1  ;;  %v3874_v60 = vpop.f32.mrb[21].mxu0 }
0x1334   :  { %v3929_v63 = vpop.f32.mrb[21].mxu1 }
0x1335   :  { %1842 = vst [vmem:[#allocation3 + $0x4] sm:$0x3] %v1841_v62 }
0x133a   :  { %v2030_v2 = vpop.f32.mrb[22].mxu0 }
0x133b   :  { %v2034_v16 = vadd.f32 %v2030_v2, %v1959_v15  ;;  %v3885_v17 = vpop.f32.mrb[23].mxu0 }
0x133c   :  { %v2677_v60 = vld [vmem:[#allocation3 + $0x4] sm:$0x3] }
0x133d   :  { %2035 = vst [vmem:[#allocation3 + $0xc] sm:$0x3] %v2034_v16 }
0x1342   :  { %v2107_v21 = vpop.f32.mrb[24].mxu0 }
0x1343   :  { %v2111_v22 = vadd.f32 %v2107_v21, %v2036_v20  ;;  %v3896_v24 = vpop.f32.mrb[25].mxu0 }
0x1345   :  { %2112 = vst [vmem:[#allocation3 + $0x2] sm:$0x3] %v2111_v22 }
0x134a   :  { %v2300_v10 = vpop.f32.mrb[26].mxu0 }
0x134b   :  { %v2304_v26 = vadd.f32 %v2300_v10, %v2229_v25  ;;  %v3907_v28 = vpop.f32.mrb[27].mxu0 }
0x134c   :  { %v2572_v61 = vld [vmem:[#allocation3 + $0x2] sm:$0x3] }
0x134d   :  { %2305 = vst [vmem:[#allocation3 + $0xe] sm:$0x3] %v2304_v26 }
0x13a5   :  { %v2377_v18 = vpop.f32.mrb[28].mxu0 }
0x13a6   :  { %v2381_v31 = vadd.f32 %v2377_v18, %v2306_v30  ;;  %v3918_v32 = vpop.f32.mrb[29].mxu0 }
0x13a8   :  { %2382 = vst [vmem:[#allocation3] sm:$0x3] %v2381_v31 }
0x13ad   :  { %v2523_v33 = vpop.f32.mrb[30].mxu0 }
0x13ae   :  { %v5334_v23 = vadd.f32 %v2523_v33, %v2453_v59  ;;  %v3940_v34 = vpop.f32.mrb[31].mxu0  ;;  %v2778_v33 = vld [vmem:[#allocation3 + $0x6] sm:$0x3] }
0x13af   :  { %v2553_v36 = vld [vmem:[#allocation3] sm:$0x3] }
0x13b0   :  { %4416 = vtanh.f32 %v2553_v36  ;;  %v3601_v35 = vmul.f32 -1.442695, %v2553_v36 }
0x13b2   :  { %4418 = vpow2.f32 %v3601_v35 }
0x13ba   :  { %v4417_v37 = vpop.eup %4416 }
0x13bb   :  { %2562 = vrot.lane.b32.xlu1 %v4417_v37, %s4777_s17 }
0x13bc   :  { %v4419_v38 = vpop.eup %4418 }
0x13bd   :  { %v2557_v39 = vadd.f32 1.0, %v4419_v38 }
0x13bf   :  { %4420 = vrcp.f32 %v2557_v39 }
0x13c9   :  { %v4421_v40 = vpop.eup %4420 }
0x142d   :  { %v2563_v41 = vpop.permute.xlu1 %2562 }
0x142e   :  { %v2565_v44 = vmul.f32 %v4421_v40, %v2563_v41 }
0x1430   :  { %4422 = vtanh.f32 %v2565_v44 }
0x143a   :  { %v4423_v52 = vpop.eup %4422 }
0x143b   :  { %2568 = vrot.lane.b32.xlu0 %v4423_v52, %s4774_s15 }
0x14ad   :  { %v2569_v55 = vpop.permute.xlu0 %2568 }
0x14ae   :  { %v2571_v57 = vmul.f32 %v4421_v40, %v2569_v55 }
0x14b0   :  { %2574 = vrot.lane.b32.xlu1 %v2571_v57, %s4774_s15 }
0x14b4   :  { %2657 = vrot.lane.b32.xlu1 %v2565_v44, %s4777_s17 }
0x1522   :  { %v2575_v58 = vpop.permute.xlu1 %2574 }
0x1523   :  { %3950 = vmatmul.mubr.msk.f32.vlgmr.msra.gmra.mrb[22].mxu1 %vm340_vm2, %v2575_v58 }
0x1524   :  { %4252 = vmatpush3.bf16.msra.mxu1 %v5337_v49  ;;  %3971 = vmatprep.mubr.msk.f32.mxu1 %vm4775_vm1, %v4772_v0 }
0x1525   :  { %4253 = vmatprep.subr.bf16.mxu1 %v4773_v19 }
0x1526   :  { %v2658_v53 = vpop.permute.xlu1 %2657 }
0x1528   :  { %4255 = vmatpush3.bf16.msra.mxu1 %v5340_v51 }
0x1529   :  { %4262 = vmatprep.subr.bf16.mxu1 %v4773_v19 }
0x15f6   :  { %v2644_v47 = vpop.f32.mrb[22].mxu1 }
0x15f7   :  { %v2648_v1 = vadd.f32 %v2644_v47, %v2572_v61  ;;  %v3951_v43 = vpop.f32.mrb[23].mxu1  ;;  %v2879_v61 = vld [vmem:[#allocation3 + $0x8] sm:$0x3] }
0x15f9   :  { %4424 = vtanh.f32 %v2648_v1  ;;  %v3603_v7 = vmul.f32 -1.442695, %v2648_v1 }
0x15fb   :  { %4426 = vpow2.f32 %v3603_v7 }
0x1603   :  { %v4425_v3 = vpop.eup %4424 }
0x1604   :  { %2662 = vrot.lane.b32.xlu0 %v4425_v3, %s4777_s17 }
0x1605   :  { %v4427_v11 = vpop.eup %4426 }
0x1606   :  { %v2652_v46 = vadd.f32 1.0, %v4427_v11 }
0x1608   :  { %4428 = vrcp.f32 %v2652_v46 }
0x1612   :  { %v4429_v12 = vpop.eup %4428 }
0x1613   :  { %v2660_v54 = vmul.f32 %v4429_v12, %v2658_v53 }
0x1676   :  { %v2663_v13 = vpop.permute.xlu0 %2662 }
0x1677   :  { %v2665_v48 = vmul.f32 %v4429_v12, %v2663_v13 }
0x1679   :  { %2667 = vrot.lane.b32.xlu0 %v2665_v48, %s4777_s17 }
0x16eb   :  { %v2668_v14 = vpop.permute.xlu0 %2667 }
0x16ec   :  { %v2670_v9 = vadd.f32 %v2668_v14, %v2660_v54 }
0x16ee   :  { %4430 = vtanh.f32 %v2670_v9 }
0x16f8   :  { %v4431_v56 = vpop.eup %4430 }
0x16f9   :  { %2673 = vrot.lane.b32.xlu1 %v4431_v56, %s4777_s17 }
0x176b   :  { %v2674_v29 = vpop.permute.xlu1 %2673 }
0x176c   :  { %v2676_v62 = vmul.f32 %v4429_v12, %v2674_v29 }
0x176e   :  { %2679 = vrot.lane.b32.xlu0 %v2676_v62, %s4774_s15 }
0x17e0   :  { %v2680_v59 = vpop.permute.xlu0 %2679 }
0x17e1   :  { %3961 = vmatmul.mubr.msk.f32.vlgmr.msra.gmra.mrb[32].mxu0 %vm340_vm2, %v2680_v59  ;;  %v2980_v59 = vld [vmem:[#allocation3 + $0xa] sm:$0x3] }
0x17e2   :  { %4258 = vmatpush3.bf16.msra.mxu0 %v5337_v49  ;;  %3982 = vmatprep.mubr.msk.f32.mxu0 %vm4775_vm1, %v4772_v0 }
0x17e3   :  { %4259 = vmatprep.subr.bf16.mxu0 %v4773_v19 }
0x17e6   :  { %4261 = vmatpush3.bf16.msra.mxu0 %v5340_v51 }
0x17e7   :  { %4268 = vmatprep.subr.bf16.mxu0 %v4773_v19 }
0x18b4   :  { %v2749_v63 = vpop.f32.mrb[32].mxu0 }
0x18b5   :  { %v2753_v15 = vadd.f32 %v2749_v63, %v2677_v60  ;;  %v3962_v2 = vpop.f32.mrb[33].mxu0 }
0x18b7   :  { %4432 = vtanh.f32 %v2753_v15  ;;  %v3605_v17 = vmul.f32 -1.442695, %v2753_v15 }
0x18b9   :  { %4434 = vpow2.f32 %v3605_v17 }
0x18c1   :  { %v4433_v16 = vpop.eup %4432 }
0x18c2   :  { %2763 = vrot.lane.b32.xlu1 %v4433_v16, %s4777_s17 }
0x18c3   :  { %v4435_v20 = vpop.eup %4434 }
0x18c4   :  { %v2757_v21 = vadd.f32 1.0, %v4435_v20 }
0x18c6   :  { %4436 = vrcp.f32 %v2757_v21 }
0x18d0   :  { %v4437_v22 = vpop.eup %4436 }
0x18d1   :  { %v2761_v10 = vmul.f32 %v4437_v22, %v2670_v9 }
0x1934   :  { %v2764_v24 = vpop.permute.xlu1 %2763 }
0x1935   :  { %v2766_v25 = vmul.f32 %v4437_v22, %v2764_v24 }
0x1937   :  { %2768 = vrot.lane.b32.xlu0 %v2766_v25, %s4777_s17 }
0x19a9   :  { %v2769_v26 = vpop.permute.xlu0 %2768 }
0x19aa   :  { %v2771_v28 = vadd.f32 %v2769_v26, %v2761_v10 }
0x19ac   :  { %4438 = vtanh.f32 %v2771_v28 }
0x19b6   :  { %v4439_v30 = vpop.eup %4438 }
0x19b7   :  { %2774 = vrot.lane.b32.xlu1 %v4439_v30, %s4777_s17  ;;  %v3081_v30 = vld [vmem:[#allocation3 + $0xc] sm:$0x3] }
0x1a29   :  { %v2775_v18 = vpop.permute.xlu1 %2774 }
0x1a2a   :  { %v2777_v31 = vmul.f32 %v4437_v22, %v2775_v18 }
0x1a2c   :  { %2780 = vrot.lane.b32.xlu0 %v2777_v31, %s4774_s15 }
0x1a9e   :  { %v2781_v32 = vpop.permute.xlu0 %2780 }
0x1a9f   :  { %3972 = vmatmul.mubr.msk.f32.vlgmr.msra.gmra.mrb[24].mxu1 %vm340_vm2, %v2781_v32 }
0x1aa0   :  { %4264 = vmatpush3.bf16.msra.mxu1 %v5337_v49  ;;  %3993 = vmatprep.mubr.msk.f32.mxu1 %vm4775_vm1, %v4772_v0 }
0x1aa1   :  { %4265 = vmatprep.subr.bf16.mxu1 %v4773_v19 }
0x1aa4   :  { %4267 = vmatpush3.bf16.msra.mxu1 %v5340_v51 }
0x1aa5   :  { %4274 = vmatprep.subr.bf16.mxu1 %v4773_v19 }
0x1b72   :  { %v2850_v34 = vpop.f32.mrb[24].mxu1 }
0x1b73   :  { %v2854_v36 = vadd.f32 %v2850_v34, %v2778_v33  ;;  %v3973_v37 = vpop.f32.mrb[25].mxu1 }
0x1b75   :  { %4440 = vtanh.f32 %v2854_v36  ;;  %v3607_v38 = vmul.f32 -1.442695, %v2854_v36 }
0x1b77   :  { %4442 = vpow2.f32 %v3607_v38 }
0x1b7f   :  { %v4441_v35 = vpop.eup %4440 }
0x1b80   :  { %2864 = vrot.lane.b32.xlu1 %v4441_v35, %s4777_s17 }
0x1b81   :  { %v4443_v39 = vpop.eup %4442 }
0x1b82   :  { %v2858_v40 = vadd.f32 1.0, %v4443_v39 }
0x1b84   :  { %4444 = vrcp.f32 %v2858_v40 }
0x1b8e   :  { %v4445_v41 = vpop.eup %4444 }
0x1b8f   :  { %v2862_v27 = vmul.f32 %v4445_v41, %v2771_v28 }
0x1bf2   :  { %v2865_v44 = vpop.permute.xlu1 %2864 }
0x1bf3   :  { %v2867_v42 = vmul.f32 %v4445_v41, %v2865_v44 }
0x1bf5   :  { %2869 = vrot.lane.b32.xlu0 %v2867_v42, %s4777_s17 }
0x1c67   :  { %v2870_v45 = vpop.permute.xlu0 %2869 }
0x1c68   :  { %v2872_v50 = vadd.f32 %v2870_v45, %v2862_v27  ;;  %v3599_v27 = vld [vmem:[#allocation18] ss:$0 sm:$0xff] }
0x1c69   :  { %v2534_v45 = vadd.f32 %v3599_v27, %v5334_v23 }
0x1c6a   :  { %4446 = vtanh.f32 %v2872_v50 }
0x1c74   :  { %v4447_v52 = vpop.eup %4446 }
0x1c75   :  { %2875 = vrot.lane.b32.xlu1 %v4447_v52, %s4777_s17 }
0x1ce7   :  { %v2876_v55 = vpop.permute.xlu1 %2875 }
0x1ce8   :  { %v2878_v57 = vmul.f32 %v4445_v41, %v2876_v55 }
0x1cea   :  { %2881 = vrot.lane.b32.xlu0 %v2878_v57, %s4774_s15  ;;  %v3600_v57 = vmul.f32 -1.442695, %v2534_v45 }
0x1d5c   :  { %v2882_v58 = vpop.permute.xlu0 %2881 }
0x1d5d   :  { %3983 = vmatmul.mubr.msk.f32.vlgmr.msra.gmra.mrb[34].mxu0 %vm340_vm2, %v2882_v58 }
0x1d5e   :  { %4270 = vmatpush3.bf16.msra.mxu0 %v5337_v49  ;;  %4004 = vmatprep.mubr.msk.f32.mxu0 %vm4775_vm1, %v4772_v0 }
0x1d5f   :  { %4271 = vmatprep.subr.bf16.mxu0 %v4773_v19 }
0x1d62   :  { %4273 = vmatpush3.bf16.msra.mxu0 %v5340_v51 }
0x1e30   :  { %v2951_v47 = vpop.f32.mrb[34].mxu0 }
0x1e31   :  { %v2955_v1 = vadd.f32 %v2951_v47, %v2879_v61  ;;  %v3984_v43 = vpop.f32.mrb[35].mxu0 }
0x1e33   :  { %4448 = vtanh.f32 %v2955_v1  ;;  %v3609_v7 = vmul.f32 -1.442695, %v2955_v1 }
0x1e35   :  { %4450 = vpow2.f32 %v3609_v7  ;;  %v3292_v7 = vld [vmem:[%s5520_s12 + $0x8] sm:$0xff] }
0x1e3d   :  { %v4449_v3 = vpop.eup %4448 }
0x1e3e   :  { %2965 = vrot.lane.b32.xlu1 %v4449_v3, %s4777_s17 }
0x1e3f   :  { %v4451_v11 = vpop.eup %4450 }
0x1e40   :  { %v2959_v46 = vadd.f32 1.0, %v4451_v11  ;;  %v3294_v11 = vld [vmem:[%s5520_s12 + $0x18] sm:$0xff] }
0x1e42   :  { %4452 = vrcp.f32 %v2959_v46  ;;  %v3291_v46 = vld [vmem:[%s5520_s12] sm:$0xff] }
0x1e4c   :  { %v4453_v12 = vpop.eup %4452 }
0x1e4d   :  { %v2963_v53 = vmul.f32 %v4453_v12, %v2872_v50 }
0x1eb0   :  { %v2966_v13 = vpop.permute.xlu1 %2965 }
0x1eb1   :  { %v2968_v48 = vmul.f32 %v4453_v12, %v2966_v13  ;;  %v3293_v13 = vld [vmem:[%s5520_s12 + $0x10] sm:$0xff] }
0x1eb3   :  { %2970 = vrot.lane.b32.xlu0 %v2968_v48, %s4777_s17  ;;  %v3296_v48 = vld [vmem:[%s5520_s12 + $0x28] sm:$0xff] }
0x1f25   :  { %v2971_v54 = vpop.permute.xlu0 %2970 }
0x1f26   :  { %v2973_v14 = vadd.f32 %v2971_v54, %v2963_v53  ;;  %v3298_v53 = vld [vmem:[%s5520_s12 + $0x38] sm:$0xff]  ;;  %v4282_v54 = vpack.c.bf16 %v3293_v13, %v3291_v46 }
0x1f28   :  { %4454 = vtanh.f32 %v2973_v14 }
0x1f32   :  { %v4455_v9 = vpop.eup %4454 }
0x1f33   :  { %2976 = vrot.lane.b32.xlu1 %v4455_v9, %s4777_s17  ;;  %v3295_v9 = vld [vmem:[%s5520_s12 + $0x20] sm:$0xff] }
0x1fa5   :  { %v2977_v56 = vpop.permute.xlu1 %2976 }
0x1fa6   :  { %v2979_v29 = vmul.f32 %v4453_v12, %v2977_v56  ;;  %v4280_v12 = vpack.c.bf16 %v3294_v11, %v3292_v7  ;;  %v3297_v56 = vld [vmem:[%s5520_s12 + $0x30] sm:$0xff] }
0x1fa8   :  { %2982 = vrot.lane.b32.xlu0 %v2979_v29, %s4774_s15  ;;  %4281 = vmatprep.subr.bf16.mxu0 %v4280_v12  ;;  %v4286_v29 = vpack.c.bf16 %v3297_v56, %v3295_v9 }
0x201a   :  { %v2983_v62 = vpop.permute.xlu0 %2982 }
0x201b   :  { %3994 = vmatmul.mubr.msk.f32.vlgmr.msra.gmra.mrb[26].mxu1 %vm340_vm2, %v2983_v62 }
0x201c   :  { %4276 = vmatpush3.bf16.msra.mxu1 %v5337_v49  ;;  %4015 = vmatprep.mubr.msk.f32.mxu1 %vm4775_vm1, %v4772_v0 }
0x201d   :  { %4277 = vmatprep.subr.bf16.mxu1 %v4773_v19 }
0x2020   :  { %4279 = vmatpush3.bf16.msra.mxu1 %v5340_v51 }
0x20ee   :  { %v3052_v60 = vpop.f32.mrb[26].mxu1 }
0x20ef   :  { %v3056_v63 = vadd.f32 %v3052_v60, %v2980_v59  ;;  %v3995_v15 = vpop.f32.mrb[27].mxu1  ;;  %v3182_v60 = vld [vmem:[#allocation3 + $0xe] sm:$0x3] }
0x20f1   :  { %4456 = vtanh.f32 %v3056_v63  ;;  %v3611_v16 = vmul.f32 -1.442695, %v3056_v63 }
0x20f3   :  { %4458 = vpow2.f32 %v3611_v16 }
0x20fb   :  { %v4457_v2 = vpop.eup %4456 }
0x20fc   :  { %3066 = vrot.lane.b32.xlu1 %v4457_v2, %s4777_s17 }
0x20fd   :  { %v4459_v17 = vpop.eup %4458 }
0x20fe   :  { %v3060_v20 = vadd.f32 1.0, %v4459_v17 }
0x2100   :  { %4460 = vrcp.f32 %v3060_v20 }
0x210a   :  { %v4461_v49 = vpop.eup %4460 }
0x210b   :  { %v3064_v19 = vmul.f32 %v4461_v49, %v2973_v14  ;;  %v4284_v14 = vpack.c.bf16 %v3298_v53, %v3296_v48 }
0x216e   :  { %v3067_v21 = vpop.permute.xlu1 %3066 }
0x216f   :  { %v3069_v22 = vmul.f32 %v4461_v49, %v3067_v21 }
0x2171   :  { %3071 = vrot.lane.b32.xlu0 %v3069_v22, %s4777_s17 }
0x21e3   :  { %v3072_v51 = vpop.permute.xlu0 %3071 }
0x21e4   :  { %v3074_v24 = vadd.f32 %v3072_v51, %v3064_v19 }
0x21e6   :  { %4462 = vtanh.f32 %v3074_v24 }
0x21f0   :  { %v4463_v25 = vpop.eup %4462 }
0x21f1   :  { %3077 = vrot.lane.b32.xlu1 %v4463_v25, %s4777_s17 }
0x2263   :  { %v3078_v10 = vpop.permute.xlu1 %3077 }
0x2264   :  { %v3080_v26 = vmul.f32 %v4461_v49, %v3078_v10 }
0x2266   :  { %3083 = vrot.lane.b32.xlu0 %v3080_v26, %s4774_s15  ;;  %v3284_v26 = vld [vmem:[%s5519_s11 + $0x8] sm:$0xff] }
0x22d8   :  { %v3084_v28 = vpop.permute.xlu0 %3083 }
0x22d9   :  { %4005 = vmatmul.mubr.msk.f32.vlgmr.msra.gmra.mrb[36].mxu0 %vm340_vm2, %v3084_v28  ;;  %v3283_v28 = vld [vmem:[%s5519_s11] sm:$0xff] }
0x22da   :  { %3368 = vmatprep.mubr.f32.mxu0 %v4772_v0  ;;  %4283 = vmatpush1.bf16.msra.mxu0 %v4282_v54 }
0x22db   :  { %4285 = vmatprep.subr.bf16.mxu0 %v4284_v14 }
0x22de   :  { %4287 = vmatpush1.bf16.msra.mxu0 %v4286_v29 }
0x23ac   :  { %v3153_v18 = vpop.f32.mrb[36].mxu0 }
0x23ad   :  { %v3157_v31 = vadd.f32 %v3153_v18, %v3081_v30  ;;  %v4006_v32 = vpop.f32.mrb[37].mxu0  ;;  %v3285_v18 = vld [vmem:[%s5519_s11 + $0x10] sm:$0xff] }
0x23ae   :  { %v3290_v32 = vld [vmem:[%s5519_s11 + $0x38] sm:$0xff] }
0x23af   :  { %4464 = vtanh.f32 %v3157_v31  ;;  %v3613_v34 = vmul.f32 -1.442695, %v3157_v31  ;;  %v3288_v31 = vld [vmem:[%s5519_s11 + $0x28] sm:$0xff] }
0x23b1   :  { %4466 = vpow2.f32 %v3613_v34  ;;  %v4292_v34 = vpack.c.bf16 %v3290_v32, %v3288_v31 }
0x23b9   :  { %v4465_v33 = vpop.eup %4464 }
0x23ba   :  { %3167 = vrot.lane.b32.xlu1 %v4465_v33, %s4777_s17  ;;  %v4290_v33 = vpack.c.bf16 %v3285_v18, %v3283_v28 }
0x23bb   :  { %v4467_v36 = vpop.eup %4466 }
0x23bc   :  { %v3161_v37 = vadd.f32 1.0, %v4467_v36  ;;  %v3287_v36 = vld [vmem:[%s5519_s11 + $0x20] sm:$0xff] }
0x23be   :  { %4468 = vrcp.f32 %v3161_v37  ;;  %v3289_v37 = vld [vmem:[%s5519_s11 + $0x30] sm:$0xff] }
0x23c8   :  { %v4469_v35 = vpop.eup %4468 }
0x23c9   :  { %v3165_v40 = vmul.f32 %v4469_v35, %v3074_v24 }
0x242c   :  { %v3168_v38 = vpop.permute.xlu1 %3167 }
0x242d   :  { %v3170_v39 = vmul.f32 %v4469_v35, %v3168_v38 }
0x242f   :  { %3172 = vrot.lane.b32.xlu0 %v3170_v39, %s4777_s17 }
0x24a1   :  { %v3173_v41 = vpop.permute.xlu0 %3172 }
0x24a2   :  { %v5409_v44 = vadd.f32 %v3173_v41, %v3165_v40 }
0x24a4   :  { %4470 = vtanh.f32 %v5409_v44 }
0x24a5   :  { %4472 = vtanh.f32 %v2534_v45 }
0x24a6   :  { %4474 = vpow2.f32 %v3600_v57 }
0x24ae   :  { %v4471_v42 = vpop.eup %4470 }
0x24af   :  { %3178 = vrot.lane.b32.xlu1 %v4471_v42, %s4777_s17  ;;  %v4473_v55 = vpop.eup %4472  ;;  %v3451_v42 = vld [vmem:[#allocation19] sm:$0x3] }
0x24b0   :  { %v4475_v58 = vpop.eup %4474  ;;  %v3456_v27 = vrot.slane %v3451_v42, %v212_v6 }
0x24b1   :  { %v2538_v61 = vadd.f32 1.0, %v4475_v58 }
0x24b3   :  { %4476 = vrcp.f32 %v2538_v61 }
0x24bd   :  { %v4477_v1 = vpop.eup %4476 }
0x2521   :  { %v3179_v50 = vpop.permute.xlu1 %3178 }
0x2522   :  { %v3181_v52 = vmul.f32 %v4469_v35, %v3179_v50  ;;  %v4294_v35 = vpack.c.bf16 %v3289_v37, %v3287_v36  ;;  %v3460_v50 = vrot.slane %v3451_v42, %v216_v8 }
0x2524   :  { %3184 = vrot.lane.b32.xlu0 %v3181_v52, %s4774_s15 }
0x2528   :  { %2543 = vrot.lane.b32.xlu0 %v4473_v55, %s4777_s17 }
0x2596   :  { %v3185_v47 = vpop.permute.xlu0 %3184 }
0x2597   :  { %4016 = vmatmul.mubr.msk.f32.vlgmr.msra.gmra.mrb[28].mxu1 %vm340_vm2, %v3185_v47 }
0x259a   :  { %v2544_v43 = vpop.permute.xlu0 %2543 }
0x259b   :  { %v2546_v3 = vmul.f32 %v4477_v1, %v2544_v43 }
0x259d   :  { %4478 = vtanh.f32 %v2546_v3 }
0x25a7   :  { %v4479_v23 = vpop.eup %4478 }
0x25a8   :  { %2549 = vrot.lane.b32.xlu0 %v4479_v23, %s4774_s15 }
0x261a   :  { %v2550_v62 = vpop.permute.xlu0 %2549 }
0x261b   :  { %v2552_v59 = vmul.f32 %v4477_v1, %v2550_v62 }
0x261d   :  { %3300 = vrot.lane.b32.xlu0 %v2552_v59, %s4774_s15 }
0x266a   :  { %v3254_v63 = vpop.f32.mrb[28].mxu1 }
0x266b   :  { %v3258_v15 = vadd.f32 %v3254_v63, %v3182_v60  ;;  %v4017_v2 = vpop.f32.mrb[29].mxu1 }
0x266d   :  { %4480 = vtanh.f32 %v3258_v15  ;;  %v3615_v20 = vmul.f32 -1.442695, %v3258_v15 }
0x266f   :  { %4482 = vpow2.f32 %v3615_v20 }
0x2677   :  { %v4481_v16 = vpop.eup %4480 }
0x2678   :  { %3268 = vrot.lane.b32.xlu1 %v4481_v16, %s4777_s17 }
0x2679   :  { %v4483_v49 = vpop.eup %4482 }
0x267a   :  { %v3262_v21 = vadd.f32 1.0, %v4483_v49 }
0x267c   :  { %4484 = vrcp.f32 %v3262_v21 }
0x2686   :  { %v4485_v22 = vpop.eup %4484 }
0x2687   :  { %v3266_v24 = vmul.f32 %v4485_v22, %v5409_v44  ;;  %v3466_v44 = vand.u32 127, %v210_v4 }
0x2689   :  { %v3467_v45 = vadd.s32 128, %v3466_v44  ;;  %vm3478_vm4 = vcmp.ge.s32.totalorder %v3466_v44, 4  ;;  %vm3468_vm8 = vcmp.eq.s32.totalorder %v3466_v44, 1  ;;  %vm3470_vm9 = vcmp.eq.s32.totalorder %v3466_v44, 3 }
0x268a   :  { %vm5484_vm10 = vmor %vm3468_vm8, %vm3470_vm9 }
0x268b   :  { %vm3481_vm5 = vcmp.lt.s32.totalorder %v3467_v45, 132  ;;  %vm3475_vm11 = vcmp.eq.s32.totalorder %v3467_v45, 133 }
0x268f   :  { %v3301_v17 = vpop.permute.xlu0 %3300 }
0x2690   :  { %3616 = vmatmul.mubr.msk.f32.vlgmr.msra.gmra.mrb[38].mxu0 %vm340_vm2, %v3301_v17  ;;  %v4778_v17 = vmov 1983009808  }
0x2691   :  { %3444 = vmatprep.mubr.f32.mxu0 %v4772_v0  ;;  %v3286_v0 = vld [vmem:[%s5519_s11 + $0x18] sm:$0xff]  ;;  %v3525_v20 = vunpack.c.l.s4 %v4778_v17  ;;  %s4779_s11 = smov [#allocation21]  }
0x2692   :  { %v4288_v30 = vpack.c.bf16 %v3286_v0, %v3284_v26 }
0x2693   :  { %v3526_v49 = vunpack.c.0.s8 %v3525_v20 }
0x2694   :  { %4289 = vmatprep.subr.bf16.mxu0 %v4288_v30 }
0x2695   :  { %4291 = vmatpush1.bf16.msra.mxu0 %v4290_v33 }
0x2696   :  { %4293 = vmatprep.subr.bf16.mxu0 %v4292_v34 }
0x2699   :  { %4295 = vmatpush1.bf16.msra.mxu0 %v4294_v35 }
0x26ea   :  { %v3269_v19 = vpop.permute.xlu1 %3268 }
0x26eb   :  { %v3271_v51 = vmul.f32 %v4485_v22, %v3269_v19 }
0x26ed   :  { %3273 = vrot.lane.b32.xlu1 %v3271_v51, %s4777_s17 }
0x275f   :  { %v3274_v25 = vpop.permute.xlu1 %3273 }
0x2760   :  { %v3276_v10 = vadd.f32 %v3274_v25, %v3266_v24  ;;  %v3529_v25 = vsub.s32 %v3526_v49, %v5011_v5 }
0x2762   :  { %4486 = vtanh.f32 %v3276_v10 }
0x276c   :  { %v4487_v38 = vpop.eup %4486 }
0x276d   :  { %3279 = vrot.lane.b32.xlu1 %v4487_v38, %s4777_s17 }
0x27df   :  { %v3280_v39 = vpop.permute.xlu1 %3279 }
0x27e0   :  { %v3282_v40 = vmul.f32 %v4485_v22, %v3280_v39 }
0x27e2   :  { %3376 = vrot.lane.b32.xlu1 %v3282_v40, %s4774_s15  ;;  %s3541_s15 = sshll.u32 %s4779_s11, 4  ;;  %s3542_s15 = int_to_ptr.vmem [resolvable:$true] %s3541_s15 }
0x27e3   :  { %s4722_s17 = scalar_lea.vmem %s3542_s15, 64  ;;  %p4727_p11 = scmp.lt.s32.totalorder %s3542_s15, %s3542_s15 }
0x27e4   :  { %p4723_p10 = scmp.ne.s32.totalorder %s3542_s15, %s4722_s17  ;;  %p4728_p12 = scmp.lt.s32.totalorder %s4722_s17, %s4722_s17 }
0x27e6   :  { %p4729_p13 = por %p4728_p12, %p4727_p11 }
0x27e8   :  { %p4730_p0 = pnand %p4729_p13, %p4723_p10 }
0x2854   :  { %v3377_v41 = vpop.permute.xlu1 %3376 }
0x2855   :  { %3617 = vmatmul.mubr.msk.f32.vlgmr.msra.gmra.mrb[38].mxu0 %vm340_vm2, %v3377_v41 }
0x2928   :  { %v3446_v52 = vpop.f32.mrb[38].mxu0 }
0x2929   :  { %v3463_v55 = vadd.f32 %v3456_v27, %v3446_v52  ;;  %v3448_v57 = vpop.f32.mrb[39].mxu0 }
0x292a   :  { %v3464_v58 = vadd.f32 %v3460_v50, %v3448_v57 }
0x292b   :  { %v3513_v61 = vmul.f32 1.442695, %v3463_v55  ;;  %v3484_v47 = vsel %vm3478_vm4, %v3463_v55, -1e+30 }
0x292c   :  { %v3515_v4 = vmul.f32 1.442695, %v3464_v58  ;;  %v3485_v1 = vsel %vm3481_vm5, %v3464_v58, -1e+30  ;;  %v3487_v6 = vsel %vm3486_vm6, %v3484_v47, -inf }
0x292d   :  { %4488 = vpow2.f32 %v3513_v61  ;;  %v3489_v43 = vsel %vm3488_vm7, %v3485_v1, -inf }
0x292e   :  { %4490 = vpow2.f32 %v3515_v4  ;;  %v3490_v8 = vmax.f32 %v3487_v6, %v3489_v43 }
0x2930   :  { %3491 = vmax.xlane.f32.xlu0 %v3490_v8 }
0x2937   :  { %v4489_v23 = vpop.eup %4488 }
0x2938   :  { %v4491_v7 = vpop.eup %4490  ;;  %v3517_v11 = vsel %vm5484_vm10, %v4489_v23, %v3463_v55 }
0x2939   :  { %v3518_v46 = vsel %vm3475_vm11, %v4491_v7, %v3464_v58 }
0x29bd   :  { %v3492_v12 = vpop.xlane.xlu0 %3491 }
0x29be   :  { %v3493_v13 = vsub.f32 %v3484_v47, %v3492_v12  ;;  %v3494_v48 = vsub.f32 %v3485_v1, %v3492_v12 }
0x29c0   :  { %v3495_v53 = vmul.f32 1.442695, %v3493_v13  ;;  %v3497_v54 = vmul.f32 1.442695, %v3494_v48 }
0x29c2   :  { %4492 = vpow2.f32 %v3495_v53 }
0x29c3   :  { %4494 = vpow2.f32 %v3497_v54 }
0x29cc   :  { %v4493_v14 = vpop.eup %4492 }
0x29cd   :  { %v4495_v9 = vpop.eup %4494  ;;  %v3499_v56 = vsel %vm3486_vm6, %v4493_v14, 0.0 }
0x29ce   :  { %v3500_v29 = vsel %vm3488_vm7, %v4495_v9, 0.0 }
0x29cf   :  { %v3501_v62 = vadd.f32 %v3500_v29, %v3499_v56 }
0x29d1   :  { %3502 = vadd.xlane.f32.xlu1 %v3501_v62 }
0x2a5e   :  { %v3503_v59 = vpop.xlane.xlu1 %3502 }
0x2a5f   :  { %4496 = vrcp.f32 %v3503_v59 }
0x2a69   :  { %v4497_v60 = vpop.eup %4496 }
0x2a6a   :  { %v3505_v63 = vmul.f32 %v4497_v60, %v4493_v14  ;;  %v3506_v15 = vmul.f32 %v4497_v60, %v4495_v9 }
0x2a6c   :  { %v3507_v2 = vadd.f32 1e-10, %v3505_v63  ;;  %v3508_v16 = vadd.f32 1e-10, %v3506_v15 }
0x2a6e   :  { %4498 = vlog2.f32 %v3507_v2 }
0x2a6f   :  { %4500 = vlog2.f32 %v3508_v16 }
0x2a78   :  { %v4499_v21 = vpop.eup %4498 }
0x2a79   :  { %v4501_v22 = vpop.eup %4500  ;;  %v3510_v19 = vmul.f32 0.6931472, %v4499_v21 }
0x2a7a   :  { %v3512_v51 = vmul.f32 0.6931472, %v4501_v22 }
0x2a7b   :  { %v3519_v24 = vsel %vm3478_vm4, %v3510_v19, %v3517_v11 }
0x2a7c   :  { %v3520_v10 = vsel %vm3481_vm5, %v3512_v51, %v3518_v46 }
0x2a7d   :  { %v3523_v26 = vcombine.low %v3519_v24, %v3520_v10 }
0x2a7f   :  { %v3530_v0 = vrot.slane %v3523_v26, %v3529_v25 }
0x2a81   :  { %3534 = vst.msk [vmem:[#allocation21] sm:$0xf] %vm3533_vm13, %v3530_v0 }
0x2a82   :  { %4733 = shalt.err (!%p4730_p0)
}
0x2a83   :  { %s4734_s30 = scalar_lea.hbm %s5522_s14, 64 }
0x2a84   :  { %p4735_p1 = scmp.ne.s32.totalorder %s5522_s14, %s4734_s30  ;;  %p4738_p2 = scmp.lt.u32.totalorder %s4734_s30, %s5522_s14 }
0x2a86   :  { %p4740_p3 = pnand %p4738_p2, %p4735_p1 }
0x2a88   :  { %4743 = shalt.err (!%p4740_p3)
}
0x2a89   :  { %3544 = dma.vmem_to_hbm [thread:$0]  %s3542_s15, 64, %s5522_s14, [#allocation6]  }
0x2a8a   :  { %4756 = dma.done.wait [#allocation6], 64  }
0x2a8b   :  { %4757 = vsyncadd [#allocation6], 4294967232 }
0x2a8c   :  { %3548 = vsyncpa [#allocation5], 1 }
0x2a8d   :  { %3549 = vsyncpa [#allocation8], 1 }
0x2a8e   :  { %3550 = vsyncpa [#allocation11], 1 }
0x2a8f   :  { %3551 = vsyncpa [#allocation14], 1 }
0x2a90   :  { %3552 = vsyncpa [#allocation17], 1 }
0x2a91   :  { %3553 = vsyncpa [#allocation20], 1 }
0x2a92   :  { %3554 = vsyncpa [#allocation6], 1 }

</bundles_post_ra>
